<compile_context>
chip_gen: v5e
topology: v5e:2x2
jax: 0.10.0
libtpu: 0.0.40
codegen_flags: <defaults>
</compile_context>

<pallas_src>
import jax
import jax.numpy as jnp
from jax import lax
from jax.experimental import pallas as pl
from jax.experimental.pallas import tpu as pltpu

# Small, TPU-friendly shapes consistent with the module (defaults nbin=513,
# ncell=128, nhid=513; we shrink nbin/nhid to 128, keep ncell=128).
NBIN = 128
NCELL = 128
NHID = 128
T = 8
EPS = 1e-5


def _detect_v6_or_newer():
  """True on v6e/v7x-class chips (256-deep MXU, bf16 EUP); False otherwise."""
  try:
    kind = jax.devices()[0].device_kind.lower()
  except Exception:
    return False
  return any(s in kind for s in ("v6", "v7", "7x"))


USE_V6_PATH = _detect_v6_or_newer()


def _gate_update(gates, c_prev):
  """LSTM cell update from fused (1, 8C) gate pre-activations.

  Lane layout of `gates`: [i_f f_f g_f o_f | i_b f_b g_b o_b], each block C
  lanes; g-gate pre-activations are pre-scaled by 2 so tanh(g) = 2*sig(2g)-1.
  State c_prev / returned h,c are (1, 2C) f32 (fwd lanes [0,C), bwd [C,2C)).
  """
  C = NCELL
  if USE_V6_PATH:
    # bf16 EUP on v6e/v7x: one sigmoid pass over all 8C gate lanes.
    gs = jax.nn.sigmoid(gates.astype(jnp.bfloat16))
  else:
    gs = jax.nn.sigmoid(gates)
  # All joins below are 128-aligned lane concats (vreg placement, no repack).
  i_g = jnp.concatenate([gs[:, 0 * C:1 * C], gs[:, 4 * C:5 * C]],
                        axis=1).astype(jnp.float32)
  f_g = jnp.concatenate([gs[:, 1 * C:2 * C], gs[:, 5 * C:6 * C]],
                        axis=1).astype(jnp.float32)
  g_g = jnp.concatenate([gs[:, 2 * C:3 * C], gs[:, 6 * C:7 * C]],
                        axis=1).astype(jnp.float32) * 2.0 - 1.0
  o_g = jnp.concatenate([gs[:, 3 * C:4 * C], gs[:, 7 * C:8 * C]],
                        axis=1).astype(jnp.float32)
  c_new = f_g * c_prev + i_g * g_g                      # f32 accumulation
  if USE_V6_PATH:
    t_c = jnp.tanh(c_new.astype(jnp.bfloat16)).astype(jnp.float32)
  else:
    t_c = jnp.tanh(c_new)
  h_new = o_g * t_c
  return h_new, c_new


def _bidir_recurrence(xgate_fn, rec_fn):
  """Fused fwd/bwd LSTM recurrence; iteration i handles fwd t=i, bwd t=T-1-i.

  xgate_fn(t_f, t_b) -> (1, 8C) input-gate contribution.
  rec_fn(h_bf16)     -> (1, 8C) recurrent contribution from (1, 2C) state.
  Returns the (T, 2C) bidirectional hidden sequence (fc2 input).
  """
  C = NCELL
  row_ids = lax.broadcasted_iota(jnp.int32, (T, 1), 0)
  h = jnp.zeros((1, 2 * C), jnp.float32)
  c = jnp.zeros((1, 2 * C), jnp.float32)
  # Hidden history kept in registers (select-accumulate), no per-step stores.
  hs_f = jnp.zeros((T, C), jnp.float32)
  hs_b = jnp.zeros((T, C), jnp.float32)
  for i in range(T):                 # T is small & static: trace-time unroll
    t_f, t_b = i, T - 1 - i
    gates = xgate_fn(t_f, t_b) + rec_fn(h.astype(jnp.bfloat16))
    h, c = _gate_update(gates, c)
    hs_f = jnp.where(row_ids == t_f, h[:, 0:C], hs_f)
    hs_b = jnp.where(row_ids == t_b, h[:, C:2 * C], hs_b)
  return jnp.concatenate([hs_f, hs_b], axis=1)          # (T, 2C), lane concat


def _dense_stack(hseq, w2, b2, g2, be2, w3, b3, g3, be3, wh, bh):
  """fc2/bn2 -> fc3/bn3 -> merged sigmoid heads; returns (T, 2*NBIN) masks."""
  def batchnorm(v, gamma, beta):
    mean = jnp.mean(v, axis=0, keepdims=True)
    d = v - mean
    var = jnp.mean(d * d, axis=0, keepdims=True)        # biased (train mode)
    return d * (lax.rsqrt(var + EPS) * gamma) + beta

  out2 = batchnorm(
      jnp.dot(hseq.astype(jnp.bfloat16), w2,
              preferred_element_type=jnp.float32) + b2, g2, be2)
  out3 = batchnorm(
      jnp.dot(out2.astype(jnp.bfloat16), w3,
              preferred_element_type=jnp.float32) + b3, g3, be3)
  # Merged speech|noise heads: one matmul + one sigmoid over (T, 2*NBIN).
  return jax.nn.sigmoid(
      jnp.dot(out3.astype(jnp.bfloat16), wh,
              preferred_element_type=jnp.float32) + bh)


def mask_estimator_kernel(
    # inputs
    x_ref,
    wih_all_ref, b_all_ref, whh_ref,
    w2_ref, b2_ref, g2_ref, be2_ref,
    w3_ref, b3_ref, g3_ref, be3_ref,
    wh_ref, bh_ref,
    # outputs
    s_out_ref, n_out_ref,
    # scratch
    xg_ref,
):
  C = NCELL

  # Fused input projection for BOTH directions: one (T,NBIN)x(NBIN,8C) matmul.
  # Columns [0,4C) = forward gates, [4C,8C) = backward gates (g-gate blocks
  # pre-scaled by 2 host-side for the single-sigmoid trick).
  xg_ref[...] = jnp.dot(
      x_ref[...], wih_all_ref[...],
      preferred_element_type=jnp.float32) + b_all_ref[...]

  def xgate(t_f, t_b):
    # Static, 128-aligned lane slices + lane concat -> (1, 8C).
    return jnp.concatenate(
        [xg_ref[t_f:t_f + 1, 0:4 * C],
         xg_ref[t_b:t_b + 1, 4 * C:8 * C]], axis=1)

  if USE_V6_PATH:
    # One block-diagonal recurrent matmul per step: K=2C=256 fills the MXU.
    whh = whh_ref[...]
    rec_fn = lambda h_bf: jnp.dot(h_bf, whh,
                                  preferred_element_type=jnp.float32)
  else:
    # v5-class (128-deep MXU): keep two K=128 dots, join with a lane concat.
    whh_f = whh_ref[0:C, 0:4 * C]
    whh_b = whh_ref[C:2 * C, 4 * C:8 * C]
    rec_fn = lambda h_bf: jnp.concatenate(
        [jnp.dot(h_bf[:, 0:C], whh_f, preferred_element_type=jnp.float32),
         jnp.dot(h_bf[:, C:2 * C], whh_b, preferred_element_type=jnp.float32)],
        axis=1)

  hseq = _bidir_recurrence(xgate, rec_fn)               # (T, 2C) f32

  masks = _dense_stack(
      hseq,
      w2_ref[...], b2_ref[...], g2_ref[...], be2_ref[...],
      w3_ref[...], b3_ref[...], g3_ref[...], be3_ref[...],
      wh_ref[...], bh_ref[...])
  s_out_ref[...] = masks[:, 0:NBIN]
  n_out_ref[...] = masks[:, NBIN:2 * NBIN]


def blstm_mask_estimator(y_abs, kparams):
  """y_abs: (T, NBIN) f32 magnitude spectrogram (PyTorch view (1, T, nbin))."""
  # Pre-cast the input to bf16 (halves input DMA bytes; the first matmul
  # consumes bf16 anyway).
  args = (y_abs.astype(jnp.bfloat16),) + tuple(kparams)
  vmem_spec = lambda: pl.BlockSpec(memory_space=pltpu.MemorySpace.VMEM)
  return pl.pallas_call(
      mask_estimator_kernel,
      out_shape=(
          jax.ShapeDtypeStruct((T, NBIN), jnp.float32),
          jax.ShapeDtypeStruct((T, NBIN), jnp.float32),
      ),
      in_specs=[vmem_spec() for _ in args],
      out_specs=(vmem_spec(), vmem_spec()),
      scratch_shapes=[
          pltpu.VMEM((T, 8 * NCELL), jnp.float32),  # fused input gates f|b
      ],
  )(*args)


def init_params(key):
  """Deterministic parameter init mirroring the PyTorch module's shapes."""
  ks = jax.random.split(key, 10)

  def xavier_t(k, fan_in, fan_out):
    # xavier_normal_ on a (out, in) weight, returned pre-transposed (in, out).
    std = (2.0 / (fan_in + fan_out)) ** 0.5
    return std * jax.random.normal(k, (fan_in, fan_out), jnp.float32)

  def lstm_uniform(k, shape):
    bound = 1.0 / (NCELL ** 0.5)  # PyTorch LSTM default init
    return jax.random.uniform(k, shape, jnp.float32, -bound, bound)

  # LSTM forward direction (weights pre-transposed to (in, 4*NCELL)).
  wih_f = lstm_uniform(ks[0], (NBIN, 4 * NCELL))
  whh_f = lstm_uniform(ks[1], (NCELL, 4 * NCELL))
  bf = lstm_uniform(ks[2], (1, 4 * NCELL)) + lstm_uniform(ks[3], (1, 4 * NCELL))
  # LSTM backward direction.
  wih_b = lstm_uniform(ks[4], (NBIN, 4 * NCELL))
  whh_b = lstm_uniform(ks[5], (NCELL, 4 * NCELL))
  bb = lstm_uniform(ks[6], (1, 4 * NCELL)) + lstm_uniform(ks[7], (1, 4 * NCELL))

  # Linear layers: xavier_normal weight, zero bias (per init_linear).
  w2 = xavier_t(ks[8], 2 * NCELL, NHID)
  b2 = jnp.zeros((1, NHID), jnp.float32)
  g2 = jnp.ones((1, NHID), jnp.float32)    # BatchNorm1d weight (default 1)
  be2 = jnp.zeros((1, NHID), jnp.float32)  # BatchNorm1d bias (default 0)

  w3 = xavier_t(jax.random.fold_in(key, 100), NHID, NHID)
  b3 = jnp.zeros((1, NHID), jnp.float32)
  g3 = jnp.ones((1, NHID), jnp.float32)
  be3 = jnp.zeros((1, NHID), jnp.float32)

  ws = xavier_t(ks[9], NHID, NBIN)
  bs = jnp.zeros((1, NBIN), jnp.float32)
  wn = xavier_t(jax.random.fold_in(key, 200), NHID, NBIN)
  bnn = jnp.zeros((1, NBIN), jnp.float32)

  return (wih_f, whh_f, bf, wih_b, whh_b, bb,
          w2, b2, g2, be2, w3, b3, g3, be3,
          ws, bs, wn, bnn)


def prep_kernel_params(params):
  """Host-side plumbing: merge weights, block-diag whh, pre-scale g-gates."""
  (wih_f, whh_f, bf, wih_b, whh_b, bb,
   w2, b2, g2, be2, w3, b3, g3, be3,
   ws, bs, wn, bnn) = params
  C = NCELL

  def scale_g(w):  # multiply the g-gate (3rd) block of the 4C gate axis by 2
    return w.at[..., 2 * C:3 * C].multiply(2.0)

  wih_all = jnp.concatenate(
      [scale_g(wih_f), scale_g(wih_b)], axis=1).astype(jnp.bfloat16)
  b_all = jnp.concatenate([scale_g(bf), scale_g(bb)], axis=1)       # f32

  # Block-diagonal recurrent weight: rows [0,C)=whh_f -> cols [0,4C),
  # rows [C,2C)=whh_b -> cols [4C,8C).  v5 path slices the diagonal blocks.
  whh_bd = jnp.zeros((2 * C, 8 * C), jnp.float32)
  whh_bd = whh_bd.at[0:C, 0:4 * C].set(scale_g(whh_f))
  whh_bd = whh_bd.at[C:2 * C, 4 * C:8 * C].set(scale_g(whh_b))
  whh_bd = whh_bd.astype(jnp.bfloat16)

  w_heads = jnp.concatenate([ws, wn], axis=1).astype(jnp.bfloat16)  # (NHID,2*NBIN)
  b_heads = jnp.concatenate([bs, bnn], axis=1)
  return (wih_all, b_all, whh_bd,
          w2.astype(jnp.bfloat16), b2, g2, be2,
          w3.astype(jnp.bfloat16), b3, g3, be3,
          w_heads, b_heads)


def reference_forward(y_abs_bf16, kparams):
  """Pure-JAX mirror of the kernel math (same bf16 weights) for validation."""
  (wih_all, b_all, whh_bd,
   w2, b2, g2, be2, w3, b3, g3, be3, wh, bh) = kparams
  C = NCELL
  xg = jnp.dot(y_abs_bf16, wih_all,
               preferred_element_type=jnp.float32) + b_all

  def xgate(t_f, t_b):
    return jnp.concatenate(
        [xg[t_f:t_f + 1, 0:4 * C], xg[t_b:t_b + 1, 4 * C:8 * C]], axis=1)

  rec_fn = lambda h_bf: jnp.dot(h_bf, whh_bd,
                                preferred_element_type=jnp.float32)
  hseq = _bidir_recurrence(xgate, rec_fn)
  masks = _dense_stack(hseq, w2, b2, g2, be2, w3, b3, g3, be3, wh, bh)
  return masks[:, :NBIN], masks[:, NBIN:]


if __name__ == "__main__":
  key = jax.random.PRNGKey(0)
  kx, kp = jax.random.split(key)
  # Magnitude spectrogram input: (T, NBIN), non-negative.
  y_abs = jax.random.uniform(kx, (T, NBIN), jnp.float32)
  params = init_params(kp)
  kparams = prep_kernel_params(params)

  run = jax.jit(blstm_mask_estimator)
  s_mask, n_mask = jax.block_until_ready(run(y_abs, kparams))

  # Basic sanity.
  assert s_mask.shape == (T, NBIN) and n_mask.shape == (T, NBIN)
  assert s_mask.dtype == jnp.float32 and n_mask.dtype == jnp.float32
  assert bool(jnp.all(jnp.isfinite(s_mask))) and bool(jnp.all(jnp.isfinite(n_mask)))
  assert bool(jnp.all((s_mask >= 0.0) & (s_mask <= 1.0)))
  assert bool(jnp.all((n_mask >= 0.0) & (n_mask <= 1.0)))

  # Numerical check against a pure-JAX mirror of the same (bf16-weight) math.
  s_ref, n_ref = jax.jit(reference_forward)(y_abs.astype(jnp.bfloat16), kparams)
  assert bool(jnp.allclose(s_mask, s_ref, atol=3e-2)), "speech mask mismatch"
  assert bool(jnp.allclose(n_mask, n_ref, atol=3e-2)), "noise mask mismatch"

  print("KERNEL_OK")
</pallas_src>

<mosaic_0001>
module attributes {stable_mosaic.version = 11 : i64} {
  func.func @mask_estimator_kernel(%arg0: memref<8x128xbf16, #tpu.memory_space<vmem>>, %arg1: memref<128x1024xbf16, #tpu.memory_space<vmem>>, %arg2: memref<1x1024xf32, #tpu.memory_space<vmem>>, %arg3: memref<256x1024xbf16, #tpu.memory_space<vmem>>, %arg4: memref<256x128xbf16, #tpu.memory_space<vmem>>, %arg5: memref<1x128xf32, #tpu.memory_space<vmem>>, %arg6: memref<1x128xf32, #tpu.memory_space<vmem>>, %arg7: memref<1x128xf32, #tpu.memory_space<vmem>>, %arg8: memref<128x128xbf16, #tpu.memory_space<vmem>>, %arg9: memref<1x128xf32, #tpu.memory_space<vmem>>, %arg10: memref<1x128xf32, #tpu.memory_space<vmem>>, %arg11: memref<1x128xf32, #tpu.memory_space<vmem>>, %arg12: memref<128x256xbf16, #tpu.memory_space<vmem>>, %arg13: memref<1x256xf32, #tpu.memory_space<vmem>>, %arg14: memref<8x128xf32, #tpu.memory_space<vmem>>, %arg15: memref<8x128xf32, #tpu.memory_space<vmem>>, %arg16: memref<8x1024xf32, #tpu.memory_space<vmem>>) attributes {dimension_semantics = [], scalar_prefetch = 0 : i64, scratch_operands = 1 : i64, tpu.core_type = #tpu.core_type<tc>} {
    %c0 = arith.constant 0 : index
    %c0_0 = arith.constant 0 : index
    %0 = vector.load %arg0[%c0, %c0_0] : memref<8x128xbf16, #tpu.memory_space<vmem>>, vector<8x128xbf16>
    %c0_1 = arith.constant 0 : index
    %c0_2 = arith.constant 0 : index
    %1 = vector.load %arg1[%c0_1, %c0_2] : memref<128x1024xbf16, #tpu.memory_space<vmem>>, vector<128x1024xbf16>
    %cst = arith.constant dense<0.000000e+00> : vector<8x1024xf32>
    %2 = tpu.matmul %0, %1, %cst {dimension_numbers = #tpu.dot_dimension_numbers<[1], [0], [0], [1], [0, 0, 1, 1], [], []>} : vector<8x128xbf16>, vector<128x1024xbf16>, vector<8x1024xf32> -> vector<8x1024xf32>
    %c0_3 = arith.constant 0 : index
    %c0_4 = arith.constant 0 : index
    %3 = vector.load %arg2[%c0_3, %c0_4] : memref<1x1024xf32, #tpu.memory_space<vmem>>, vector<1x1024xf32>
    %4 = vector.broadcast %3 : vector<1x1024xf32> to vector<8x1024xf32>
    %5 = arith.addf %2, %4 : vector<8x1024xf32>
    %c0_5 = arith.constant 0 : index
    %c0_6 = arith.constant 0 : index
    %6 = vector.load %arg16[%c0_5, %c0_6] : memref<8x1024xf32, #tpu.memory_space<vmem>>, vector<8x1024xf32>
    tpu.vector_store %arg16[%c0_5, %c0_6], %5 {strides = array<i32>} : memref<8x1024xf32, #tpu.memory_space<vmem>>, vector<8x1024xf32>,
    %c0_7 = arith.constant 0 : index
    %c0_8 = arith.constant 0 : index
    %7 = vector.load %arg3[%c0_7, %c0_8] : memref<256x1024xbf16, #tpu.memory_space<vmem>>, vector<128x512xbf16>
    %c128 = arith.constant 128 : index
    %c512 = arith.constant 512 : index
    %8 = vector.load %arg3[%c128, %c512] : memref<256x1024xbf16, #tpu.memory_space<vmem>>, vector<128x512xbf16>
    %9 = tpu.iota {dimensions = array<i32: 0>} : vector<8x1xi32>
    %cst_9 = arith.constant 0.000000e+00 : f32
    %10 = vector.broadcast %cst_9 : f32 to vector<1x256xf32>
    %cst_10 = arith.constant 0.000000e+00 : f32
    %11 = vector.broadcast %cst_10 : f32 to vector<1x256xf32>
    %cst_11 = arith.constant 0.000000e+00 : f32
    %12 = vector.broadcast %cst_11 : f32 to vector<8x128xf32>
    %cst_12 = arith.constant 0.000000e+00 : f32
    %13 = vector.broadcast %cst_12 : f32 to vector<8x128xf32>
    %c0_13 = arith.constant 0 : index
    %c0_14 = arith.constant 0 : index
    %14 = vector.load %arg16[%c0_13, %c0_14] : memref<8x1024xf32, #tpu.memory_space<vmem>>, vector<1x512xf32>
    %c7 = arith.constant 7 : index
    %c512_15 = arith.constant 512 : index
    %15 = vector.load %arg16[%c7, %c512_15] : memref<8x1024xf32, #tpu.memory_space<vmem>>, vector<1x512xf32>
    %16 = tpu.concatenate %14, %15 in 1 : vector<1x512xf32>, vector<1x512xf32> -> vector<1x1024xf32>
    %17 = arith.truncf %10 : vector<1x256xf32> to vector<1x256xbf16>
    %18 = vector.extract_strided_slice %17 {offsets = [0, 0], sizes = [1, 128], strides = [1, 1]} : vector<1x256xbf16> to vector<1x128xbf16>
    %cst_16 = arith.constant dense<0.000000e+00> : vector<1x512xf32>
    %19 = tpu.matmul %18, %7, %cst_16 {dimension_numbers = #tpu.dot_dimension_numbers<[1], [0], [0], [1], [0, 0, 1, 1], [], []>} : vector<1x128xbf16>, vector<128x512xbf16>, vector<1x512xf32> -> vector<1x512xf32>
    %20 = vector.extract_strided_slice %17 {offsets = [0, 128], sizes = [1, 128], strides = [1, 1]} : vector<1x256xbf16> to vector<1x128xbf16>
    %cst_17 = arith.constant dense<0.000000e+00> : vector<1x512xf32>
    %21 = tpu.matmul %20, %8, %cst_17 {dimension_numbers = #tpu.dot_dimension_numbers<[1], [0], [0], [1], [0, 0, 1, 1], [], []>} : vector<1x128xbf16>, vector<128x512xbf16>, vector<1x512xf32> -> vector<1x512xf32>
    %22 = tpu.concatenate %19, %21 in 1 : vector<1x512xf32>, vector<1x512xf32> -> vector<1x1024xf32>
    %23 = arith.addf %16, %22 : vector<1x1024xf32>
    %24 = arith.negf %23 : vector<1x1024xf32>
    %25 = math.exp %24 : vector<1x1024xf32>
    %cst_18 = arith.constant 1.000000e+00 : f32
    %26 = vector.broadcast %cst_18 : f32 to vector<1x1024xf32>
    %27 = arith.addf %26, %25 : vector<1x1024xf32>
    %28 = arith.divf %26, %27 : vector<1x1024xf32>
    %29 = vector.extract_strided_slice %28 {offsets = [0, 0], sizes = [1, 128], strides = [1, 1]} : vector<1x1024xf32> to vector<1x128xf32>
    %30 = vector.extract_strided_slice %28 {offsets = [0, 512], sizes = [1, 128], strides = [1, 1]} : vector<1x1024xf32> to vector<1x128xf32>
    %31 = tpu.concatenate %29, %30 in 1 : vector<1x128xf32>, vector<1x128xf32> -> vector<1x256xf32>
    %32 = vector.extract_strided_slice %28 {offsets = [0, 128], sizes = [1, 128], strides = [1, 1]} : vector<1x1024xf32> to vector<1x128xf32>
    %33 = vector.extract_strided_slice %28 {offsets = [0, 640], sizes = [1, 128], strides = [1, 1]} : vector<1x1024xf32> to vector<1x128xf32>
    %34 = tpu.concatenate %32, %33 in 1 : vector<1x128xf32>, vector<1x128xf32> -> vector<1x256xf32>
    %35 = vector.extract_strided_slice %28 {offsets = [0, 256], sizes = [1, 128], strides = [1, 1]} : vector<1x1024xf32> to vector<1x128xf32>
    %36 = vector.extract_strided_slice %28 {offsets = [0, 768], sizes = [1, 128], strides = [1, 1]} : vector<1x1024xf32> to vector<1x128xf32>
    %37 = tpu.concatenate %35, %36 in 1 : vector<1x128xf32>, vector<1x128xf32> -> vector<1x256xf32>
    %cst_19 = arith.constant 2.000000e+00 : f32
    %38 = vector.broadcast %cst_19 : f32 to vector<1x256xf32>
    %39 = arith.mulf %37, %38 : vector<1x256xf32>
    %cst_20 = arith.constant 1.000000e+00 : f32
    %40 = vector.broadcast %cst_20 : f32 to vector<1x256xf32>
    %41 = arith.subf %39, %40 : vector<1x256xf32>
    %42 = vector.extract_strided_slice %28 {offsets = [0, 384], sizes = [1, 128], strides = [1, 1]} : vector<1x1024xf32> to vector<1x128xf32>
    %43 = vector.extract_strided_slice %28 {offsets = [0, 896], sizes = [1, 128], strides = [1, 1]} : vector<1x1024xf32> to vector<1x128xf32>
    %44 = tpu.concatenate %42, %43 in 1 : vector<1x128xf32>, vector<1x128xf32> -> vector<1x256xf32>
    %45 = arith.mulf %34, %11 : vector<1x256xf32>
    %46 = arith.mulf %31, %41 : vector<1x256xf32>
    %47 = arith.addf %45, %46 : vector<1x256xf32>
    %48 = math.tanh %47 : vector<1x256xf32>
    %49 = arith.mulf %44, %48 : vector<1x256xf32>
    %c0_i32 = arith.constant 0 : i32
    %50 = vector.broadcast %c0_i32 : i32 to vector<8x1xi32>
    %51 = arith.cmpi eq, %9, %50 : vector<8x1xi32>
    %52 = vector.extract_strided_slice %49 {offsets = [0, 0], sizes = [1, 128], strides = [1, 1]} : vector<1x256xf32> to vector<1x128xf32>
    %53 = vector.shape_cast %51 : vector<8x1xi1> to vector<8x1xi1>
    %54 = vector.broadcast %53 : vector<8x1xi1> to vector<8x128xi1>
    %55 = vector.shape_cast %52 : vector<1x128xf32> to vector<1x128xf32>
    %56 = vector.broadcast %55 : vector<1x128xf32> to vector<8x128xf32>
    %57 = arith.select %54, %56, %12 : vector<8x128xi1>, vector<8x128xf32>
    %c7_i32 = arith.constant 7 : i32
    %58 = vector.broadcast %c7_i32 : i32 to vector<8x1xi32>
    %59 = arith.cmpi eq, %9, %58 : vector<8x1xi32>
    %60 = vector.extract_strided_slice %49 {offsets = [0, 128], sizes = [1, 128], strides = [1, 1]} : vector<1x256xf32> to vector<1x128xf32>
    %61 = vector.shape_cast %59 : vector<8x1xi1> to vector<8x1xi1>
    %62 = vector.broadcast %61 : vector<8x1xi1> to vector<8x128xi1>
    %63 = vector.shape_cast %60 : vector<1x128xf32> to vector<1x128xf32>
    %64 = vector.broadcast %63 : vector<1x128xf32> to vector<8x128xf32>
    %65 = arith.select %62, %64, %13 : vector<8x128xi1>, vector<8x128xf32>
    %c1 = arith.constant 1 : index
    %c0_21 = arith.constant 0 : index
    %66 = vector.load %arg16[%c1, %c0_21] : memref<8x1024xf32, #tpu.memory_space<vmem>>, vector<1x512xf32>
    %c6 = arith.constant 6 : index
    %c512_22 = arith.constant 512 : index
    %67 = vector.load %arg16[%c6, %c512_22] : memref<8x1024xf32, #tpu.memory_space<vmem>>, vector<1x512xf32>
    %68 = tpu.concatenate %66, %67 in 1 : vector<1x512xf32>, vector<1x512xf32> -> vector<1x1024xf32>
    %69 = arith.truncf %49 : vector<1x256xf32> to vector<1x256xbf16>
    %70 = vector.extract_strided_slice %69 {offsets = [0, 0], sizes = [1, 128], strides = [1, 1]} : vector<1x256xbf16> to vector<1x128xbf16>
    %cst_23 = arith.constant dense<0.000000e+00> : vector<1x512xf32>
    %71 = tpu.matmul %70, %7, %cst_23 {dimension_numbers = #tpu.dot_dimension_numbers<[1], [0], [0], [1], [0, 0, 1, 1], [], []>} : vector<1x128xbf16>, vector<128x512xbf16>, vector<1x512xf32> -> vector<1x512xf32>
    %72 = vector.extract_strided_slice %69 {offsets = [0, 128], sizes = [1, 128], strides = [1, 1]} : vector<1x256xbf16> to vector<1x128xbf16>
    %cst_24 = arith.constant dense<0.000000e+00> : vector<1x512xf32>
    %73 = tpu.matmul %72, %8, %cst_24 {dimension_numbers = #tpu.dot_dimension_numbers<[1], [0], [0], [1], [0, 0, 1, 1], [], []>} : vector<1x128xbf16>, vector<128x512xbf16>, vector<1x512xf32> -> vector<1x512xf32>
    %74 = tpu.concatenate %71, %73 in 1 : vector<1x512xf32>, vector<1x512xf32> -> vector<1x1024xf32>
    %75 = arith.addf %68, %74 : vector<1x1024xf32>
    %76 = arith.negf %75 : vector<1x1024xf32>
    %77 = math.exp %76 : vector<1x1024xf32>
    %cst_25 = arith.constant 1.000000e+00 : f32
    %78 = vector.broadcast %cst_25 : f32 to vector<1x1024xf32>
    %79 = arith.addf %78, %77 : vector<1x1024xf32>
    %80 = arith.divf %78, %79 : vector<1x1024xf32>
    %81 = vector.extract_strided_slice %80 {offsets = [0, 0], sizes = [1, 128], strides = [1, 1]} : vector<1x1024xf32> to vector<1x128xf32>
    %82 = vector.extract_strided_slice %80 {offsets = [0, 512], sizes = [1, 128], strides = [1, 1]} : vector<1x1024xf32> to vector<1x128xf32>
    %83 = tpu.concatenate %81, %82 in 1 : vector<1x128xf32>, vector<1x128xf32> -> vector<1x256xf32>
    %84 = vector.extract_strided_slice %80 {offsets = [0, 128], sizes = [1, 128], strides = [1, 1]} : vector<1x1024xf32> to vector<1x128xf32>
    %85 = vector.extract_strided_slice %80 {offsets = [0, 640], sizes = [1, 128], strides = [1, 1]} : vector<1x1024xf32> to vector<1x128xf32>
    %86 = tpu.concatenate %84, %85 in 1 : vector<1x128xf32>, vector<1x128xf32> -> vector<1x256xf32>
    %87 = vector.extract_strided_slice %80 {offsets = [0, 256], sizes = [1, 128], strides = [1, 1]} : vector<1x1024xf32> to vector<1x128xf32>
    %88 = vector.extract_strided_slice %80 {offsets = [0, 768], sizes = [1, 128], strides = [1, 1]} : vector<1x1024xf32> to vector<1x128xf32>
    %89 = tpu.concatenate %87, %88 in 1 : vector<1x128xf32>, vector<1x128xf32> -> vector<1x256xf32>
    %cst_26 = arith.constant 2.000000e+00 : f32
    %90 = vector.broadcast %cst_26 : f32 to vector<1x256xf32>
    %91 = arith.mulf %89, %90 : vector<1x256xf32>
    %cst_27 = arith.constant 1.000000e+00 : f32
    %92 = vector.broadcast %cst_27 : f32 to vector<1x256xf32>
    %93 = arith.subf %91, %92 : vector<1x256xf32>
    %94 = vector.extract_strided_slice %80 {offsets = [0, 384], sizes = [1, 128], strides = [1, 1]} : vector<1x1024xf32> to vector<1x128xf32>
    %95 = vector.extract_strided_slice %80 {offsets = [0, 896], sizes = [1, 128], strides = [1, 1]} : vector<1x1024xf32> to vector<1x128xf32>
    %96 = tpu.concatenate %94, %95 in 1 : vector<1x128xf32>, vector<1x128xf32> -> vector<1x256xf32>
    %97 = arith.mulf %86, %47 : vector<1x256xf32>
    %98 = arith.mulf %83, %93 : vector<1x256xf32>
    %99 = arith.addf %97, %98 : vector<1x256xf32>
    %100 = math.tanh %99 : vector<1x256xf32>
    %101 = arith.mulf %96, %100 : vector<1x256xf32>
    %c1_i32 = arith.constant 1 : i32
    %102 = vector.broadcast %c1_i32 : i32 to vector<8x1xi32>
    %103 = arith.cmpi eq, %9, %102 : vector<8x1xi32>
    %104 = vector.extract_strided_slice %101 {offsets = [0, 0], sizes = [1, 128], strides = [1, 1]} : vector<1x256xf32> to vector<1x128xf32>
    %105 = vector.shape_cast %103 : vector<8x1xi1> to vector<8x1xi1>
    %106 = vector.broadcast %105 : vector<8x1xi1> to vector<8x128xi1>
    %107 = vector.shape_cast %104 : vector<1x128xf32> to vector<1x128xf32>
    %108 = vector.broadcast %107 : vector<1x128xf32> to vector<8x128xf32>
    %109 = arith.select %106, %108, %57 : vector<8x128xi1>, vector<8x128xf32>
    %c6_i32 = arith.constant 6 : i32
    %110 = vector.broadcast %c6_i32 : i32 to vector<8x1xi32>
    %111 = arith.cmpi eq, %9, %110 : vector<8x1xi32>
    %112 = vector.extract_strided_slice %101 {offsets = [0, 128], sizes = [1, 128], strides = [1, 1]} : vector<1x256xf32> to vector<1x128xf32>
    %113 = vector.shape_cast %111 : vector<8x1xi1> to vector<8x1xi1>
    %114 = vector.broadcast %113 : vector<8x1xi1> to vector<8x128xi1>
    %115 = vector.shape_cast %112 : vector<1x128xf32> to vector<1x128xf32>
    %116 = vector.broadcast %115 : vector<1x128xf32> to vector<8x128xf32>
    %117 = arith.select %114, %116, %65 : vector<8x128xi1>, vector<8x128xf32>
    %c2 = arith.constant 2 : index
    %c0_28 = arith.constant 0 : index
    %118 = vector.load %arg16[%c2, %c0_28] : memref<8x1024xf32, #tpu.memory_space<vmem>>, vector<1x512xf32>
    %c5 = arith.constant 5 : index
    %c512_29 = arith.constant 512 : index
    %119 = vector.load %arg16[%c5, %c512_29] : memref<8x1024xf32, #tpu.memory_space<vmem>>, vector<1x512xf32>
    %120 = tpu.concatenate %118, %119 in 1 : vector<1x512xf32>, vector<1x512xf32> -> vector<1x1024xf32>
    %121 = arith.truncf %101 : vector<1x256xf32> to vector<1x256xbf16>
    %122 = vector.extract_strided_slice %121 {offsets = [0, 0], sizes = [1, 128], strides = [1, 1]} : vector<1x256xbf16> to vector<1x128xbf16>
    %cst_30 = arith.constant dense<0.000000e+00> : vector<1x512xf32>
    %123 = tpu.matmul %122, %7, %cst_30 {dimension_numbers = #tpu.dot_dimension_numbers<[1], [0], [0], [1], [0, 0, 1, 1], [], []>} : vector<1x128xbf16>, vector<128x512xbf16>, vector<1x512xf32> -> vector<1x512xf32>
    %124 = vector.extract_strided_slice %121 {offsets = [0, 128], sizes = [1, 128], strides = [1, 1]} : vector<1x256xbf16> to vector<1x128xbf16>
    %cst_31 = arith.constant dense<0.000000e+00> : vector<1x512xf32>
    %125 = tpu.matmul %124, %8, %cst_31 {dimension_numbers = #tpu.dot_dimension_numbers<[1], [0], [0], [1], [0, 0, 1, 1], [], []>} : vector<1x128xbf16>, vector<128x512xbf16>, vector<1x512xf32> -> vector<1x512xf32>
    %126 = tpu.concatenate %123, %125 in 1 : vector<1x512xf32>, vector<1x512xf32> -> vector<1x1024xf32>
    %127 = arith.addf %120, %126 : vector<1x1024xf32>
    %128 = arith.negf %127 : vector<1x1024xf32>
    %129 = math.exp %128 : vector<1x1024xf32>
    %cst_32 = arith.constant 1.000000e+00 : f32
    %130 = vector.broadcast %cst_32 : f32 to vector<1x1024xf32>
    %131 = arith.addf %130, %129 : vector<1x1024xf32>
    %132 = arith.divf %130, %131 : vector<1x1024xf32>
    %133 = vector.extract_strided_slice %132 {offsets = [0, 0], sizes = [1, 128], strides = [1, 1]} : vector<1x1024xf32> to vector<1x128xf32>
    %134 = vector.extract_strided_slice %132 {offsets = [0, 512], sizes = [1, 128], strides = [1, 1]} : vector<1x1024xf32> to vector<1x128xf32>
    %135 = tpu.concatenate %133, %134 in 1 : vector<1x128xf32>, vector<1x128xf32> -> vector<1x256xf32>
    %136 = vector.extract_strided_slice %132 {offsets = [0, 128], sizes = [1, 128], strides = [1, 1]} : vector<1x1024xf32> to vector<1x128xf32>
    %137 = vector.extract_strided_slice %132 {offsets = [0, 640], sizes = [1, 128], strides = [1, 1]} : vector<1x1024xf32> to vector<1x128xf32>
    %138 = tpu.concatenate %136, %137 in 1 : vector<1x128xf32>, vector<1x128xf32> -> vector<1x256xf32>
    %139 = vector.extract_strided_slice %132 {offsets = [0, 256], sizes = [1, 128], strides = [1, 1]} : vector<1x1024xf32> to vector<1x128xf32>
    %140 = vector.extract_strided_slice %132 {offsets = [0, 768], sizes = [1, 128], strides = [1, 1]} : vector<1x1024xf32> to vector<1x128xf32>
    %141 = tpu.concatenate %139, %140 in 1 : vector<1x128xf32>, vector<1x128xf32> -> vector<1x256xf32>
    %cst_33 = arith.constant 2.000000e+00 : f32
    %142 = vector.broadcast %cst_33 : f32 to vector<1x256xf32>
    %143 = arith.mulf %141, %142 : vector<1x256xf32>
    %cst_34 = arith.constant 1.000000e+00 : f32
    %144 = vector.broadcast %cst_34 : f32 to vector<1x256xf32>
    %145 = arith.subf %143, %144 : vector<1x256xf32>
    %146 = vector.extract_strided_slice %132 {offsets = [0, 384], sizes = [1, 128], strides = [1, 1]} : vector<1x1024xf32> to vector<1x128xf32>
    %147 = vector.extract_strided_slice %132 {offsets = [0, 896], sizes = [1, 128], strides = [1, 1]} : vector<1x1024xf32> to vector<1x128xf32>
    %148 = tpu.concatenate %146, %147 in 1 : vector<1x128xf32>, vector<1x128xf32> -> vector<1x256xf32>
    %149 = arith.mulf %138, %99 : vector<1x256xf32>
    %150 = arith.mulf %135, %145 : vector<1x256xf32>
    %151 = arith.addf %149, %150 : vector<1x256xf32>
    %152 = math.tanh %151 : vector<1x256xf32>
    %153 = arith.mulf %148, %152 : vector<1x256xf32>
    %c2_i32 = arith.constant 2 : i32
    %154 = vector.broadcast %c2_i32 : i32 to vector<8x1xi32>
    %155 = arith.cmpi eq, %9, %154 : vector<8x1xi32>
    %156 = vector.extract_strided_slice %153 {offsets = [0, 0], sizes = [1, 128], strides = [1, 1]} : vector<1x256xf32> to vector<1x128xf32>
    %157 = vector.shape_cast %155 : vector<8x1xi1> to vector<8x1xi1>
    %158 = vector.broadcast %157 : vector<8x1xi1> to vector<8x128xi1>
    %159 = vector.shape_cast %156 : vector<1x128xf32> to vector<1x128xf32>
    %160 = vector.broadcast %159 : vector<1x128xf32> to vector<8x128xf32>
    %161 = arith.select %158, %160, %109 : vector<8x128xi1>, vector<8x128xf32>
    %c5_i32 = arith.constant 5 : i32
    %162 = vector.broadcast %c5_i32 : i32 to vector<8x1xi32>
    %163 = arith.cmpi eq, %9, %162 : vector<8x1xi32>
    %164 = vector.extract_strided_slice %153 {offsets = [0, 128], sizes = [1, 128], strides = [1, 1]} : vector<1x256xf32> to vector<1x128xf32>
    %165 = vector.shape_cast %163 : vector<8x1xi1> to vector<8x1xi1>
    %166 = vector.broadcast %165 : vector<8x1xi1> to vector<8x128xi1>
    %167 = vector.shape_cast %164 : vector<1x128xf32> to vector<1x128xf32>
    %168 = vector.broadcast %167 : vector<1x128xf32> to vector<8x128xf32>
    %169 = arith.select %166, %168, %117 : vector<8x128xi1>, vector<8x128xf32>
    %c3 = arith.constant 3 : index
    %c0_35 = arith.constant 0 : index
    %170 = vector.load %arg16[%c3, %c0_35] : memref<8x1024xf32, #tpu.memory_space<vmem>>, vector<1x512xf32>
    %c4 = arith.constant 4 : index
    %c512_36 = arith.constant 512 : index
    %171 = vector.load %arg16[%c4, %c512_36] : memref<8x1024xf32, #tpu.memory_space<vmem>>, vector<1x512xf32>
    %172 = tpu.concatenate %170, %171 in 1 : vector<1x512xf32>, vector<1x512xf32> -> vector<1x1024xf32>
    %173 = arith.truncf %153 : vector<1x256xf32> to vector<1x256xbf16>
    %174 = vector.extract_strided_slice %173 {offsets = [0, 0], sizes = [1, 128], strides = [1, 1]} : vector<1x256xbf16> to vector<1x128xbf16>
    %cst_37 = arith.constant dense<0.000000e+00> : vector<1x512xf32>
    %175 = tpu.matmul %174, %7, %cst_37 {dimension_numbers = #tpu.dot_dimension_numbers<[1], [0], [0], [1], [0, 0, 1, 1], [], []>} : vector<1x128xbf16>, vector<128x512xbf16>, vector<1x512xf32> -> vector<1x512xf32>
    %176 = vector.extract_strided_slice %173 {offsets = [0, 128], sizes = [1, 128], strides = [1, 1]} : vector<1x256xbf16> to vector<1x128xbf16>
    %cst_38 = arith.constant dense<0.000000e+00> : vector<1x512xf32>
    %177 = tpu.matmul %176, %8, %cst_38 {dimension_numbers = #tpu.dot_dimension_numbers<[1], [0], [0], [1], [0, 0, 1, 1], [], []>} : vector<1x128xbf16>, vector<128x512xbf16>, vector<1x512xf32> -> vector<1x512xf32>
    %178 = tpu.concatenate %175, %177 in 1 : vector<1x512xf32>, vector<1x512xf32> -> vector<1x1024xf32>
    %179 = arith.addf %172, %178 : vector<1x1024xf32>
    %180 = arith.negf %179 : vector<1x1024xf32>
    %181 = math.exp %180 : vector<1x1024xf32>
    %cst_39 = arith.constant 1.000000e+00 : f32
    %182 = vector.broadcast %cst_39 : f32 to vector<1x1024xf32>
    %183 = arith.addf %182, %181 : vector<1x1024xf32>
    %184 = arith.divf %182, %183 : vector<1x1024xf32>
    %185 = vector.extract_strided_slice %184 {offsets = [0, 0], sizes = [1, 128], strides = [1, 1]} : vector<1x1024xf32> to vector<1x128xf32>
    %186 = vector.extract_strided_slice %184 {offsets = [0, 512], sizes = [1, 128], strides = [1, 1]} : vector<1x1024xf32> to vector<1x128xf32>
    %187 = tpu.concatenate %185, %186 in 1 : vector<1x128xf32>, vector<1x128xf32> -> vector<1x256xf32>
    %188 = vector.extract_strided_slice %184 {offsets = [0, 128], sizes = [1, 128], strides = [1, 1]} : vector<1x1024xf32> to vector<1x128xf32>
    %189 = vector.extract_strided_slice %184 {offsets = [0, 640], sizes = [1, 128], strides = [1, 1]} : vector<1x1024xf32> to vector<1x128xf32>
    %190 = tpu.concatenate %188, %189 in 1 : vector<1x128xf32>, vector<1x128xf32> -> vector<1x256xf32>
    %191 = vector.extract_strided_slice %184 {offsets = [0, 256], sizes = [1, 128], strides = [1, 1]} : vector<1x1024xf32> to vector<1x128xf32>
    %192 = vector.extract_strided_slice %184 {offsets = [0, 768], sizes = [1, 128], strides = [1, 1]} : vector<1x1024xf32> to vector<1x128xf32>
    %193 = tpu.concatenate %191, %192 in 1 : vector<1x128xf32>, vector<1x128xf32> -> vector<1x256xf32>
    %cst_40 = arith.constant 2.000000e+00 : f32
    %194 = vector.broadcast %cst_40 : f32 to vector<1x256xf32>
    %195 = arith.mulf %193, %194 : vector<1x256xf32>
    %cst_41 = arith.constant 1.000000e+00 : f32
    %196 = vector.broadcast %cst_41 : f32 to vector<1x256xf32>
    %197 = arith.subf %195, %196 : vector<1x256xf32>
    %198 = vector.extract_strided_slice %184 {offsets = [0, 384], sizes = [1, 128], strides = [1, 1]} : vector<1x1024xf32> to vector<1x128xf32>
    %199 = vector.extract_strided_slice %184 {offsets = [0, 896], sizes = [1, 128], strides = [1, 1]} : vector<1x1024xf32> to vector<1x128xf32>
    %200 = tpu.concatenate %198, %199 in 1 : vector<1x128xf32>, vector<1x128xf32> -> vector<1x256xf32>
    %201 = arith.mulf %190, %151 : vector<1x256xf32>
    %202 = arith.mulf %187, %197 : vector<1x256xf32>
    %203 = arith.addf %201, %202 : vector<1x256xf32>
    %204 = math.tanh %203 : vector<1x256xf32>
    %205 = arith.mulf %200, %204 : vector<1x256xf32>
    %c3_i32 = arith.constant 3 : i32
    %206 = vector.broadcast %c3_i32 : i32 to vector<8x1xi32>
    %207 = arith.cmpi eq, %9, %206 : vector<8x1xi32>
    %208 = vector.extract_strided_slice %205 {offsets = [0, 0], sizes = [1, 128], strides = [1, 1]} : vector<1x256xf32> to vector<1x128xf32>
    %209 = vector.shape_cast %207 : vector<8x1xi1> to vector<8x1xi1>
    %210 = vector.broadcast %209 : vector<8x1xi1> to vector<8x128xi1>
    %211 = vector.shape_cast %208 : vector<1x128xf32> to vector<1x128xf32>
    %212 = vector.broadcast %211 : vector<1x128xf32> to vector<8x128xf32>
    %213 = arith.select %210, %212, %161 : vector<8x128xi1>, vector<8x128xf32>
    %c4_i32 = arith.constant 4 : i32
    %214 = vector.broadcast %c4_i32 : i32 to vector<8x1xi32>
    %215 = arith.cmpi eq, %9, %214 : vector<8x1xi32>
    %216 = vector.extract_strided_slice %205 {offsets = [0, 128], sizes = [1, 128], strides = [1, 1]} : vector<1x256xf32> to vector<1x128xf32>
    %217 = vector.shape_cast %215 : vector<8x1xi1> to vector<8x1xi1>
    %218 = vector.broadcast %217 : vector<8x1xi1> to vector<8x128xi1>
    %219 = vector.shape_cast %216 : vector<1x128xf32> to vector<1x128xf32>
    %220 = vector.broadcast %219 : vector<1x128xf32> to vector<8x128xf32>
    %221 = arith.select %218, %220, %169 : vector<8x128xi1>, vector<8x128xf32>
    %c4_42 = arith.constant 4 : index
    %c0_43 = arith.constant 0 : index
    %222 = vector.load %arg16[%c4_42, %c0_43] : memref<8x1024xf32, #tpu.memory_space<vmem>>, vector<1x512xf32>
    %c3_44 = arith.constant 3 : index
    %c512_45 = arith.constant 512 : index
    %223 = vector.load %arg16[%c3_44, %c512_45] : memref<8x1024xf32, #tpu.memory_space<vmem>>, vector<1x512xf32>
    %224 = tpu.concatenate %222, %223 in 1 : vector<1x512xf32>, vector<1x512xf32> -> vector<1x1024xf32>
    %225 = arith.truncf %205 : vector<1x256xf32> to vector<1x256xbf16>
    %226 = vector.extract_strided_slice %225 {offsets = [0, 0], sizes = [1, 128], strides = [1, 1]} : vector<1x256xbf16> to vector<1x128xbf16>
    %cst_46 = arith.constant dense<0.000000e+00> : vector<1x512xf32>
    %227 = tpu.matmul %226, %7, %cst_46 {dimension_numbers = #tpu.dot_dimension_numbers<[1], [0], [0], [1], [0, 0, 1, 1], [], []>} : vector<1x128xbf16>, vector<128x512xbf16>, vector<1x512xf32> -> vector<1x512xf32>
    %228 = vector.extract_strided_slice %225 {offsets = [0, 128], sizes = [1, 128], strides = [1, 1]} : vector<1x256xbf16> to vector<1x128xbf16>
    %cst_47 = arith.constant dense<0.000000e+00> : vector<1x512xf32>
    %229 = tpu.matmul %228, %8, %cst_47 {dimension_numbers = #tpu.dot_dimension_numbers<[1], [0], [0], [1], [0, 0, 1, 1], [], []>} : vector<1x128xbf16>, vector<128x512xbf16>, vector<1x512xf32> -> vector<1x512xf32>
    %230 = tpu.concatenate %227, %229 in 1 : vector<1x512xf32>, vector<1x512xf32> -> vector<1x1024xf32>
    %231 = arith.addf %224, %230 : vector<1x1024xf32>
    %232 = arith.negf %231 : vector<1x1024xf32>
    %233 = math.exp %232 : vector<1x1024xf32>
    %cst_48 = arith.constant 1.000000e+00 : f32
    %234 = vector.broadcast %cst_48 : f32 to vector<1x1024xf32>
    %235 = arith.addf %234, %233 : vector<1x1024xf32>
    %236 = arith.divf %234, %235 : vector<1x1024xf32>
    %237 = vector.extract_strided_slice %236 {offsets = [0, 0], sizes = [1, 128], strides = [1, 1]} : vector<1x1024xf32> to vector<1x128xf32>
    %238 = vector.extract_strided_slice %236 {offsets = [0, 512], sizes = [1, 128], strides = [1, 1]} : vector<1x1024xf32> to vector<1x128xf32>
    %239 = tpu.concatenate %237, %238 in 1 : vector<1x128xf32>, vector<1x128xf32> -> vector<1x256xf32>
    %240 = vector.extract_strided_slice %236 {offsets = [0, 128], sizes = [1, 128], strides = [1, 1]} : vector<1x1024xf32> to vector<1x128xf32>
    %241 = vector.extract_strided_slice %236 {offsets = [0, 640], sizes = [1, 128], strides = [1, 1]} : vector<1x1024xf32> to vector<1x128xf32>
    %242 = tpu.concatenate %240, %241 in 1 : vector<1x128xf32>, vector<1x128xf32> -> vector<1x256xf32>
    %243 = vector.extract_strided_slice %236 {offsets = [0, 256], sizes = [1, 128], strides = [1, 1]} : vector<1x1024xf32> to vector<1x128xf32>
    %244 = vector.extract_strided_slice %236 {offsets = [0, 768], sizes = [1, 128], strides = [1, 1]} : vector<1x1024xf32> to vector<1x128xf32>
    %245 = tpu.concatenate %243, %244 in 1 : vector<1x128xf32>, vector<1x128xf32> -> vector<1x256xf32>
    %cst_49 = arith.constant 2.000000e+00 : f32
    %246 = vector.broadcast %cst_49 : f32 to vector<1x256xf32>
    %247 = arith.mulf %245, %246 : vector<1x256xf32>
    %cst_50 = arith.constant 1.000000e+00 : f32
    %248 = vector.broadcast %cst_50 : f32 to vector<1x256xf32>
    %249 = arith.subf %247, %248 : vector<1x256xf32>
    %250 = vector.extract_strided_slice %236 {offsets = [0, 384], sizes = [1, 128], strides = [1, 1]} : vector<1x1024xf32> to vector<1x128xf32>
    %251 = vector.extract_strided_slice %236 {offsets = [0, 896], sizes = [1, 128], strides = [1, 1]} : vector<1x1024xf32> to vector<1x128xf32>
    %252 = tpu.concatenate %250, %251 in 1 : vector<1x128xf32>, vector<1x128xf32> -> vector<1x256xf32>
    %253 = arith.mulf %242, %203 : vector<1x256xf32>
    %254 = arith.mulf %239, %249 : vector<1x256xf32>
    %255 = arith.addf %253, %254 : vector<1x256xf32>
    %256 = math.tanh %255 : vector<1x256xf32>
    %257 = arith.mulf %252, %256 : vector<1x256xf32>
    %c4_i32_51 = arith.constant 4 : i32
    %258 = vector.broadcast %c4_i32_51 : i32 to vector<8x1xi32>
    %259 = arith.cmpi eq, %9, %258 : vector<8x1xi32>
    %260 = vector.extract_strided_slice %257 {offsets = [0, 0], sizes = [1, 128], strides = [1, 1]} : vector<1x256xf32> to vector<1x128xf32>
    %261 = vector.shape_cast %259 : vector<8x1xi1> to vector<8x1xi1>
    %262 = vector.broadcast %261 : vector<8x1xi1> to vector<8x128xi1>
    %263 = vector.shape_cast %260 : vector<1x128xf32> to vector<1x128xf32>
    %264 = vector.broadcast %263 : vector<1x128xf32> to vector<8x128xf32>
    %265 = arith.select %262, %264, %213 : vector<8x128xi1>, vector<8x128xf32>
    %c3_i32_52 = arith.constant 3 : i32
    %266 = vector.broadcast %c3_i32_52 : i32 to vector<8x1xi32>
    %267 = arith.cmpi eq, %9, %266 : vector<8x1xi32>
    %268 = vector.extract_strided_slice %257 {offsets = [0, 128], sizes = [1, 128], strides = [1, 1]} : vector<1x256xf32> to vector<1x128xf32>
    %269 = vector.shape_cast %267 : vector<8x1xi1> to vector<8x1xi1>
    %270 = vector.broadcast %269 : vector<8x1xi1> to vector<8x128xi1>
    %271 = vector.shape_cast %268 : vector<1x128xf32> to vector<1x128xf32>
    %272 = vector.broadcast %271 : vector<1x128xf32> to vector<8x128xf32>
    %273 = arith.select %270, %272, %221 : vector<8x128xi1>, vector<8x128xf32>
    %c5_53 = arith.constant 5 : index
    %c0_54 = arith.constant 0 : index
    %274 = vector.load %arg16[%c5_53, %c0_54] : memref<8x1024xf32, #tpu.memory_space<vmem>>, vector<1x512xf32>
    %c2_55 = arith.constant 2 : index
    %c512_56 = arith.constant 512 : index
    %275 = vector.load %arg16[%c2_55, %c512_56] : memref<8x1024xf32, #tpu.memory_space<vmem>>, vector<1x512xf32>
    %276 = tpu.concatenate %274, %275 in 1 : vector<1x512xf32>, vector<1x512xf32> -> vector<1x1024xf32>
    %277 = arith.truncf %257 : vector<1x256xf32> to vector<1x256xbf16>
    %278 = vector.extract_strided_slice %277 {offsets = [0, 0], sizes = [1, 128], strides = [1, 1]} : vector<1x256xbf16> to vector<1x128xbf16>
    %cst_57 = arith.constant dense<0.000000e+00> : vector<1x512xf32>
    %279 = tpu.matmul %278, %7, %cst_57 {dimension_numbers = #tpu.dot_dimension_numbers<[1], [0], [0], [1], [0, 0, 1, 1], [], []>} : vector<1x128xbf16>, vector<128x512xbf16>, vector<1x512xf32> -> vector<1x512xf32>
    %280 = vector.extract_strided_slice %277 {offsets = [0, 128], sizes = [1, 128], strides = [1, 1]} : vector<1x256xbf16> to vector<1x128xbf16>
    %cst_58 = arith.constant dense<0.000000e+00> : vector<1x512xf32>
    %281 = tpu.matmul %280, %8, %cst_58 {dimension_numbers = #tpu.dot_dimension_numbers<[1], [0], [0], [1], [0, 0, 1, 1], [], []>} : vector<1x128xbf16>, vector<128x512xbf16>, vector<1x512xf32> -> vector<1x512xf32>
    %282 = tpu.concatenate %279, %281 in 1 : vector<1x512xf32>, vector<1x512xf32> -> vector<1x1024xf32>
    %283 = arith.addf %276, %282 : vector<1x1024xf32>
    %284 = arith.negf %283 : vector<1x1024xf32>
    %285 = math.exp %284 : vector<1x1024xf32>
    %cst_59 = arith.constant 1.000000e+00 : f32
    %286 = vector.broadcast %cst_59 : f32 to vector<1x1024xf32>
    %287 = arith.addf %286, %285 : vector<1x1024xf32>
    %288 = arith.divf %286, %287 : vector<1x1024xf32>
    %289 = vector.extract_strided_slice %288 {offsets = [0, 0], sizes = [1, 128], strides = [1, 1]} : vector<1x1024xf32> to vector<1x128xf32>
    %290 = vector.extract_strided_slice %288 {offsets = [0, 512], sizes = [1, 128], strides = [1, 1]} : vector<1x1024xf32> to vector<1x128xf32>
    %291 = tpu.concatenate %289, %290 in 1 : vector<1x128xf32>, vector<1x128xf32> -> vector<1x256xf32>
    %292 = vector.extract_strided_slice %288 {offsets = [0, 128], sizes = [1, 128], strides = [1, 1]} : vector<1x1024xf32> to vector<1x128xf32>
    %293 = vector.extract_strided_slice %288 {offsets = [0, 640], sizes = [1, 128], strides = [1, 1]} : vector<1x1024xf32> to vector<1x128xf32>
    %294 = tpu.concatenate %292, %293 in 1 : vector<1x128xf32>, vector<1x128xf32> -> vector<1x256xf32>
    %295 = vector.extract_strided_slice %288 {offsets = [0, 256], sizes = [1, 128], strides = [1, 1]} : vector<1x1024xf32> to vector<1x128xf32>
    %296 = vector.extract_strided_slice %288 {offsets = [0, 768], sizes = [1, 128], strides = [1, 1]} : vector<1x1024xf32> to vector<1x128xf32>
    %297 = tpu.concatenate %295, %296 in 1 : vector<1x128xf32>, vector<1x128xf32> -> vector<1x256xf32>
    %cst_60 = arith.constant 2.000000e+00 : f32
    %298 = vector.broadcast %cst_60 : f32 to vector<1x256xf32>
    %299 = arith.mulf %297, %298 : vector<1x256xf32>
    %cst_61 = arith.constant 1.000000e+00 : f32
    %300 = vector.broadcast %cst_61 : f32 to vector<1x256xf32>
    %301 = arith.subf %299, %300 : vector<1x256xf32>
    %302 = vector.extract_strided_slice %288 {offsets = [0, 384], sizes = [1, 128], strides = [1, 1]} : vector<1x1024xf32> to vector<1x128xf32>
    %303 = vector.extract_strided_slice %288 {offsets = [0, 896], sizes = [1, 128], strides = [1, 1]} : vector<1x1024xf32> to vector<1x128xf32>
    %304 = tpu.concatenate %302, %303 in 1 : vector<1x128xf32>, vector<1x128xf32> -> vector<1x256xf32>
    %305 = arith.mulf %294, %255 : vector<1x256xf32>
    %306 = arith.mulf %291, %301 : vector<1x256xf32>
    %307 = arith.addf %305, %306 : vector<1x256xf32>
    %308 = math.tanh %307 : vector<1x256xf32>
    %309 = arith.mulf %304, %308 : vector<1x256xf32>
    %c5_i32_62 = arith.constant 5 : i32
    %310 = vector.broadcast %c5_i32_62 : i32 to vector<8x1xi32>
    %311 = arith.cmpi eq, %9, %310 : vector<8x1xi32>
    %312 = vector.extract_strided_slice %309 {offsets = [0, 0], sizes = [1, 128], strides = [1, 1]} : vector<1x256xf32> to vector<1x128xf32>
    %313 = vector.shape_cast %311 : vector<8x1xi1> to vector<8x1xi1>
    %314 = vector.broadcast %313 : vector<8x1xi1> to vector<8x128xi1>
    %315 = vector.shape_cast %312 : vector<1x128xf32> to vector<1x128xf32>
    %316 = vector.broadcast %315 : vector<1x128xf32> to vector<8x128xf32>
    %317 = arith.select %314, %316, %265 : vector<8x128xi1>, vector<8x128xf32>
    %c2_i32_63 = arith.constant 2 : i32
    %318 = vector.broadcast %c2_i32_63 : i32 to vector<8x1xi32>
    %319 = arith.cmpi eq, %9, %318 : vector<8x1xi32>
    %320 = vector.extract_strided_slice %309 {offsets = [0, 128], sizes = [1, 128], strides = [1, 1]} : vector<1x256xf32> to vector<1x128xf32>
    %321 = vector.shape_cast %319 : vector<8x1xi1> to vector<8x1xi1>
    %322 = vector.broadcast %321 : vector<8x1xi1> to vector<8x128xi1>
    %323 = vector.shape_cast %320 : vector<1x128xf32> to vector<1x128xf32>
    %324 = vector.broadcast %323 : vector<1x128xf32> to vector<8x128xf32>
    %325 = arith.select %322, %324, %273 : vector<8x128xi1>, vector<8x128xf32>
    %c6_64 = arith.constant 6 : index
    %c0_65 = arith.constant 0 : index
    %326 = vector.load %arg16[%c6_64, %c0_65] : memref<8x1024xf32, #tpu.memory_space<vmem>>, vector<1x512xf32>
    %c1_66 = arith.constant 1 : index
    %c512_67 = arith.constant 512 : index
    %327 = vector.load %arg16[%c1_66, %c512_67] : memref<8x1024xf32, #tpu.memory_space<vmem>>, vector<1x512xf32>
    %328 = tpu.concatenate %326, %327 in 1 : vector<1x512xf32>, vector<1x512xf32> -> vector<1x1024xf32>
    %329 = arith.truncf %309 : vector<1x256xf32> to vector<1x256xbf16>
    %330 = vector.extract_strided_slice %329 {offsets = [0, 0], sizes = [1, 128], strides = [1, 1]} : vector<1x256xbf16> to vector<1x128xbf16>
    %cst_68 = arith.constant dense<0.000000e+00> : vector<1x512xf32>
    %331 = tpu.matmul %330, %7, %cst_68 {dimension_numbers = #tpu.dot_dimension_numbers<[1], [0], [0], [1], [0, 0, 1, 1], [], []>} : vector<1x128xbf16>, vector<128x512xbf16>, vector<1x512xf32> -> vector<1x512xf32>
    %332 = vector.extract_strided_slice %329 {offsets = [0, 128], sizes = [1, 128], strides = [1, 1]} : vector<1x256xbf16> to vector<1x128xbf16>
    %cst_69 = arith.constant dense<0.000000e+00> : vector<1x512xf32>
    %333 = tpu.matmul %332, %8, %cst_69 {dimension_numbers = #tpu.dot_dimension_numbers<[1], [0], [0], [1], [0, 0, 1, 1], [], []>} : vector<1x128xbf16>, vector<128x512xbf16>, vector<1x512xf32> -> vector<1x512xf32>
    %334 = tpu.concatenate %331, %333 in 1 : vector<1x512xf32>, vector<1x512xf32> -> vector<1x1024xf32>
    %335 = arith.addf %328, %334 : vector<1x1024xf32>
    %336 = arith.negf %335 : vector<1x1024xf32>
    %337 = math.exp %336 : vector<1x1024xf32>
    %cst_70 = arith.constant 1.000000e+00 : f32
    %338 = vector.broadcast %cst_70 : f32 to vector<1x1024xf32>
    %339 = arith.addf %338, %337 : vector<1x1024xf32>
    %340 = arith.divf %338, %339 : vector<1x1024xf32>
    %341 = vector.extract_strided_slice %340 {offsets = [0, 0], sizes = [1, 128], strides = [1, 1]} : vector<1x1024xf32> to vector<1x128xf32>
    %342 = vector.extract_strided_slice %340 {offsets = [0, 512], sizes = [1, 128], strides = [1, 1]} : vector<1x1024xf32> to vector<1x128xf32>
    %343 = tpu.concatenate %341, %342 in 1 : vector<1x128xf32>, vector<1x128xf32> -> vector<1x256xf32>
    %344 = vector.extract_strided_slice %340 {offsets = [0, 128], sizes = [1, 128], strides = [1, 1]} : vector<1x1024xf32> to vector<1x128xf32>
    %345 = vector.extract_strided_slice %340 {offsets = [0, 640], sizes = [1, 128], strides = [1, 1]} : vector<1x1024xf32> to vector<1x128xf32>
    %346 = tpu.concatenate %344, %345 in 1 : vector<1x128xf32>, vector<1x128xf32> -> vector<1x256xf32>
    %347 = vector.extract_strided_slice %340 {offsets = [0, 256], sizes = [1, 128], strides = [1, 1]} : vector<1x1024xf32> to vector<1x128xf32>
    %348 = vector.extract_strided_slice %340 {offsets = [0, 768], sizes = [1, 128], strides = [1, 1]} : vector<1x1024xf32> to vector<1x128xf32>
    %349 = tpu.concatenate %347, %348 in 1 : vector<1x128xf32>, vector<1x128xf32> -> vector<1x256xf32>
    %cst_71 = arith.constant 2.000000e+00 : f32
    %350 = vector.broadcast %cst_71 : f32 to vector<1x256xf32>
    %351 = arith.mulf %349, %350 : vector<1x256xf32>
    %cst_72 = arith.constant 1.000000e+00 : f32
    %352 = vector.broadcast %cst_72 : f32 to vector<1x256xf32>
    %353 = arith.subf %351, %352 : vector<1x256xf32>
    %354 = vector.extract_strided_slice %340 {offsets = [0, 384], sizes = [1, 128], strides = [1, 1]} : vector<1x1024xf32> to vector<1x128xf32>
    %355 = vector.extract_strided_slice %340 {offsets = [0, 896], sizes = [1, 128], strides = [1, 1]} : vector<1x1024xf32> to vector<1x128xf32>
    %356 = tpu.concatenate %354, %355 in 1 : vector<1x128xf32>, vector<1x128xf32> -> vector<1x256xf32>
    %357 = arith.mulf %346, %307 : vector<1x256xf32>
    %358 = arith.mulf %343, %353 : vector<1x256xf32>
    %359 = arith.addf %357, %358 : vector<1x256xf32>
    %360 = math.tanh %359 : vector<1x256xf32>
    %361 = arith.mulf %356, %360 : vector<1x256xf32>
    %c6_i32_73 = arith.constant 6 : i32
    %362 = vector.broadcast %c6_i32_73 : i32 to vector<8x1xi32>
    %363 = arith.cmpi eq, %9, %362 : vector<8x1xi32>
    %364 = vector.extract_strided_slice %361 {offsets = [0, 0], sizes = [1, 128], strides = [1, 1]} : vector<1x256xf32> to vector<1x128xf32>
    %365 = vector.shape_cast %363 : vector<8x1xi1> to vector<8x1xi1>
    %366 = vector.broadcast %365 : vector<8x1xi1> to vector<8x128xi1>
    %367 = vector.shape_cast %364 : vector<1x128xf32> to vector<1x128xf32>
    %368 = vector.broadcast %367 : vector<1x128xf32> to vector<8x128xf32>
    %369 = arith.select %366, %368, %317 : vector<8x128xi1>, vector<8x128xf32>
    %c1_i32_74 = arith.constant 1 : i32
    %370 = vector.broadcast %c1_i32_74 : i32 to vector<8x1xi32>
    %371 = arith.cmpi eq, %9, %370 : vector<8x1xi32>
    %372 = vector.extract_strided_slice %361 {offsets = [0, 128], sizes = [1, 128], strides = [1, 1]} : vector<1x256xf32> to vector<1x128xf32>
    %373 = vector.shape_cast %371 : vector<8x1xi1> to vector<8x1xi1>
    %374 = vector.broadcast %373 : vector<8x1xi1> to vector<8x128xi1>
    %375 = vector.shape_cast %372 : vector<1x128xf32> to vector<1x128xf32>
    %376 = vector.broadcast %375 : vector<1x128xf32> to vector<8x128xf32>
    %377 = arith.select %374, %376, %325 : vector<8x128xi1>, vector<8x128xf32>
    %c7_75 = arith.constant 7 : index
    %c0_76 = arith.constant 0 : index
    %378 = vector.load %arg16[%c7_75, %c0_76] : memref<8x1024xf32, #tpu.memory_space<vmem>>, vector<1x512xf32>
    %c0_77 = arith.constant 0 : index
    %c512_78 = arith.constant 512 : index
    %379 = vector.load %arg16[%c0_77, %c512_78] : memref<8x1024xf32, #tpu.memory_space<vmem>>, vector<1x512xf32>
    %380 = tpu.concatenate %378, %379 in 1 : vector<1x512xf32>, vector<1x512xf32> -> vector<1x1024xf32>
    %381 = arith.truncf %361 : vector<1x256xf32> to vector<1x256xbf16>
    %382 = vector.extract_strided_slice %381 {offsets = [0, 0], sizes = [1, 128], strides = [1, 1]} : vector<1x256xbf16> to vector<1x128xbf16>
    %cst_79 = arith.constant dense<0.000000e+00> : vector<1x512xf32>
    %383 = tpu.matmul %382, %7, %cst_79 {dimension_numbers = #tpu.dot_dimension_numbers<[1], [0], [0], [1], [0, 0, 1, 1], [], []>} : vector<1x128xbf16>, vector<128x512xbf16>, vector<1x512xf32> -> vector<1x512xf32>
    %384 = vector.extract_strided_slice %381 {offsets = [0, 128], sizes = [1, 128], strides = [1, 1]} : vector<1x256xbf16> to vector<1x128xbf16>
    %cst_80 = arith.constant dense<0.000000e+00> : vector<1x512xf32>
    %385 = tpu.matmul %384, %8, %cst_80 {dimension_numbers = #tpu.dot_dimension_numbers<[1], [0], [0], [1], [0, 0, 1, 1], [], []>} : vector<1x128xbf16>, vector<128x512xbf16>, vector<1x512xf32> -> vector<1x512xf32>
    %386 = tpu.concatenate %383, %385 in 1 : vector<1x512xf32>, vector<1x512xf32> -> vector<1x1024xf32>
    %387 = arith.addf %380, %386 : vector<1x1024xf32>
    %388 = arith.negf %387 : vector<1x1024xf32>
    %389 = math.exp %388 : vector<1x1024xf32>
    %cst_81 = arith.constant 1.000000e+00 : f32
    %390 = vector.broadcast %cst_81 : f32 to vector<1x1024xf32>
    %391 = arith.addf %390, %389 : vector<1x1024xf32>
    %392 = arith.divf %390, %391 : vector<1x1024xf32>
    %393 = vector.extract_strided_slice %392 {offsets = [0, 0], sizes = [1, 128], strides = [1, 1]} : vector<1x1024xf32> to vector<1x128xf32>
    %394 = vector.extract_strided_slice %392 {offsets = [0, 512], sizes = [1, 128], strides = [1, 1]} : vector<1x1024xf32> to vector<1x128xf32>
    %395 = tpu.concatenate %393, %394 in 1 : vector<1x128xf32>, vector<1x128xf32> -> vector<1x256xf32>
    %396 = vector.extract_strided_slice %392 {offsets = [0, 128], sizes = [1, 128], strides = [1, 1]} : vector<1x1024xf32> to vector<1x128xf32>
    %397 = vector.extract_strided_slice %392 {offsets = [0, 640], sizes = [1, 128], strides = [1, 1]} : vector<1x1024xf32> to vector<1x128xf32>
    %398 = tpu.concatenate %396, %397 in 1 : vector<1x128xf32>, vector<1x128xf32> -> vector<1x256xf32>
    %399 = vector.extract_strided_slice %392 {offsets = [0, 256], sizes = [1, 128], strides = [1, 1]} : vector<1x1024xf32> to vector<1x128xf32>
    %400 = vector.extract_strided_slice %392 {offsets = [0, 768], sizes = [1, 128], strides = [1, 1]} : vector<1x1024xf32> to vector<1x128xf32>
    %401 = tpu.concatenate %399, %400 in 1 : vector<1x128xf32>, vector<1x128xf32> -> vector<1x256xf32>
    %cst_82 = arith.constant 2.000000e+00 : f32
    %402 = vector.broadcast %cst_82 : f32 to vector<1x256xf32>
    %403 = arith.mulf %401, %402 : vector<1x256xf32>
    %cst_83 = arith.constant 1.000000e+00 : f32
    %404 = vector.broadcast %cst_83 : f32 to vector<1x256xf32>
    %405 = arith.subf %403, %404 : vector<1x256xf32>
    %406 = vector.extract_strided_slice %392 {offsets = [0, 384], sizes = [1, 128], strides = [1, 1]} : vector<1x1024xf32> to vector<1x128xf32>
    %407 = vector.extract_strided_slice %392 {offsets = [0, 896], sizes = [1, 128], strides = [1, 1]} : vector<1x1024xf32> to vector<1x128xf32>
    %408 = tpu.concatenate %406, %407 in 1 : vector<1x128xf32>, vector<1x128xf32> -> vector<1x256xf32>
    %409 = arith.mulf %398, %359 : vector<1x256xf32>
    %410 = arith.mulf %395, %405 : vector<1x256xf32>
    %411 = arith.addf %409, %410 : vector<1x256xf32>
    %412 = math.tanh %411 : vector<1x256xf32>
    %413 = arith.mulf %408, %412 : vector<1x256xf32>
    %c7_i32_84 = arith.constant 7 : i32
    %414 = vector.broadcast %c7_i32_84 : i32 to vector<8x1xi32>
    %415 = arith.cmpi eq, %9, %414 : vector<8x1xi32>
    %416 = vector.extract_strided_slice %413 {offsets = [0, 0], sizes = [1, 128], strides = [1, 1]} : vector<1x256xf32> to vector<1x128xf32>
    %417 = vector.shape_cast %415 : vector<8x1xi1> to vector<8x1xi1>
    %418 = vector.broadcast %417 : vector<8x1xi1> to vector<8x128xi1>
    %419 = vector.shape_cast %416 : vector<1x128xf32> to vector<1x128xf32>
    %420 = vector.broadcast %419 : vector<1x128xf32> to vector<8x128xf32>
    %421 = arith.select %418, %420, %369 : vector<8x128xi1>, vector<8x128xf32>
    %c0_i32_85 = arith.constant 0 : i32
    %422 = vector.broadcast %c0_i32_85 : i32 to vector<8x1xi32>
    %423 = arith.cmpi eq, %9, %422 : vector<8x1xi32>
    %424 = vector.extract_strided_slice %413 {offsets = [0, 128], sizes = [1, 128], strides = [1, 1]} : vector<1x256xf32> to vector<1x128xf32>
    %425 = vector.shape_cast %423 : vector<8x1xi1> to vector<8x1xi1>
    %426 = vector.broadcast %425 : vector<8x1xi1> to vector<8x128xi1>
    %427 = vector.shape_cast %424 : vector<1x128xf32> to vector<1x128xf32>
    %428 = vector.broadcast %427 : vector<1x128xf32> to vector<8x128xf32>
    %429 = arith.select %426, %428, %377 : vector<8x128xi1>, vector<8x128xf32>
    %430 = tpu.concatenate %421, %429 in 1 : vector<8x128xf32>, vector<8x128xf32> -> vector<8x256xf32>
    %c0_86 = arith.constant 0 : index
    %c0_87 = arith.constant 0 : index
    %431 = vector.load %arg4[%c0_86, %c0_87] : memref<256x128xbf16, #tpu.memory_space<vmem>>, vector<256x128xbf16>
    %c0_88 = arith.constant 0 : index
    %c0_89 = arith.constant 0 : index
    %432 = vector.load %arg5[%c0_88, %c0_89] : memref<1x128xf32, #tpu.memory_space<vmem>>, vector<1x128xf32>
    %c0_90 = arith.constant 0 : index
    %c0_91 = arith.constant 0 : index
    %433 = vector.load %arg6[%c0_90, %c0_91] : memref<1x128xf32, #tpu.memory_space<vmem>>, vector<1x128xf32>
    %c0_92 = arith.constant 0 : index
    %c0_93 = arith.constant 0 : index
    %434 = vector.load %arg7[%c0_92, %c0_93] : memref<1x128xf32, #tpu.memory_space<vmem>>, vector<1x128xf32>
    %c0_94 = arith.constant 0 : index
    %c0_95 = arith.constant 0 : index
    %435 = vector.load %arg8[%c0_94, %c0_95] : memref<128x128xbf16, #tpu.memory_space<vmem>>, vector<128x128xbf16>
    %c0_96 = arith.constant 0 : index
    %c0_97 = arith.constant 0 : index
    %436 = vector.load %arg9[%c0_96, %c0_97] : memref<1x128xf32, #tpu.memory_space<vmem>>, vector<1x128xf32>
    %c0_98 = arith.constant 0 : index
    %c0_99 = arith.constant 0 : index
    %437 = vector.load %arg10[%c0_98, %c0_99] : memref<1x128xf32, #tpu.memory_space<vmem>>, vector<1x128xf32>
    %c0_100 = arith.constant 0 : index
    %c0_101 = arith.constant 0 : index
    %438 = vector.load %arg11[%c0_100, %c0_101] : memref<1x128xf32, #tpu.memory_space<vmem>>, vector<1x128xf32>
    %c0_102 = arith.constant 0 : index
    %c0_103 = arith.constant 0 : index
    %439 = vector.load %arg12[%c0_102, %c0_103] : memref<128x256xbf16, #tpu.memory_space<vmem>>, vector<128x256xbf16>
    %c0_104 = arith.constant 0 : index
    %c0_105 = arith.constant 0 : index
    %440 = vector.load %arg13[%c0_104, %c0_105] : memref<1x256xf32, #tpu.memory_space<vmem>>, vector<1x256xf32>
    %441 = arith.truncf %430 : vector<8x256xf32> to vector<8x256xbf16>
    %cst_106 = arith.constant dense<0.000000e+00> : vector<8x128xf32>
    %442 = tpu.matmul %441, %431, %cst_106 {dimension_numbers = #tpu.dot_dimension_numbers<[1], [0], [0], [1], [0, 0, 1, 1], [], []>} : vector<8x256xbf16>, vector<256x128xbf16>, vector<8x128xf32> -> vector<8x128xf32>
    %443 = vector.broadcast %432 : vector<1x128xf32> to vector<8x128xf32>
    %444 = arith.addf %442, %443 : vector<8x128xf32>
    %cst_107 = arith.constant dense<0.000000e+00> : vector<128xf32>
    %445 = vector.multi_reduction <add>, %444, %cst_107 [0] : vector<8x128xf32> to vector<128xf32>
    %446 = vector.shape_cast %445 : vector<128xf32> to vector<1x128xf32>
    %cst_108 = arith.constant 8.000000e+00 : f32
    %447 = vector.broadcast %cst_108 : f32 to vector<1x128xf32>
    %448 = arith.divf %446, %447 : vector<1x128xf32>
    %449 = vector.broadcast %448 : vector<1x128xf32> to vector<8x128xf32>
    %450 = arith.subf %444, %449 : vector<8x128xf32>
    %451 = arith.mulf %450, %450 : vector<8x128xf32>
    %cst_109 = arith.constant dense<0.000000e+00> : vector<128xf32>
    %452 = vector.multi_reduction <add>, %451, %cst_109 [0] : vector<8x128xf32> to vector<128xf32>
    %453 = vector.shape_cast %452 : vector<128xf32> to vector<1x128xf32>
    %cst_110 = arith.constant 8.000000e+00 : f32
    %454 = vector.broadcast %cst_110 : f32 to vector<1x128xf32>
    %455 = arith.divf %453, %454 : vector<1x128xf32>
    %cst_111 = arith.constant 9.99999974E-6 : f32
    %456 = vector.broadcast %cst_111 : f32 to vector<1x128xf32>
    %457 = arith.addf %455, %456 : vector<1x128xf32>
    %458 = math.rsqrt %457 : vector<1x128xf32>
    %459 = arith.mulf %458, %433 : vector<1x128xf32>
    %460 = vector.broadcast %459 : vector<1x128xf32> to vector<8x128xf32>
    %461 = arith.mulf %450, %460 : vector<8x128xf32>
    %462 = vector.broadcast %434 : vector<1x128xf32> to vector<8x128xf32>
    %463 = arith.addf %461, %462 : vector<8x128xf32>
    %464 = arith.truncf %463 : vector<8x128xf32> to vector<8x128xbf16>
    %cst_112 = arith.constant dense<0.000000e+00> : vector<8x128xf32>
    %465 = tpu.matmul %464, %435, %cst_112 {dimension_numbers = #tpu.dot_dimension_numbers<[1], [0], [0], [1], [0, 0, 1, 1], [], []>} : vector<8x128xbf16>, vector<128x128xbf16>, vector<8x128xf32> -> vector<8x128xf32>
    %466 = vector.broadcast %436 : vector<1x128xf32> to vector<8x128xf32>
    %467 = arith.addf %465, %466 : vector<8x128xf32>
    %cst_113 = arith.constant dense<0.000000e+00> : vector<128xf32>
    %468 = vector.multi_reduction <add>, %467, %cst_113 [0] : vector<8x128xf32> to vector<128xf32>
    %469 = vector.shape_cast %468 : vector<128xf32> to vector<1x128xf32>
    %cst_114 = arith.constant 8.000000e+00 : f32
    %470 = vector.broadcast %cst_114 : f32 to vector<1x128xf32>
    %471 = arith.divf %469, %470 : vector<1x128xf32>
    %472 = vector.broadcast %471 : vector<1x128xf32> to vector<8x128xf32>
    %473 = arith.subf %467, %472 : vector<8x128xf32>
    %474 = arith.mulf %473, %473 : vector<8x128xf32>
    %cst_115 = arith.constant dense<0.000000e+00> : vector<128xf32>
    %475 = vector.multi_reduction <add>, %474, %cst_115 [0] : vector<8x128xf32> to vector<128xf32>
    %476 = vector.shape_cast %475 : vector<128xf32> to vector<1x128xf32>
    %cst_116 = arith.constant 8.000000e+00 : f32
    %477 = vector.broadcast %cst_116 : f32 to vector<1x128xf32>
    %478 = arith.divf %476, %477 : vector<1x128xf32>
    %cst_117 = arith.constant 9.99999974E-6 : f32
    %479 = vector.broadcast %cst_117 : f32 to vector<1x128xf32>
    %480 = arith.addf %478, %479 : vector<1x128xf32>
    %481 = math.rsqrt %480 : vector<1x128xf32>
    %482 = arith.mulf %481, %437 : vector<1x128xf32>
    %483 = vector.broadcast %482 : vector<1x128xf32> to vector<8x128xf32>
    %484 = arith.mulf %473, %483 : vector<8x128xf32>
    %485 = vector.broadcast %438 : vector<1x128xf32> to vector<8x128xf32>
    %486 = arith.addf %484, %485 : vector<8x128xf32>
    %487 = arith.truncf %486 : vector<8x128xf32> to vector<8x128xbf16>
    %cst_118 = arith.constant dense<0.000000e+00> : vector<8x256xf32>
    %488 = tpu.matmul %487, %439, %cst_118 {dimension_numbers = #tpu.dot_dimension_numbers<[1], [0], [0], [1], [0, 0, 1, 1], [], []>} : vector<8x128xbf16>, vector<128x256xbf16>, vector<8x256xf32> -> vector<8x256xf32>
    %489 = vector.broadcast %440 : vector<1x256xf32> to vector<8x256xf32>
    %490 = arith.addf %488, %489 : vector<8x256xf32>
    %491 = arith.negf %490 : vector<8x256xf32>
    %492 = math.exp %491 : vector<8x256xf32>
    %cst_119 = arith.constant 1.000000e+00 : f32
    %493 = vector.broadcast %cst_119 : f32 to vector<8x256xf32>
    %494 = arith.addf %493, %492 : vector<8x256xf32>
    %495 = arith.divf %493, %494 : vector<8x256xf32>
    %496 = vector.extract_strided_slice %495 {offsets = [0, 0], sizes = [8, 128], strides = [1, 1]} : vector<8x256xf32> to vector<8x128xf32>
    %c0_120 = arith.constant 0 : index
    %c0_121 = arith.constant 0 : index
    %497 = vector.load %arg14[%c0_120, %c0_121] : memref<8x128xf32, #tpu.memory_space<vmem>>, vector<8x128xf32>
    tpu.vector_store %arg14[%c0_120, %c0_121], %496 {strides = array<i32>} : memref<8x128xf32, #tpu.memory_space<vmem>>, vector<8x128xf32>,
    %498 = vector.extract_strided_slice %495 {offsets = [0, 128], sizes = [8, 128], strides = [1, 1]} : vector<8x256xf32> to vector<8x128xf32>
    %c0_122 = arith.constant 0 : index
    %c0_123 = arith.constant 0 : index
    %499 = vector.load %arg15[%c0_122, %c0_123] : memref<8x128xf32, #tpu.memory_space<vmem>>, vector<8x128xf32>
    tpu.vector_store %arg15[%c0_122, %c0_123], %498 {strides = array<i32>} : memref<8x128xf32, #tpu.memory_space<vmem>>, vector<8x128xf32>,
    return
  }
}

</mosaic_0001>

<bundles_post_ra>
// kernel: blstm_mask_estimator.1
= control target key start
LH: loop header
LB: loop body
LE: loop exit
PB: predicated region body
PF: predicated region fallthrough
CT: control target
= control target key end

     0   :  { %s7492_s0 = inlined_call_operand.vmem [shape: bf16[8,128], index: 0, kind: input, shape index: {}]   ;;  %s7493_s1 = inlined_call_operand.hbm [shape: bf16[128,1024], index: 1, kind: input, shape index: {}]   ;;  %s7494_s2 = inlined_call_operand.vmem [shape: f32[1,1024], index: 2, kind: input, shape index: {}]   ;;  %s7495_s3 = inlined_call_operand.hbm [shape: bf16[256,1024], index: 3, kind: input, shape index: {}]   ;;  %s7496_s4 = inlined_call_operand.hbm [shape: bf16[256,128], index: 4, kind: input, shape index: {}]   ;;  %s7497_s5 = inlined_call_operand.vmem [shape: f32[1,128], index: 5, kind: input, shape index: {}]   ;;  %s7498_s6 = inlined_call_operand.vmem [shape: f32[1,128], index: 6, kind: input, shape index: {}]   ;;  %s7499_s7 = inlined_call_operand.vmem [shape: f32[1,128], index: 7, kind: input, shape index: {}]   ;;  %s7500_s8 = inlined_call_operand.hbm [shape: bf16[128,128], index: 8, kind: input, shape index: {}]   ;;  %s7501_s9 = inlined_call_operand.vmem [shape: f32[1,128], index: 9, kind: input, shape index: {}]   ;;  %s7502_s10 = inlined_call_operand.vmem [shape: f32[1,128], index: 10, kind: input, shape index: {}]   ;;  %s7503_s11 = inlined_call_operand.vmem [shape: f32[1,128], index: 11, kind: input, shape index: {}]   ;;  %s7504_s12 = inlined_call_operand.hbm [shape: bf16[128,256], index: 12, kind: input, shape index: {}]   ;;  %s7505_s13 = inlined_call_operand.vmem [shape: f32[1,256], index: 13, kind: input, shape index: {}]   ;;  %s7506_s14 = inlined_call_operand.hbm [shape: f32[8,128], index: 14, kind: output, shape index: {0}]   ;;  %s7507_s15 = inlined_call_operand.hbm [shape: f32[8,128], index: 15, kind: output, shape index: {1}]  }
   0x1   :  { %7585 = sst [smem:[#allocation55_spill]] %s7506_s14 }
   0x2   :  { %21 = vsyncpa [#allocation4], 0 }
   0x3   :  { %22 = vsyncpa [#allocation7], 0 }
   0x4   :  { %23 = vsyncpa [#allocation10], 0 }
   0x5   :  { %24 = vsyncpa [#allocation5], 0 }
   0x6   :  { %25 = vsyncpa [#allocation14], 0  ;;  %s47_s20 = sshll.u32 %s7495_s3, 4  ;;  %s5467_s21 = smov [#allocation6]   ;;  %s48_s20 = int_to_ptr.hbm [resolvable:$true] %s47_s20 }
   0x7   :  { %s49_s22 = sshll.u32 %s5467_s21, 4  ;;  %s5468_s23 = smov 512   ;;  %s50_s22 = int_to_ptr.vmem [resolvable:$true] %s49_s22 }
   0x8   :  { %s5469_s24 = smov 32   ;;  %s79_s27 = sshll.u32 %s7500_s8, 4  ;;  %s80_s27 = int_to_ptr.hbm [resolvable:$true] %s79_s27 }
   0x9   :  { %55 = dma.hbm_to_vmem [thread:$0]  %s48_s20, 16384, %s50_s22, [#allocation7], %s5468_s23, %s5468_s23, %s5469_s24  }
   0xa   :  { %s5470_s28 = smov [#allocation9]   ;;  %s32_s17 = sshll.u32 %s7493_s1, 4  ;;  %s33_s17 = int_to_ptr.hbm [resolvable:$true] %s32_s17 }
   0xb   :  { %s81_s29 = sshll.u32 %s5470_s28, 4  ;;  %s5471_s3 = smov 64   ;;  %s82_s29 = int_to_ptr.vmem [resolvable:$true] %s81_s29 }
   0xc   :  { %s5472_s18 = smov 4   ;;  %s60_s20 = sshll.u32 %s7496_s4, 4  ;;  %s61_s20 = int_to_ptr.hbm [resolvable:$true] %s60_s20 }
   0xd   :  { %87 = dma.hbm_to_vmem [thread:$0]  %s80_s27, 1024, %s82_s29, [#allocation10], %s5471_s3, %s5471_s3, %s5472_s18  }
   0xe   :  { %s5473_s22 = smov [#allocation3]   ;;  %s5474_s8 = smov [#allocation8]  }
   0xf   :  { %s34_s14 = sshll.u32 %s5473_s22, 4  ;;  %s62_s25 = sshll.u32 %s5474_s8, 4  ;;  %s35_s14 = int_to_ptr.vmem [resolvable:$true] %s34_s14  ;;  %s63_s25 = int_to_ptr.vmem [resolvable:$true] %s62_s25 }
  0x10   :  { %40 = dma.hbm_to_vmem [thread:$0]  %s33_s17, 8192, %s35_s14, [#allocation4], %s5468_s23, %s5468_s23, %s5469_s24  }
  0x11   :  { %s98_s1 = sshll.u32 %s7504_s12, 4  ;;  %s5475_s30 = smov [#allocation11]   ;;  %s99_s1 = int_to_ptr.hbm [resolvable:$true] %s98_s1 }
  0x12   :  { %68 = dma.hbm_to_vmem [thread:$0]  %s61_s20, 2048, %s63_s25, [#allocation7], %s5471_s3, %s5471_s3, %s5472_s18  }
  0x13   :  { %s100_s27 = sshll.u32 %s5475_s30, 4  ;;  %s5476_s29 = smov 128   ;;  %s101_s27 = int_to_ptr.vmem [resolvable:$true] %s100_s27 }
  0x14   :  { %s5477_s16 = smov 8  }
  0x15   :  { %106 = dma.hbm_to_vmem [thread:$0]  %s99_s1, 2048, %s101_s27, [#allocation10], %s5476_s29, %s5476_s29, %s5477_s16  }
  0x16   :  { %5457 = dma.done.wait [#allocation4], 8192  }
  0x17   :  { %5458 = vsyncadd [#allocation4], 4294959104 }
  0x18   :  { %5459 = dma.done.wait [#allocation7], 18432  }
  0x19   :  { %5460 = vsyncadd [#allocation7], 4294948864 }
  0x1a   :  { %5461 = dma.done.wait [#allocation10], 3072  }
  0x1b   :  { %5462 = vsyncadd [#allocation10], 4294964224  ;;  %v4272_v0 = vld [vmem:[#allocation3 + $0x1c0] sm:$0xf]  ;;  %v4856_v2 = vld [vmem:[#allocation3 + $0x1c4] sm:$0xf] }
  0x1c   :  { %v4860_v1 = vld [vmem:[#allocation3 + $0x1dc] sm:$0xf0]  ;;  %v4274_v4 = vld [vmem:[#allocation3 + $0x1e0] sm:$0xf0]  ;;  %v4280_v5 = vld [vmem:[#allocation3 + $0x1c8] sm:$0xf] }
  0x1d   :  { %v4273_v3 = vor.u32 %v4860_v1, %v4272_v0  ;;  %v4861_v6 = vld [vmem:[#allocation3 + $0x1e4] sm:$0xf0]  ;;  %v4277_v7 = vor.u32 %v4856_v2, %v4274_v4  ;;  %v4857_v9 = vld [vmem:[#allocation3 + $0x1cc] sm:$0xf]  ;;  %v4240_v11 = vld [vmem:[#allocation3 + $0x180] sm:$0xf] }
  0x1e   :  { %v4281_v8 = vor.u32 %v4861_v6, %v4280_v5  ;;  %v4282_v10 = vld [vmem:[#allocation3 + $0x1e8] sm:$0xf0]  ;;  %v4852_v13 = vld [vmem:[#allocation3 + $0x19c] sm:$0xf0]  ;;  %v4848_v14 = vld [vmem:[#allocation3 + $0x184] sm:$0xf] }
  0x1f   :  { %533 = vmatpush.bf16.msra.mxu0 %v4273_v3  ;;  %v4285_v12 = vor.u32 %v4857_v9, %v4282_v10  ;;  %v4242_v15 = vld [vmem:[#allocation3 + $0x1a0] sm:$0xf0]  ;;  %546 = vmatpush.bf16.msra.mxu1 %v4277_v7  ;;  %v4241_v16 = vor.u32 %v4852_v13, %v4240_v11  ;;  %v4248_v18 = vld [vmem:[#allocation3 + $0x188] sm:$0xf]  ;;  %v4849_v20 = vld [vmem:[#allocation3 + $0x18c] sm:$0xf] }
  0x20   :  { %559 = vmatpush.bf16.msra.mxu2 %v4281_v8  ;;  %v4245_v17 = vor.u32 %v4848_v14, %v4242_v15  ;;  %v4853_v19 = vld [vmem:[#allocation3 + $0x1a4] sm:$0xf0]  ;;  %v4250_v22 = vld [vmem:[#allocation3 + $0x1a8] sm:$0xf0]  ;;  %v4208_v23 = vld [vmem:[#allocation3 + $0x140] sm:$0xf] }
  0x21   :  { %572 = vmatpush.bf16.msra.mxu3 %v4285_v12  ;;  %v4249_v21 = vor.u32 %v4853_v19, %v4248_v18  ;;  %v4844_v24 = vld [vmem:[#allocation3 + $0x15c] sm:$0xf0]  ;;  %v4253_v25 = vor.u32 %v4849_v20, %v4250_v22  ;;  %v4840_v26 = vld [vmem:[#allocation3 + $0x144] sm:$0xf]  ;;  %v4216_v28 = vld [vmem:[#allocation3 + $0x148] sm:$0xf] }
  0x22   :  { %v4210_v27 = vld [vmem:[#allocation3 + $0x160] sm:$0xf0]  ;;  %v4209_v29 = vor.u32 %v4844_v24, %v4208_v23  ;;  %v4845_v30 = vld [vmem:[#allocation3 + $0x164] sm:$0xf0]  ;;  %v4841_v31 = vld [vmem:[#allocation3 + $0x14c] sm:$0xf] }
  0x23   :  { %534 = vmatpush.bf16.msra.mxu0 %v4241_v16  ;;  %v4218_v32 = vld [vmem:[#allocation3 + $0x168] sm:$0xf0]  ;;  %547 = vmatpush.bf16.msra.mxu1 %v4245_v17  ;;  %v4213_v33 = vor.u32 %v4840_v26, %v4210_v27  ;;  %v4217_v34 = vor.u32 %v4845_v30, %v4216_v28  ;;  %v4176_v35 = vld [vmem:[#allocation3 + $0x100] sm:$0xf]  ;;  %v4832_v37 = vld [vmem:[#allocation3 + $0x104] sm:$0xf] }
  0x24   :  { %560 = vmatpush.bf16.msra.mxu2 %v4249_v21  ;;  %v4836_v36 = vld [vmem:[#allocation3 + $0x11c] sm:$0xf0]  ;;  %v4221_v38 = vor.u32 %v4841_v31, %v4218_v32  ;;  %v4178_v39 = vld [vmem:[#allocation3 + $0x120] sm:$0xf0]  ;;  %v4184_v40 = vld [vmem:[#allocation3 + $0x108] sm:$0xf] }
  0x25   :  { %573 = vmatpush.bf16.msra.mxu3 %v4253_v25  ;;  %v4837_v41 = vld [vmem:[#allocation3 + $0x124] sm:$0xf0]  ;;  %v4833_v42 = vld [vmem:[#allocation3 + $0x10c] sm:$0xf]  ;;  %v4177_v44 = vor.u32 %v4836_v36, %v4176_v35  ;;  %v4181_v45 = vor.u32 %v4832_v37, %v4178_v39  ;;  %v4144_v47 = vld [vmem:[#allocation3 + $0xc0] sm:$0xf] }
  0x26   :  { %v4186_v43 = vld [vmem:[#allocation3 + $0x128] sm:$0xf0]  ;;  %v4185_v46 = vor.u32 %v4837_v41, %v4184_v40  ;;  %v4828_v48 = vld [vmem:[#allocation3 + $0xdc] sm:$0xf0]  ;;  %v4824_v49 = vld [vmem:[#allocation3 + $0xc4] sm:$0xf] }
  0x27   :  { %535 = vmatpush.bf16.msra.mxu0 %v4209_v29  ;;  %548 = vmatpush.bf16.msra.mxu1 %v4213_v33  ;;  %v4189_v50 = vor.u32 %v4833_v42, %v4186_v43  ;;  %v4146_v51 = vld [vmem:[#allocation3 + $0xe0] sm:$0xf0]  ;;  %v4152_v52 = vld [vmem:[#allocation3 + $0xc8] sm:$0xf]  ;;  %v4825_v54 = vld [vmem:[#allocation3 + $0xcc] sm:$0xf]  ;;  %v4145_v56 = vor.u32 %v4828_v48, %v4144_v47 }
  0x28   :  { %561 = vmatpush.bf16.msra.mxu2 %v4217_v34  ;;  %v4829_v53 = vld [vmem:[#allocation3 + $0xe4] sm:$0xf0]  ;;  %v4154_v55 = vld [vmem:[#allocation3 + $0xe8] sm:$0xf0]  ;;  %v4149_v57 = vor.u32 %v4824_v49, %v4146_v51  ;;  %v4112_v59 = vld [vmem:[#allocation3 + $0x80] sm:$0xf] }
  0x29   :  { %574 = vmatpush.bf16.msra.mxu3 %v4221_v38  ;;  %v4153_v58 = vor.u32 %v4829_v53, %v4152_v52  ;;  %v4820_v60 = vld [vmem:[#allocation3 + $0x9c] sm:$0xf0]  ;;  %v4816_v61 = vld [vmem:[#allocation3 + $0x84] sm:$0xf]  ;;  %v4157_v62 = vor.u32 %v4825_v54, %v4154_v55  ;;  %v4120_v0 = vld [vmem:[#allocation3 + $0x88] sm:$0xf] }
  0x2a   :  { %v4114_v63 = vld [vmem:[#allocation3 + $0xa0] sm:$0xf0]  ;;  %v4821_v1 = vld [vmem:[#allocation3 + $0xa4] sm:$0xf0]  ;;  %v4817_v2 = vld [vmem:[#allocation3 + $0x8c] sm:$0xf]  ;;  %v4113_v4 = vor.u32 %v4820_v60, %v4112_v59 }
  0x2b   :  { %536 = vmatpush.bf16.msra.mxu0 %v4177_v44  ;;  %549 = vmatpush.bf16.msra.mxu1 %v4181_v45  ;;  %v4122_v3 = vld [vmem:[#allocation3 + $0xa8] sm:$0xf0]  ;;  %v4117_v5 = vor.u32 %v4816_v61, %v4114_v63  ;;  %v4121_v6 = vor.u32 %v4821_v1, %v4120_v0  ;;  %v4080_v7 = vld [vmem:[#allocation3 + $0x40] sm:$0xf]  ;;  %v4808_v9 = vld [vmem:[#allocation3 + $0x44] sm:$0xf] }
  0x2c   :  { %562 = vmatpush.bf16.msra.mxu2 %v4185_v46  ;;  %v4812_v8 = vld [vmem:[#allocation3 + $0x5c] sm:$0xf0]  ;;  %v4125_v10 = vor.u32 %v4817_v2, %v4122_v3  ;;  %v4082_v11 = vld [vmem:[#allocation3 + $0x60] sm:$0xf0]  ;;  %v4088_v12 = vld [vmem:[#allocation3 + $0x48] sm:$0xf] }
  0x2d   :  { %575 = vmatpush.bf16.msra.mxu3 %v4189_v50  ;;  %v4813_v13 = vld [vmem:[#allocation3 + $0x64] sm:$0xf0]  ;;  %v4809_v14 = vld [vmem:[#allocation3 + $0x4c] sm:$0xf]  ;;  %v4081_v16 = vor.u32 %v4812_v8, %v4080_v7  ;;  %v4048_v17 = vld [vmem:[#allocation3] sm:$0xf]  ;;  %v4085_v19 = vor.u32 %v4808_v9, %v4082_v11 }
  0x2e   :  { %v4090_v15 = vld [vmem:[#allocation3 + $0x68] sm:$0xf0]  ;;  %v4804_v18 = vld [vmem:[#allocation3 + $0x1c] sm:$0xf0]  ;;  %v4089_v20 = vor.u32 %v4813_v13, %v4088_v12  ;;  %v4800_v21 = vld [vmem:[#allocation3 + $0x4] sm:$0xf] }
  0x2f   :  { %537 = vmatpush.bf16.msra.mxu0 %v4145_v56  ;;  %550 = vmatpush.bf16.msra.mxu1 %v4149_v57  ;;  %v4050_v22 = vld [vmem:[#allocation3 + $0x20] sm:$0xf0]  ;;  %v4056_v23 = vld [vmem:[#allocation3 + $0x8] sm:$0xf]  ;;  %v4093_v24 = vor.u32 %v4809_v14, %v4090_v15  ;;  %v4801_v26 = vld [vmem:[#allocation3 + $0xc] sm:$0xf]  ;;  %v4049_v31 = vor.u32 %v4804_v18, %v4048_v17 }
  0x30   :  { %563 = vmatpush.bf16.msra.mxu2 %v4153_v58  ;;  %v4805_v25 = vld [vmem:[#allocation3 + $0x24] sm:$0xf0]  ;;  %v4058_v27 = vld [vmem:[#allocation3 + $0x28] sm:$0xf0]  ;;  %v4288_v28 = vld [vmem:[#allocation3 + $0x1d0] sm:$0xf]  ;;  %v4053_v35 = vor.u32 %v4800_v21, %v4050_v22 }
  0x31   :  { %576 = vmatpush.bf16.msra.mxu3 %v4157_v62  ;;  %v4862_v29 = vld [vmem:[#allocation3 + $0x1ec] sm:$0xf0]  ;;  %v4858_v30 = vld [vmem:[#allocation3 + $0x1d4] sm:$0xf]  ;;  %v4296_v33 = vld [vmem:[#allocation3 + $0x1d8] sm:$0xf]  ;;  %v4057_v36 = vor.u32 %v4805_v25, %v4056_v23  ;;  %v4061_v39 = vor.u32 %v4801_v26, %v4058_v27 }
  0x32   :  { %v4290_v32 = vld [vmem:[#allocation3 + $0x1f0] sm:$0xf0]  ;;  %v4863_v34 = vld [vmem:[#allocation3 + $0x1f4] sm:$0xf0]  ;;  %v4859_v37 = vld [vmem:[#allocation3 + $0x1dc] sm:$0xf]  ;;  %v4289_v40 = vor.u32 %v4862_v29, %v4288_v28 }
  0x33   :  { %538 = vmatpush.bf16.msra.mxu0 %v4113_v4  ;;  %551 = vmatpush.bf16.msra.mxu1 %v4117_v5  ;;  %v4298_v38 = vld [vmem:[#allocation3 + $0x1f8] sm:$0xf0]  ;;  %v4293_v41 = vor.u32 %v4858_v30, %v4290_v32  ;;  %v4297_v42 = vor.u32 %v4863_v34, %v4296_v33  ;;  %v4256_v43 = vld [vmem:[#allocation3 + $0x190] sm:$0xf]  ;;  %v4850_v45 = vld [vmem:[#allocation3 + $0x194] sm:$0xf] }
  0x34   :  { %564 = vmatpush.bf16.msra.mxu2 %v4121_v6  ;;  %v4854_v44 = vld [vmem:[#allocation3 + $0x1ac] sm:$0xf0]  ;;  %v4301_v46 = vor.u32 %v4859_v37, %v4298_v38  ;;  %v4258_v47 = vld [vmem:[#allocation3 + $0x1b0] sm:$0xf0]  ;;  %v4264_v48 = vld [vmem:[#allocation3 + $0x198] sm:$0xf] }
  0x35   :  { %577 = vmatpush.bf16.msra.mxu3 %v4125_v10  ;;  %v4855_v49 = vld [vmem:[#allocation3 + $0x1b4] sm:$0xf0]  ;;  %v4851_v50 = vld [vmem:[#allocation3 + $0x19c] sm:$0xf]  ;;  %v4257_v52 = vor.u32 %v4854_v44, %v4256_v43  ;;  %v4261_v53 = vor.u32 %v4850_v45, %v4258_v47  ;;  %v4224_v55 = vld [vmem:[#allocation3 + $0x150] sm:$0xf] }
  0x36   :  { %v4266_v51 = vld [vmem:[#allocation3 + $0x1b8] sm:$0xf0]  ;;  %v4265_v54 = vor.u32 %v4855_v49, %v4264_v48  ;;  %v4846_v56 = vld [vmem:[#allocation3 + $0x16c] sm:$0xf0]  ;;  %v4842_v57 = vld [vmem:[#allocation3 + $0x154] sm:$0xf] }
  0x37   :  { %539 = vmatpush.bf16.msra.mxu0 %v4081_v16  ;;  %552 = vmatpush.bf16.msra.mxu1 %v4085_v19  ;;  %v4269_v58 = vor.u32 %v4851_v50, %v4266_v51  ;;  %v4226_v59 = vld [vmem:[#allocation3 + $0x170] sm:$0xf0]  ;;  %v4232_v60 = vld [vmem:[#allocation3 + $0x158] sm:$0xf]  ;;  %v4843_v62 = vld [vmem:[#allocation3 + $0x15c] sm:$0xf]  ;;  %v4225_v0 = vor.u32 %v4846_v56, %v4224_v55 }
  0x38   :  { %565 = vmatpush.bf16.msra.mxu2 %v4089_v20  ;;  %v4847_v61 = vld [vmem:[#allocation3 + $0x174] sm:$0xf0]  ;;  %v4234_v63 = vld [vmem:[#allocation3 + $0x178] sm:$0xf0]  ;;  %v5580_v1 = vld [vmem:[%s7492_s0] sm:$0xf]  ;;  %v4229_v2 = vor.u32 %v4842_v57, %v4226_v59 }
  0x39   :  { %578 = vmatpush.bf16.msra.mxu3 %v4093_v24  ;;  %v4233_v3 = vor.u32 %v4847_v61, %v4232_v60  ;;  %v4192_v4 = vld [vmem:[#allocation3 + $0x110] sm:$0xf]  ;;  %v4834_v6 = vld [vmem:[#allocation3 + $0x114] sm:$0xf]  ;;  %v4237_v7 = vor.u32 %v4843_v62, %v4234_v63  ;;  %v4200_v9 = vld [vmem:[#allocation3 + $0x118] sm:$0xf] }
  0x3a   :  { %v4838_v5 = vld [vmem:[#allocation3 + $0x12c] sm:$0xf0]  ;;  %v4194_v8 = vld [vmem:[#allocation3 + $0x130] sm:$0xf0]  ;;  %v4839_v10 = vld [vmem:[#allocation3 + $0x134] sm:$0xf0] }
  0x3b   :  { %540 = vmatpush.bf16.msra.mxu0 %v4049_v31  ;;  %553 = vmatpush.bf16.msra.mxu1 %v4053_v35  ;;  %v4835_v11 = vld [vmem:[#allocation3 + $0x11c] sm:$0xf]  ;;  %v4193_v13 = vor.u32 %v4838_v5, %v4192_v4  ;;  %v4197_v14 = vor.u32 %v4834_v6, %v4194_v8  ;;  %v4201_v15 = vor.u32 %v4839_v10, %v4200_v9  ;;  %v4160_v16 = vld [vmem:[#allocation3 + $0xd0] sm:$0xf]  ;;  %v4826_v18 = vld [vmem:[#allocation3 + $0xd4] sm:$0xf] }
  0x3c   :  { %566 = vmatpush.bf16.msra.mxu2 %v4057_v36  ;;  %v4202_v12 = vld [vmem:[#allocation3 + $0x138] sm:$0xf0]  ;;  %v4830_v17 = vld [vmem:[#allocation3 + $0xec] sm:$0xf0]  ;;  %v4162_v20 = vld [vmem:[#allocation3 + $0xf0] sm:$0xf0] }
  0x3d   :  { %579 = vmatpush.bf16.msra.mxu3 %v4061_v39  ;;  %v4205_v19 = vor.u32 %v4835_v11, %v4202_v12  ;;  %v4168_v21 = vld [vmem:[#allocation3 + $0xd8] sm:$0xf]  ;;  %v4827_v23 = vld [vmem:[#allocation3 + $0xdc] sm:$0xf]  ;;  %v4161_v25 = vor.u32 %v4830_v17, %v4160_v16  ;;  %v4165_v26 = vor.u32 %v4826_v18, %v4162_v20  ;;  %v4128_v28 = vld [vmem:[#allocation3 + $0x90] sm:$0xf] }
  0x3e   :  { %541 = vmatmul.bf16.vlgmr.msra.gmra.mxu0 %v5580_v1  ;;  %554 = vmatmul.bf16.vlgmr.msra.gmra.mxu1 %v5580_v1  ;;  %v4831_v22 = vld [vmem:[#allocation3 + $0xf4] sm:$0xf0]  ;;  %v4170_v24 = vld [vmem:[#allocation3 + $0xf8] sm:$0xf0]  ;;  %v4822_v29 = vld [vmem:[#allocation3 + $0xac] sm:$0xf0] }
  0x3f   :  { %585 = vmatpush.bf16.msrb.mxu0 %v4289_v40  ;;  %598 = vmatpush.bf16.msrb.mxu1 %v4293_v41  ;;  %v4169_v27 = vor.u32 %v4831_v22, %v4168_v21  ;;  %v4818_v30 = vld [vmem:[#allocation3 + $0x94] sm:$0xf]  ;;  %v4173_v31 = vor.u32 %v4827_v23, %v4170_v24  ;;  %v4136_v33 = vld [vmem:[#allocation3 + $0x98] sm:$0xf]  ;;  %v4819_v35 = vld [vmem:[#allocation3 + $0x9c] sm:$0xf]  ;;  %v4129_v37 = vor.u32 %v4822_v29, %v4128_v28 }
  0x40   :  { %611 = vmatpush.bf16.msrb.mxu2 %v4297_v42  ;;  %580 = vmatmul.bf16.vlgmr.msra.gmra.mxu3 %v5580_v1  ;;  %v4130_v32 = vld [vmem:[#allocation3 + $0xb0] sm:$0xf0]  ;;  %v4823_v34 = vld [vmem:[#allocation3 + $0xb4] sm:$0xf0]  ;;  %v4138_v36 = vld [vmem:[#allocation3 + $0xb8] sm:$0xf0] }
  0x41   :  { %624 = vmatpush.bf16.msrb.mxu3 %v4301_v46  ;;  %567 = vmatmul.bf16.vlgmr.msra.gmra.mxu2 %v5580_v1  ;;  %v4133_v38 = vor.u32 %v4818_v30, %v4130_v32  ;;  %v4137_v39 = vor.u32 %v4823_v34, %v4136_v33  ;;  %v4096_v40 = vld [vmem:[#allocation3 + $0x50] sm:$0xf]  ;;  %v4810_v42 = vld [vmem:[#allocation3 + $0x54] sm:$0xf]  ;;  %v4141_v43 = vor.u32 %v4819_v35, %v4138_v36  ;;  %v4104_v45 = vld [vmem:[#allocation3 + $0x58] sm:$0xf] }
  0x42   :  { %v4814_v41 = vld [vmem:[#allocation3 + $0x6c] sm:$0xf0]  ;;  %v4098_v44 = vld [vmem:[#allocation3 + $0x70] sm:$0xf0]  ;;  %v4815_v46 = vld [vmem:[#allocation3 + $0x74] sm:$0xf0] }
  0x43   :  { %586 = vmatpush.bf16.msrb.mxu0 %v4257_v52  ;;  %599 = vmatpush.bf16.msrb.mxu1 %v4261_v53  ;;  %v4811_v47 = vld [vmem:[#allocation3 + $0x5c] sm:$0xf]  ;;  %v4097_v49 = vor.u32 %v4814_v41, %v4096_v40  ;;  %v4064_v50 = vld [vmem:[#allocation3 + $0x10] sm:$0xf]  ;;  %v4101_v52 = vor.u32 %v4810_v42, %v4098_v44  ;;  %v4105_v53 = vor.u32 %v4815_v46, %v4104_v45  ;;  %v4066_v55 = vld [vmem:[#allocation3 + $0x30] sm:$0xf0] }
  0x44   :  { %612 = vmatpush.bf16.msrb.mxu2 %v4265_v54  ;;  %v4106_v48 = vld [vmem:[#allocation3 + $0x78] sm:$0xf0]  ;;  %v4806_v51 = vld [vmem:[#allocation3 + $0x2c] sm:$0xf0]  ;;  %v4802_v54 = vld [vmem:[#allocation3 + $0x14] sm:$0xf] }
  0x45   :  { %625 = vmatpush.bf16.msrb.mxu3 %v4269_v58  ;;  %v4072_v56 = vld [vmem:[#allocation3 + $0x18] sm:$0xf]  ;;  %v4109_v57 = vor.u32 %v4811_v47, %v4106_v48  ;;  %v4803_v59 = vld [vmem:[#allocation3 + $0x1c] sm:$0xf]  ;;  %v4416_v61 = vld [vmem:[#allocation6 + $0x1c0] sm:$0xf]  ;;  %v4069_v5 = vor.u32 %v4802_v54, %v4066_v55 }
  0x46   :  { %v4807_v58 = vld [vmem:[#allocation3 + $0x34] sm:$0xf0]  ;;  %v4074_v60 = vld [vmem:[#allocation3 + $0x38] sm:$0xf0]  ;;  %v4894_v62 = vld [vmem:[#allocation6 + $0x1dc] sm:$0xf0] }
  0x47   :  { %587 = vmatpush.bf16.msrb.mxu0 %v4225_v0  ;;  %600 = vmatpush.bf16.msrb.mxu1 %v4229_v2  ;;  %v4892_v63 = vld [vmem:[#allocation6 + $0x1c4] sm:$0xf]  ;;  %v4065_v0 = vor.u32 %v4806_v51, %v4064_v50  ;;  %v4895_v4 = vld [vmem:[#allocation6 + $0x1e4] sm:$0xf0]  ;;  %v4073_v6 = vor.u32 %v4807_v58, %v4072_v56  ;;  %v4426_v8 = vld [vmem:[#allocation6 + $0x1e8] sm:$0xf0]  ;;  %v4077_v9 = vor.u32 %v4803_v59, %v4074_v60 }
  0x48   :  { %613 = vmatpush.bf16.msrb.mxu2 %v4233_v3  ;;  %v4418_v2 = vld [vmem:[#allocation6 + $0x1e0] sm:$0xf0]  ;;  %v4424_v3 = vld [vmem:[#allocation6 + $0x1c8] sm:$0xf]  ;;  %v5586_v10 = vor.u32 %v4894_v62, %v4416_v61  ;;  %v4889_v20 = vld [vmem:[#allocation6 + $0x18c] sm:$0xf] }
  0x49   :  { %626 = vmatpush.bf16.msrb.mxu3 %v4237_v7  ;;  %v4893_v7 = vld [vmem:[#allocation6 + $0x1cc] sm:$0xf]  ;;  %v5588_v11 = vor.u32 %v4892_v63, %v4418_v2  ;;  %v5590_v12 = vor.u32 %v4895_v4, %v4424_v3  ;;  %v4402_v17 = vld [vmem:[#allocation6 + $0x1a0] sm:$0xf0]  ;;  %v4408_v18 = vld [vmem:[#allocation6 + $0x188] sm:$0xf] }
  0x4a   :  { %v5592_v16 = vor.u32 %v4893_v7, %v4426_v8  ;;  %v4410_v21 = vld [vmem:[#allocation6 + $0x1a8] sm:$0xf0]  ;;  %v4386_v29 = vld [vmem:[#allocation6 + $0x160] sm:$0xf0]  ;;  %v4392_v30 = vld [vmem:[#allocation6 + $0x148] sm:$0xf] }
  0x4b   :  { %588 = vmatpush.bf16.msrb.mxu0 %v4193_v13  ;;  %601 = vmatpush.bf16.msrb.mxu1 %v4197_v14  ;;  %v4400_v13 = vld [vmem:[#allocation6 + $0x180] sm:$0xf]  ;;  %v5604_v28 = vor.u32 %v4889_v20, %v4410_v21  ;;  %v4885_v32 = vld [vmem:[#allocation6 + $0x14c] sm:$0xf]  ;;  %v4370_v41 = vld [vmem:[#allocation6 + $0x120] sm:$0xf0] }
  0x4c   :  { %614 = vmatpush.bf16.msrb.mxu2 %v4201_v15  ;;  %v4890_v14 = vld [vmem:[#allocation6 + $0x19c] sm:$0xf0]  ;;  %v4888_v15 = vld [vmem:[#allocation6 + $0x184] sm:$0xf]  ;;  %v4394_v33 = vld [vmem:[#allocation6 + $0x168] sm:$0xf0] }
  0x4d   :  { %627 = vmatpush.bf16.msrb.mxu3 %v4205_v19  ;;  %v4891_v19 = vld [vmem:[#allocation6 + $0x1a4] sm:$0xf0]  ;;  %v5595_v22 = vor.u32 %v4890_v14, %v4400_v13  ;;  %v5599_v23 = vor.u32 %v4888_v15, %v4402_v17  ;;  %v5620_v40 = vor.u32 %v4885_v32, %v4394_v33  ;;  %v4881_v44 = vld [vmem:[#allocation6 + $0x10c] sm:$0xf]  ;;  %v4352_v48 = vld [vmem:[#allocation6 + $0xc0] sm:$0xf] }
  0x4e   :  { %v5601_v24 = vor.u32 %v4891_v19, %v4408_v18  ;;  %v4376_v42 = vld [vmem:[#allocation6 + $0x108] sm:$0xf]  ;;  %v4876_v50 = vld [vmem:[#allocation6 + $0xc4] sm:$0xf]  ;;  %v4877_v55 = vld [vmem:[#allocation6 + $0xcc] sm:$0xf] }
  0x4f   :  { %589 = vmatpush.bf16.msrb.mxu0 %v4161_v25  ;;  %602 = vmatpush.bf16.msrb.mxu1 %v4165_v26  ;;  %v4384_v25 = vld [vmem:[#allocation6 + $0x140] sm:$0xf]  ;;  %v4879_v54 = vld [vmem:[#allocation6 + $0xe4] sm:$0xf0]  ;;  %v4362_v56 = vld [vmem:[#allocation6 + $0xe8] sm:$0xf0] }
  0x50   :  { %615 = vmatpush.bf16.msrb.mxu2 %v4169_v27  ;;  %v4886_v26 = vld [vmem:[#allocation6 + $0x15c] sm:$0xf0]  ;;  %v4884_v27 = vld [vmem:[#allocation6 + $0x144] sm:$0xf]  ;;  %v5644_v2 = vor.u32 %v4877_v55, %v4362_v56  ;;  %v4875_v3 = vld [vmem:[#allocation6 + $0xa4] sm:$0xf0] }
  0x51   :  { %628 = vmatpush.bf16.msrb.mxu3 %v4173_v31  ;;  %v4887_v31 = vld [vmem:[#allocation6 + $0x164] sm:$0xf0]  ;;  %v5610_v34 = vor.u32 %v4886_v26, %v4384_v25  ;;  %v5615_v35 = vor.u32 %v4884_v27, %v4386_v29  ;;  %v4336_v58 = vld [vmem:[#allocation6 + $0x80] sm:$0xf]  ;;  %v4872_v62 = vld [vmem:[#allocation6 + $0x84] sm:$0xf] }
  0x52   :  { %v5617_v36 = vor.u32 %v4887_v31, %v4392_v30  ;;  %v4874_v59 = vld [vmem:[#allocation6 + $0x9c] sm:$0xf0]  ;;  %v4338_v63 = vld [vmem:[#allocation6 + $0xa0] sm:$0xf0]  ;;  %v4873_v4 = vld [vmem:[#allocation6 + $0x8c] sm:$0xf] }
  0x53   :  { %590 = vmatpush.bf16.msrb.mxu0 %v4129_v37  ;;  %603 = vmatpush.bf16.msrb.mxu1 %v4133_v38  ;;  %v4368_v37 = vld [vmem:[#allocation6 + $0x100] sm:$0xf]  ;;  %v5651_v7 = vor.u32 %v4872_v62, %v4338_v63  ;;  %v4868_v14 = vld [vmem:[#allocation6 + $0x44] sm:$0xf]  ;;  %v4328_v18 = vld [vmem:[#allocation6 + $0x48] sm:$0xf] }
  0x54   :  { %616 = vmatpush.bf16.msrb.mxu2 %v4137_v39  ;;  %v4882_v38 = vld [vmem:[#allocation6 + $0x11c] sm:$0xf0]  ;;  %v4880_v39 = vld [vmem:[#allocation6 + $0x104] sm:$0xf]  ;;  %v4871_v19 = vld [vmem:[#allocation6 + $0x64] sm:$0xf0] }
  0x55   :  { %629 = vmatpush.bf16.msrb.mxu3 %v4141_v43  ;;  %v4883_v43 = vld [vmem:[#allocation6 + $0x124] sm:$0xf0]  ;;  %v5623_v45 = vor.u32 %v4882_v38, %v4368_v37  ;;  %v5627_v46 = vor.u32 %v4880_v39, %v4370_v41  ;;  %v4870_v13 = vld [vmem:[#allocation6 + $0x5c] sm:$0xf0]  ;;  %v4322_v17 = vld [vmem:[#allocation6 + $0x60] sm:$0xf0]  ;;  %v5665_v30 = vor.u32 %v4871_v19, %v4328_v18 }
  0x56   :  { %v5629_v47 = vor.u32 %v4883_v43, %v4376_v42  ;;  %v4869_v20 = vld [vmem:[#allocation6 + $0x4c] sm:$0xf]  ;;  %v4304_v26 = vld [vmem:[#allocation6] sm:$0xf]  ;;  %v5663_v29 = vor.u32 %v4868_v14, %v4322_v17  ;;  %v4864_v31 = vld [vmem:[#allocation6 + $0x4] sm:$0xf] }
  0x57   :  { %591 = vmatpush.bf16.msrb.mxu0 %v4097_v49  ;;  %604 = vmatpush.bf16.msrb.mxu1 %v4101_v52  ;;  %v4878_v49 = vld [vmem:[#allocation6 + $0xdc] sm:$0xf0]  ;;  %v4354_v52 = vld [vmem:[#allocation6 + $0xe0] sm:$0xf0]  ;;  %v4330_v21 = vld [vmem:[#allocation6 + $0x68] sm:$0xf0] }
  0x58   :  { %617 = vmatpush.bf16.msrb.mxu2 %v4105_v53  ;;  %v4360_v53 = vld [vmem:[#allocation6 + $0xc8] sm:$0xf]  ;;  %v5639_v60 = vor.u32 %v4876_v50, %v4354_v52  ;;  %v4866_v27 = vld [vmem:[#allocation6 + $0x1c] sm:$0xf0]  ;;  %v4306_v32 = vld [vmem:[#allocation6 + $0x20] sm:$0xf0]  ;;  %v5668_v37 = vor.u32 %v4869_v20, %v4330_v21 }
  0x59   :  { %630 = vmatpush.bf16.msrb.mxu3 %v4109_v57  ;;  %v5635_v57 = vor.u32 %v4878_v49, %v4352_v48  ;;  %v5641_v61 = vor.u32 %v4879_v54, %v4360_v53  ;;  %v4312_v33 = vld [vmem:[#allocation6 + $0x8] sm:$0xf]  ;;  %v4865_v39 = vld [vmem:[#allocation6 + $0xc] sm:$0xf]  ;;  %v4544_v42 = vld [vmem:[#allocation6 + $0x3d0] sm:$0xf]  ;;  %v5675_v52 = vor.u32 %v4864_v31, %v4306_v32 }
  0x5a   :  { %v4867_v38 = vld [vmem:[#allocation6 + $0x24] sm:$0xf0]  ;;  %v4314_v41 = vld [vmem:[#allocation6 + $0x28] sm:$0xf0]  ;;  %v4926_v43 = vld [vmem:[#allocation6 + $0x3ec] sm:$0xf0] }
  0x5b   :  { %592 = vmatpush.bf16.msrb.mxu0 %v4065_v0  ;;  %605 = vmatpush.bf16.msrb.mxu1 %v4069_v5  ;;  %v4344_v0 = vld [vmem:[#allocation6 + $0x88] sm:$0xf]  ;;  %v4346_v5 = vld [vmem:[#allocation6 + $0xa8] sm:$0xf0]  ;;  %v4546_v48 = vld [vmem:[#allocation6 + $0x3f0] sm:$0xf0]  ;;  %v5677_v53 = vor.u32 %v4867_v38, %v4312_v33  ;;  %v5680_v56 = vor.u32 %v4865_v39, %v4314_v41 }
  0x5c   :  { %618 = vmatpush.bf16.msrb.mxu2 %v4073_v6  ;;  %v5647_v6 = vor.u32 %v4874_v59, %v4336_v58  ;;  %v5653_v8 = vor.u32 %v4875_v3, %v4344_v0  ;;  %v5656_v15 = vor.u32 %v4873_v4, %v4346_v5  ;;  %v4552_v49 = vld [vmem:[#allocation6 + $0x3d8] sm:$0xf]  ;;  %v4925_v54 = vld [vmem:[#allocation6 + $0x3dc] sm:$0xf]  ;;  %v5682_v58 = vor.u32 %v4926_v43, %v4544_v42  ;;  %v4528_v63 = vld [vmem:[#allocation6 + $0x390] sm:$0xf] }
  0x5d   :  { %631 = vmatpush.bf16.msrb.mxu3 %v4077_v9  ;;  %v4320_v9 = vld [vmem:[#allocation6 + $0x40] sm:$0xf]  ;;  %v4927_v50 = vld [vmem:[#allocation6 + $0x3f4] sm:$0xf0]  ;;  %7586 = vst [vmem:[#allocation20_spill] sm:$0xff] %v5677_v53  ;;  %v7508_v31 = vmov 0  }
  0x5e   :  { %593 = vmatmul.bf16.vlgmr.msrb.gmra.mxu0 %v5580_v1  ;;  %606 = vmatmul.bf16.vlgmr.msrb.gmra.mxu1 %v5580_v1  ;;  %v5659_v25 = vor.u32 %v4870_v13, %v4320_v9  ;;  %v4554_v55 = vld [vmem:[#allocation6 + $0x3f8] sm:$0xf0]  ;;  %7587 = vst [vmem:[#allocation21_spill] sm:$0xff] %v5680_v56  ;;  %v5686_v62 = vor.u32 %v4927_v50, %v4552_v49  ;;  %v4922_v0 = vld [vmem:[#allocation6 + $0x3ac] sm:$0xf0]  ;;  %s4029_s25 = sshll.u32 %s7507_s15, 4  ;;  %s4030_s25 = int_to_ptr.hbm [resolvable:$true] %s4029_s25 }
  0x5f   :  { %892 = vmatpush.bf16.msra.mxu0 %v5586_v10  ;;  %905 = vmatpush.bf16.msra.mxu1 %v5588_v11  ;;  %7588 = vst [vmem:[#allocation22_spill] sm:$0xff] %v5682_v58  ;;  %v4920_v3 = vld [vmem:[#allocation6 + $0x394] sm:$0xf]  ;;  %v5689_v4 = vor.u32 %v4925_v54, %v4554_v55  ;;  %v4536_v9 = vld [vmem:[#allocation6 + $0x398] sm:$0xf]  ;;  %v5695_v18 = vor.u32 %v4922_v0, %v4528_v63  ;;  %s5481_s26 = smov [#allocation12]  }
  0x60   :  { %918 = vmatpush.bf16.msra.mxu2 %v5590_v12  ;;  %632 = vmatmul.bf16.vlgmr.msrb.gmra.mxu3 %v5580_v1  ;;  %7590 = vst [vmem:[#allocation24_spill] sm:$0xff] %v5686_v62  ;;  %v4530_v5 = vld [vmem:[#allocation6 + $0x3b0] sm:$0xf0]  ;;  %v4923_v13 = vld [vmem:[#allocation6 + $0x3b4] sm:$0xf0]  ;;  %s4016_s28 = sshll.u32 %s5481_s26, 4  ;;  %s4017_s28 = int_to_ptr.vmem [resolvable:$true] %s4016_s28 }
  0x61   :  { %931 = vmatpush.bf16.msra.mxu3 %v5592_v16  ;;  %619 = vmatmul.bf16.vlgmr.msrb.gmra.mxu2 %v5580_v1  ;;  %v4378_v1 = vld [vmem:[#allocation6 + $0x128] sm:$0xf0]  ;;  %7591 = vst [vmem:[#allocation25_spill] sm:$0xff] %v5689_v4  ;;  %v4921_v14 = vld [vmem:[#allocation6 + $0x39c] sm:$0xf]  ;;  %v5699_v19 = vor.u32 %v4920_v3, %v4530_v5  ;;  %v5701_v20 = vor.u32 %v4923_v13, %v4536_v9  ;;  %s7922_s15 = sld [smem:[#allocation55_spill]] }
  0x62   :  { %v5632_v51 = vor.u32 %v4881_v44, %v4378_v1  ;;  %v4924_v44 = vld [vmem:[#allocation6 + $0x3d4] sm:$0xf]  ;;  %v5671_v1 = vor.u32 %v4866_v27, %v4304_v26  ;;  %v4538_v17 = vld [vmem:[#allocation6 + $0x3b8] sm:$0xf0]  ;;  %7592 = vst [vmem:[#allocation26_spill] sm:$0xff] %v5695_v18 }
  0x63   :  { %893 = vmatpush.bf16.msra.mxu0 %v5595_v22  ;;  %906 = vmatpush.bf16.msra.mxu1 %v5599_v23  ;;  %v5684_v59 = vor.u32 %v4924_v44, %v4546_v48  ;;  %7593 = vst [vmem:[#allocation27_spill] sm:$0xff] %v5699_v19  ;;  %v4512_v21 = vld [vmem:[#allocation6 + $0x350] sm:$0xf]  ;;  %v4916_v27 = vld [vmem:[#allocation6 + $0x354] sm:$0xf]  ;;  %v5705_v32 = vor.u32 %v4921_v14, %v4538_v17 }
  0x64   :  { %919 = vmatpush.bf16.msra.mxu2 %v5601_v24  ;;  %7594 = vst [vmem:[#allocation28_spill] sm:$0xff] %v5701_v20  ;;  %v4918_v26 = vld [vmem:[#allocation6 + $0x36c] sm:$0xf0]  ;;  %v4514_v33 = vld [vmem:[#allocation6 + $0x370] sm:$0xf0] }
  0x65   :  { %932 = vmatpush.bf16.msra.mxu3 %v5604_v28  ;;  %7589 = vst [vmem:[#allocation23_spill] sm:$0xff] %v5684_v59  ;;  %v4520_v38 = vld [vmem:[#allocation6 + $0x358] sm:$0xf]  ;;  %v4917_v41 = vld [vmem:[#allocation6 + $0x35c] sm:$0xf]  ;;  %v5711_v43 = vor.u32 %v4918_v26, %v4512_v21  ;;  %v5715_v44 = vor.u32 %v4916_v27, %v4514_v33 }
  0x66   :  { %7595 = vst [vmem:[#allocation29_spill] sm:$0xff] %v5705_v32  ;;  %v4919_v39 = vld [vmem:[#allocation6 + $0x374] sm:$0xf0]  ;;  %v4522_v42 = vld [vmem:[#allocation6 + $0x378] sm:$0xf0] }
  0x67   :  { %894 = vmatpush.bf16.msra.mxu0 %v5610_v34  ;;  %907 = vmatpush.bf16.msra.mxu1 %v5615_v35  ;;  %7596 = vst [vmem:[#allocation30_spill] sm:$0xff] %v5711_v43  ;;  %v5717_v48 = vor.u32 %v4919_v39, %v4520_v38  ;;  %v4496_v49 = vld [vmem:[#allocation6 + $0x310] sm:$0xf]  ;;  %v4912_v54 = vld [vmem:[#allocation6 + $0x314] sm:$0xf]  ;;  %v5720_v55 = vor.u32 %v4917_v41, %v4522_v42  ;;  %s4018_s27 = sshll.u32 %s7922_s15, 4  ;;  %s4019_s27 = int_to_ptr.hbm [resolvable:$true] %s4018_s27 }
  0x68   :  { %920 = vmatpush.bf16.msra.mxu2 %v5617_v36  ;;  %7597 = vst [vmem:[#allocation31_spill] sm:$0xff] %v5715_v44  ;;  %v4914_v50 = vld [vmem:[#allocation6 + $0x32c] sm:$0xf0]  ;;  %v4498_v63 = vld [vmem:[#allocation6 + $0x330] sm:$0xf0] }
  0x69   :  { %933 = vmatpush.bf16.msra.mxu3 %v5620_v40  ;;  %7598 = vst [vmem:[#allocation32_spill] sm:$0xff] %v5717_v48  ;;  %v4504_v0 = vld [vmem:[#allocation6 + $0x318] sm:$0xf]  ;;  %v4913_v5 = vld [vmem:[#allocation6 + $0x31c] sm:$0xf]  ;;  %v5723_v13 = vor.u32 %v4914_v50, %v4496_v49  ;;  %v5727_v14 = vor.u32 %v4912_v54, %v4498_v63 }
  0x6a   :  { %7599 = vst [vmem:[#allocation33_spill] sm:$0xff] %v5720_v55  ;;  %v4915_v3 = vld [vmem:[#allocation6 + $0x334] sm:$0xf0]  ;;  %v4506_v9 = vld [vmem:[#allocation6 + $0x338] sm:$0xf0] }
  0x6b   :  { %895 = vmatpush.bf16.msra.mxu0 %v5623_v45  ;;  %908 = vmatpush.bf16.msra.mxu1 %v5627_v46  ;;  %7600 = vst [vmem:[#allocation34_spill] sm:$0xff] %v5723_v13  ;;  %v5729_v17 = vor.u32 %v4915_v3, %v4504_v0  ;;  %v4480_v21 = vld [vmem:[#allocation6 + $0x2d0] sm:$0xf]  ;;  %v4908_v27 = vld [vmem:[#allocation6 + $0x2d4] sm:$0xf]  ;;  %v5732_v33 = vor.u32 %v4913_v5, %v4506_v9 }
  0x6c   :  { %921 = vmatpush.bf16.msra.mxu2 %v5629_v47  ;;  %7601 = vst [vmem:[#allocation35_spill] sm:$0xff] %v5727_v14  ;;  %v4910_v26 = vld [vmem:[#allocation6 + $0x2ec] sm:$0xf0]  ;;  %v4482_v38 = vld [vmem:[#allocation6 + $0x2f0] sm:$0xf0] }
  0x6d   :  { %934 = vmatpush.bf16.msra.mxu3 %v5632_v51  ;;  %7602 = vst [vmem:[#allocation36_spill] sm:$0xff] %v5729_v17  ;;  %v4488_v39 = vld [vmem:[#allocation6 + $0x2d8] sm:$0xf]  ;;  %v4909_v42 = vld [vmem:[#allocation6 + $0x2dc] sm:$0xf]  ;;  %v5735_v50 = vor.u32 %v4910_v26, %v4480_v21  ;;  %v5739_v54 = vor.u32 %v4908_v27, %v4482_v38 }
  0x6e   :  { %7603 = vst [vmem:[#allocation37_spill] sm:$0xff] %v5732_v33  ;;  %v4911_v41 = vld [vmem:[#allocation6 + $0x2f4] sm:$0xf0]  ;;  %v4490_v49 = vld [vmem:[#allocation6 + $0x2f8] sm:$0xf0] }
  0x6f   :  { %896 = vmatpush.bf16.msra.mxu0 %v5635_v57  ;;  %909 = vmatpush.bf16.msra.mxu1 %v5639_v60  ;;  %7604 = vst [vmem:[#allocation38_spill] sm:$0xff] %v5735_v50  ;;  %v5741_v63 = vor.u32 %v4911_v41, %v4488_v39  ;;  %v4464_v0 = vld [vmem:[#allocation6 + $0x290] sm:$0xf]  ;;  %v4904_v5 = vld [vmem:[#allocation6 + $0x294] sm:$0xf]  ;;  %v5744_v9 = vor.u32 %v4909_v42, %v4490_v49 }
  0x70   :  { %922 = vmatpush.bf16.msra.mxu2 %v5641_v61  ;;  %7605 = vst [vmem:[#allocation39_spill] sm:$0xff] %v5739_v54  ;;  %v4906_v3 = vld [vmem:[#allocation6 + $0x2ac] sm:$0xf0]  ;;  %v4905_v21 = vld [vmem:[#allocation6 + $0x29c] sm:$0xf] }
  0x71   :  { %935 = vmatpush.bf16.msra.mxu3 %v5644_v2  ;;  %7606 = vst [vmem:[#allocation40_spill] sm:$0xff] %v5741_v63  ;;  %v4474_v26 = vld [vmem:[#allocation6 + $0x2b8] sm:$0xf0]  ;;  %v4448_v39 = vld [vmem:[#allocation6 + $0x250] sm:$0xf] }
  0x72   :  { %7607 = vst [vmem:[#allocation41_spill] sm:$0xff] %v5744_v9  ;;  %v4902_v41 = vld [vmem:[#allocation6 + $0x26c] sm:$0xf0]  ;;  %v4900_v42 = vld [vmem:[#allocation6 + $0x254] sm:$0xf]  ;;  %v5756_v49 = vor.u32 %v4905_v21, %v4474_v26 }
  0x73   :  { %897 = vmatpush.bf16.msra.mxu0 %v5647_v6  ;;  %910 = vmatpush.bf16.msra.mxu1 %v5651_v7  ;;  %v4896_v21 = vld [vmem:[#allocation6 + $0x214] sm:$0xf] }
  0x74   :  { %923 = vmatpush.bf16.msra.mxu2 %v5653_v8  ;;  %7611 = vst [vmem:[#allocation45_spill] sm:$0xff] %v5756_v49 }
  0x75   :  { %936 = vmatpush.bf16.msra.mxu3 %v5656_v15 }
  0x77   :  { %898 = vmatpush.bf16.msra.mxu0 %v5659_v25  ;;  %911 = vmatpush.bf16.msra.mxu1 %v5663_v29 }
  0x78   :  { %924 = vmatpush.bf16.msra.mxu2 %v5665_v30 }
  0x79   :  { %937 = vmatpush.bf16.msra.mxu3 %v5668_v37 }
  0x7b   :  { %899 = vmatpush.bf16.msra.mxu0 %v5671_v1  ;;  %912 = vmatpush.bf16.msra.mxu1 %v5675_v52 }
  0x7c   :  { %925 = vmatpush.bf16.msra.mxu2 %v5677_v53 }
  0x7d   :  { %938 = vmatpush.bf16.msra.mxu3 %v5680_v56 }
  0x7e   :  { %900 = vmatmul.bf16.vlgmr.msra.gmra.mxu0 %v7508_v31  ;;  %913 = vmatmul.bf16.vlgmr.msra.gmra.mxu1 %v7508_v31 }
  0x7f   :  { %1104 = vmatpush.bf16.msrb.mxu0 %v5682_v58  ;;  %1117 = vmatpush.bf16.msrb.mxu1 %v5684_v59 }
  0x80   :  { %1130 = vmatpush.bf16.msrb.mxu2 %v5686_v62  ;;  %939 = vmatmul.bf16.vlgmr.msra.gmra.mxu3 %v7508_v31 }
  0x81   :  { %1143 = vmatpush.bf16.msrb.mxu3 %v5689_v4  ;;  %926 = vmatmul.bf16.vlgmr.msra.gmra.mxu2 %v7508_v31  ;;  %v4466_v31 = vld [vmem:[#allocation6 + $0x2b0] sm:$0xf0] }
  0x82   :  { %v5751_v27 = vor.u32 %v4904_v5, %v4466_v31  ;;  %v4898_v5 = vld [vmem:[#allocation6 + $0x22c] sm:$0xf0] }
  0x83   :  { %1105 = vmatpush.bf16.msrb.mxu0 %v5695_v18  ;;  %1118 = vmatpush.bf16.msrb.mxu1 %v5699_v19 }
  0x84   :  { %1131 = vmatpush.bf16.msrb.mxu2 %v5701_v20  ;;  %7609 = vst [vmem:[#allocation43_spill] sm:$0xff] %v5751_v27 }
  0x85   :  { %1144 = vmatpush.bf16.msrb.mxu3 %v5705_v32 }
  0x87   :  { %1106 = vmatpush.bf16.msrb.mxu0 %v5711_v43  ;;  %1119 = vmatpush.bf16.msrb.mxu1 %v5715_v44 }
  0x88   :  { %1132 = vmatpush.bf16.msrb.mxu2 %v5717_v48 }
  0x89   :  { %1145 = vmatpush.bf16.msrb.mxu3 %v5720_v55  ;;  %v4472_v55 = vld [vmem:[#allocation6 + $0x298] sm:$0xf] }
  0x8b   :  { %1107 = vmatpush.bf16.msrb.mxu0 %v5723_v13  ;;  %1120 = vmatpush.bf16.msrb.mxu1 %v5727_v14  ;;  %v4907_v13 = vld [vmem:[#allocation6 + $0x2b4] sm:$0xf0]  ;;  %v5747_v14 = vor.u32 %v4906_v3, %v4464_v0  ;;  %v4901_v0 = vld [vmem:[#allocation6 + $0x25c] sm:$0xf] }
  0x8c   :  { %1133 = vmatpush.bf16.msrb.mxu2 %v5729_v17  ;;  %v5753_v38 = vor.u32 %v4907_v13, %v4472_v55  ;;  %v4456_v17 = vld [vmem:[#allocation6 + $0x258] sm:$0xf]  ;;  %v4458_v3 = vld [vmem:[#allocation6 + $0x278] sm:$0xf0]  ;;  %v4432_v13 = vld [vmem:[#allocation6 + $0x210] sm:$0xf] }
  0x8d   :  { %1146 = vmatpush.bf16.msrb.mxu3 %v5732_v33  ;;  %7608 = vst [vmem:[#allocation42_spill] sm:$0xff] %v5747_v14  ;;  %v4450_v33 = vld [vmem:[#allocation6 + $0x270] sm:$0xf0]  ;;  %v5768_v26 = vor.u32 %v4901_v0, %v4458_v3  ;;  %v7621_v0 = vld [vmem:[#allocation33_spill] sm:$0xff]  ;;  %v7622_v3 = vld [vmem:[#allocation34_spill] sm:$0xff] }
  0x8e   :  { %7610 = vst [vmem:[#allocation44_spill] sm:$0xff] %v5753_v38  ;;  %v5763_v31 = vor.u32 %v4900_v42, %v4450_v33  ;;  %v7620_v42 = vmov 0  }
  0x8f   :  { %1108 = vmatpush.bf16.msrb.mxu0 %v5735_v50  ;;  %1121 = vmatpush.bf16.msrb.mxu1 %v5739_v54  ;;  %v4903_v50 = vld [vmem:[#allocation6 + $0x274] sm:$0xf0]  ;;  %v5759_v54 = vor.u32 %v4902_v41, %v4448_v39  ;;  %7615 = vst [vmem:[#allocation49_spill] sm:$0xff] %v5768_v26  ;;  %v4897_v39 = vld [vmem:[#allocation6 + $0x21c] sm:$0xf] }
  0x90   :  { %1134 = vmatpush.bf16.msrb.mxu2 %v5741_v63  ;;  %7613 = vst [vmem:[#allocation47_spill] sm:$0xff] %v5763_v31  ;;  %v5765_v55 = vor.u32 %v4903_v50, %v4456_v17  ;;  %v4440_v63 = vld [vmem:[#allocation6 + $0x218] sm:$0xf]  ;;  %v4442_v41 = vld [vmem:[#allocation6 + $0x238] sm:$0xf0] }
  0x91   :  { %1147 = vmatpush.bf16.msrb.mxu3 %v5744_v9  ;;  %7612 = vst [vmem:[#allocation46_spill] sm:$0xff] %v5759_v54  ;;  %v4434_v9 = vld [vmem:[#allocation6 + $0x230] sm:$0xf0]  ;;  %v5780_v50 = vor.u32 %v4897_v39, %v4442_v41 }
  0x92   :  { %7614 = vst [vmem:[#allocation48_spill] sm:$0xff] %v5765_v55  ;;  %v5775_v17 = vor.u32 %v4896_v21, %v4434_v9  ;;  %v7623_v21 = vld [vmem:[#allocation35_spill] sm:$0xff] }
  0x93   :  { %1109 = vmatpush.bf16.msrb.mxu0 %v5747_v14  ;;  %1122 = vmatpush.bf16.msrb.mxu1 %v5751_v27  ;;  %v4899_v14 = vld [vmem:[#allocation6 + $0x234] sm:$0xf0]  ;;  %v5771_v27 = vor.u32 %v4898_v5, %v4432_v13  ;;  %7619 = vst [vmem:[#allocation53_spill] sm:$0xff] %v5780_v50 }
  0x94   :  { %1135 = vmatpush.bf16.msrb.mxu2 %v5753_v38  ;;  %7617 = vst [vmem:[#allocation51_spill] sm:$0xff] %v5775_v17  ;;  %v5777_v33 = vor.u32 %v4899_v14, %v4440_v63  ;;  %v195_v14 = vld [vmem:[%s7494_s2] sm:$0xff] }
  0x95   :  { %1148 = vmatpush.bf16.msrb.mxu3 %v5756_v49  ;;  %7616 = vst [vmem:[#allocation50_spill] sm:$0xff] %v5771_v27  ;;  %v197_v63 = vperm.slane %v195_v14, 0  ;;  %v198_v9 = vperm.slane %v195_v14, 1 }
  0x96   :  { %7618 = vst [vmem:[#allocation52_spill] sm:$0xff] %v5777_v33 }
  0x97   :  { %1110 = vmatpush.bf16.msrb.mxu0 %v5759_v54  ;;  %1123 = vmatpush.bf16.msrb.mxu1 %v5763_v31 }
  0x98   :  { %1136 = vmatpush.bf16.msrb.mxu2 %v5765_v55 }
  0x99   :  { %1149 = vmatpush.bf16.msrb.mxu3 %v5768_v26 }
  0x9b   :  { %1111 = vmatpush.bf16.msrb.mxu0 %v5771_v27  ;;  %1124 = vmatpush.bf16.msrb.mxu1 %v5775_v17 }
  0x9c   :  { %1137 = vmatpush.bf16.msrb.mxu2 %v5777_v33 }
  0x9d   :  { %1150 = vmatpush.bf16.msrb.mxu3 %v5780_v50 }
  0x9e   :  { %1112 = vmatmul.bf16.vlgmr.msrb.gmra.mxu0 %v7620_v42  ;;  %1125 = vmatmul.bf16.vlgmr.msrb.gmra.mxu1 %v7620_v42 }
  0x9f   :  { %1363 = vmatpush.bf16.msra.mxu0 %v5586_v10  ;;  %1376 = vmatpush.bf16.msra.mxu1 %v5588_v11 }
  0xa0   :  { %1138 = vmatmul.bf16.vlgmr.msrb.gmra.mxu2 %v7620_v42  ;;  %1151 = vmatmul.bf16.vlgmr.msrb.gmra.mxu3 %v7620_v42  ;;  %v199_v42 = vperm.slane %v195_v14, 2 }
  0xa1   :  { %1389 = vmatpush.bf16.msra.mxu2 %v5590_v12  ;;  %1402 = vmatpush.bf16.msra.mxu3 %v5592_v16 }
  0xa3   :  { %1364 = vmatpush.bf16.msra.mxu0 %v5595_v22  ;;  %1377 = vmatpush.bf16.msra.mxu1 %v5599_v23 }
  0xa5   :  { %1390 = vmatpush.bf16.msra.mxu2 %v5601_v24  ;;  %1403 = vmatpush.bf16.msra.mxu3 %v5604_v28 }
  0xa7   :  { %1365 = vmatpush.bf16.msra.mxu0 %v5610_v34  ;;  %1378 = vmatpush.bf16.msra.mxu1 %v5615_v35 }
  0xa9   :  { %1391 = vmatpush.bf16.msra.mxu2 %v5617_v36  ;;  %1404 = vmatpush.bf16.msra.mxu3 %v5620_v40 }
  0xab   :  { %1366 = vmatpush.bf16.msra.mxu0 %v5623_v45  ;;  %1379 = vmatpush.bf16.msra.mxu1 %v5627_v46 }
  0xad   :  { %1392 = vmatpush.bf16.msra.mxu2 %v5629_v47  ;;  %1405 = vmatpush.bf16.msra.mxu3 %v5632_v51 }
  0xaf   :  { %1367 = vmatpush.bf16.msra.mxu0 %v5635_v57  ;;  %1380 = vmatpush.bf16.msra.mxu1 %v5639_v60 }
  0xb1   :  { %1393 = vmatpush.bf16.msra.mxu2 %v5641_v61  ;;  %1406 = vmatpush.bf16.msra.mxu3 %v5644_v2 }
  0xb3   :  { %1368 = vmatpush.bf16.msra.mxu0 %v5647_v6  ;;  %1381 = vmatpush.bf16.msra.mxu1 %v5651_v7 }
  0xb5   :  { %1394 = vmatpush.bf16.msra.mxu2 %v5653_v8  ;;  %1407 = vmatpush.bf16.msra.mxu3 %v5656_v15 }
  0xb7   :  { %1369 = vmatpush.bf16.msra.mxu0 %v5659_v25  ;;  %1382 = vmatpush.bf16.msra.mxu1 %v5663_v29 }
  0xb9   :  { %1395 = vmatpush.bf16.msra.mxu2 %v5665_v30  ;;  %1408 = vmatpush.bf16.msra.mxu3 %v5668_v37 }
  0xbb   :  { %1370 = vmatpush.bf16.msra.mxu0 %v5671_v1  ;;  %1383 = vmatpush.bf16.msra.mxu1 %v5675_v52  ;;  %v542_v13 = vpop.f32.mrf.mxu0  ;;  %v555_v5 = vpop.f32.mrf.mxu1 }
  0xbc   :  { %v543_v39 = vadd.f32 %v542_v13, %v197_v63  ;;  %v556_v41 = vadd.f32 %v555_v5, %v198_v9  ;;  %v7630_v63 = vld [vmem:[#allocation42_spill] sm:$0xff] }
  0xbd   :  { %1396 = vmatpush.bf16.msra.mxu2 %v5677_v53  ;;  %1409 = vmatpush.bf16.msra.mxu3 %v5680_v56 }
  0xbe   :  { %637 = vst [vmem:[#allocation2] sm:$0xff] %v543_v39  ;;  %v7631_v39 = vld [vmem:[#allocation43_spill] sm:$0xff] }
  0xbf   :  { %1419 = vmatpush.bf16.msrb.mxu0 %v5682_v58  ;;  %1432 = vmatpush.bf16.msrb.mxu1 %v5684_v59  ;;  %638 = vst [vmem:[#allocation2 + $0x8] sm:$0xff] %v556_v41 }
  0xc1   :  { %1445 = vmatpush.bf16.msrb.mxu2 %v5686_v62  ;;  %1458 = vmatpush.bf16.msrb.mxu3 %v5689_v4 }
  0xc3   :  { %1420 = vmatpush.bf16.msrb.mxu0 %v5695_v18  ;;  %1433 = vmatpush.bf16.msrb.mxu1 %v5699_v19  ;;  %v7628_v19 = vld [vmem:[#allocation40_spill] sm:$0xff]  ;;  %v581_v18 = vpop.f32.mrf.mxu3  ;;  %v544_v13 = vpop.f32.mrf.mxu0 }
  0xc4   :  { %v557_v5 = vpop.f32.mrf.mxu1 }
  0xc5   :  { %1446 = vmatpush.bf16.msrb.mxu2 %v5701_v20  ;;  %1459 = vmatpush.bf16.msrb.mxu3 %v5705_v32  ;;  %v7624_v32 = vld [vmem:[#allocation36_spill] sm:$0xff]  ;;  %v7627_v20 = vld [vmem:[#allocation39_spill] sm:$0xff]  ;;  %v203_v5 = vperm.slane %v195_v14, 6 }
  0xc7   :  { %1421 = vmatpush.bf16.msrb.mxu0 %v5711_v43  ;;  %1434 = vmatpush.bf16.msrb.mxu1 %v5715_v44  ;;  %v7625_v43 = vld [vmem:[#allocation37_spill] sm:$0xff]  ;;  %v7626_v44 = vld [vmem:[#allocation38_spill] sm:$0xff] }
  0xc9   :  { %1447 = vmatpush.bf16.msrb.mxu2 %v5717_v48  ;;  %1460 = vmatpush.bf16.msrb.mxu3 %v7621_v0  ;;  %v200_v48 = vperm.slane %v195_v14, 3  ;;  %v568_v0 = vpop.f32.mrf.mxu2 }
  0xcb   :  { %1422 = vmatpush.bf16.msrb.mxu0 %v7622_v3  ;;  %1435 = vmatpush.bf16.msrb.mxu1 %v7623_v21  ;;  %v569_v3 = vadd.f32 %v568_v0, %v199_v42  ;;  %v7629_v21 = vld [vmem:[#allocation41_spill] sm:$0xff]  ;;  %v582_v9 = vadd.f32 %v581_v18, %v200_v48  ;;  %v583_v41 = vpop.f32.mrf.mxu3  ;;  %v201_v18 = vperm.slane %v195_v14, 4  ;;  %v202_v48 = vperm.slane %v195_v14, 5 }
  0xcd   :  { %1448 = vmatpush.bf16.msrb.mxu2 %v7624_v32  ;;  %1461 = vmatpush.bf16.msrb.mxu3 %v7625_v43  ;;  %639 = vst [vmem:[#allocation2 + $0x10] sm:$0xff] %v569_v3 }
  0xce   :  { %640 = vst [vmem:[#allocation2 + $0x18] sm:$0xff] %v582_v9 }
  0xcf   :  { %1423 = vmatpush.bf16.msrb.mxu0 %v7626_v44  ;;  %1436 = vmatpush.bf16.msrb.mxu1 %v7627_v20 }
  0xd1   :  { %1449 = vmatpush.bf16.msrb.mxu2 %v7628_v19  ;;  %1462 = vmatpush.bf16.msrb.mxu3 %v7629_v21  ;;  %v570_v0 = vpop.f32.mrf.mxu2 }
  0xd2   :  { %v204_v0 = vperm.slane %v195_v14, 7 }
  0xd3   :  { %1424 = vmatpush.bf16.msrb.mxu0 %v7630_v63  ;;  %1437 = vmatpush.bf16.msrb.mxu1 %v7631_v39 }
  0xd5   :  { %1450 = vmatpush.bf16.msrb.mxu2 %v5753_v38  ;;  %1463 = vmatpush.bf16.msrb.mxu3 %v5756_v49  ;;  %v711_v38 = vld [vmem:[#allocation2] ss:$8 sm:$0xf] }
  0xd6   :  { %v716_v14 = vperm.slane %v711_v38, 1  ;;  %v718_v63 = vperm.slane %v711_v38, 3 }
  0xd7   :  { %1425 = vmatpush.bf16.msrb.mxu0 %v5759_v54  ;;  %1438 = vmatpush.bf16.msrb.mxu1 %v5763_v31 }
  0xd9   :  { %1451 = vmatpush.bf16.msrb.mxu2 %v5765_v55  ;;  %1464 = vmatpush.bf16.msrb.mxu3 %v5768_v26 }
  0xdb   :  { %1426 = vmatpush.bf16.msrb.mxu0 %v5771_v27  ;;  %1439 = vmatpush.bf16.msrb.mxu1 %v5775_v17  ;;  %v594_v3 = vpop.f32.mrf.mxu0  ;;  %v607_v9 = vpop.f32.mrf.mxu1 }
  0xdc   :  { %v595_v42 = vadd.f32 %v594_v3, %v201_v18  ;;  %v608_v13 = vadd.f32 %v607_v9, %v202_v48  ;;  %v717_v18 = vperm.slane %v711_v38, 2  ;;  %v715_v48 = vperm.slane %v711_v38, 0 }
  0xdd   :  { %1452 = vmatpush.bf16.msrb.mxu2 %v5777_v33  ;;  %1465 = vmatpush.bf16.msrb.mxu3 %v5780_v50 }
  0xde   :  { %641 = vst [vmem:[#allocation2 + $0x20] sm:$0xff] %v595_v42 }
  0xdf   :  { %642 = vst [vmem:[#allocation2 + $0x28] sm:$0xff] %v608_v13 }
  0xe3   :  { %v633_v55 = vpop.f32.mrf.mxu3  ;;  %v596_v27 = vpop.f32.mrf.mxu0 }
  0xe4   :  { %v620_v41 = vpop.f32.mrf.mxu2  ;;  %v634_v31 = vadd.f32 %v633_v55, %v204_v0  ;;  %v609_v17 = vpop.f32.mrf.mxu1 }
  0xe5   :  { %v621_v26 = vadd.f32 %v620_v41, %v203_v5 }
  0xe6   :  { %644 = vst [vmem:[#allocation2 + $0x38] sm:$0xff] %v634_v31 }
  0xe7   :  { %643 = vst [vmem:[#allocation2 + $0x30] sm:$0xff] %v621_v26 }
  0xeb   :  { %v635_v50 = vpop.f32.mrf.mxu3 }
  0xec   :  { %v622_v33 = vpop.f32.mrf.mxu2 }
  0xfb   :  { %v901_v54 = vpop.f32.mrf.mxu0  ;;  %v914_v49 = vpop.f32.mrf.mxu1 }
  0xfc   :  { %v1156_v5 = vadd.f32 %v901_v54, %v715_v48  ;;  %v1157_v27 = vadd.f32 %v914_v49, %v716_v14 }
  0xfe   :  { %v4558_v55 = vmul.f32 -1.442695, %v1156_v5  ;;  %v4559_v26 = vmul.f32 -1.442695, %v1157_v27 }
 0x103   :  { %v940_v9 = vpop.f32.mrf.mxu3  ;;  %v903_v13 = vpop.f32.mrf.mxu0 }
 0x104   :  { %v927_v3 = vpop.f32.mrf.mxu2  ;;  %v916_v39 = vpop.f32.mrf.mxu1 }
 0x105   :  { %v1158_v42 = vadd.f32 %v927_v3, %v717_v18  ;;  %v1159_v3 = vadd.f32 %v940_v9, %v718_v63  ;;  %v713_v39 = vld [vmem:[#allocation2 + $0x27] ss:$8 sm:$0xf] }
 0x106   :  { %v724_v48 = vperm.slane %v713_v39, 0  ;;  %v725_v13 = vperm.slane %v713_v39, 1 }
 0x107   :  { %v4560_v41 = vmul.f32 -1.442695, %v1158_v42  ;;  %v4561_v14 = vmul.f32 -1.442695, %v1159_v3 }
 0x109   :  { %4987 = vpow2.f32 %v4560_v41 }
 0x10a   :  { %4989 = vpow2.f32 %v4558_v55 }
 0x10b   :  { %v942_v17 = vpop.f32.mrf.mxu3  ;;  %4991 = vpow2.f32 %v4559_v26  ;;  %v726_v26 = vperm.slane %v713_v39, 2 }
 0x10c   :  { %v929_v31 = vpop.f32.mrf.mxu2  ;;  %v727_v17 = vperm.slane %v713_v39, 3 }
 0x10f   :  { %v4988_v33 = vpop.eup %4987 }
 0x110   :  { %v5857_v50 = vadd.f32 1.0, %v4988_v33  ;;  %v4990_v0 = vpop.eup %4989 }
 0x111   :  { %v4992_v18 = vpop.eup %4991  ;;  %v5860_v54 = vadd.f32 1.0, %v4990_v0 }
 0x112   :  { %4993 = vrcp.f32 %v5857_v50  ;;  %v5862_v49 = vadd.f32 1.0, %v4992_v18  ;;  %vm1231_vm1 = vweird.f32 %v5857_v50 }
 0x113   :  { %4995 = vrcp.f32 %v5860_v54  ;;  %vm1201_vm3 = vweird.f32 %v5860_v54 }
 0x114   :  { %4997 = vrcp.f32 %v5862_v49  ;;  %v1220_v19 = vand.u32 2147483647, %v5862_v49  ;;  %v1222_v20 = vand.u32 2147483648, %v5862_v49  ;;  %vm1216_vm8 = vweird.f32 %v5862_v49 }
 0x115   :  { %4999 = vpow2.f32 %v4561_v14 }
 0x116   :  { %vm1221_vm11 = vcmp.eq.f32.partialorder %v1220_v19, 8.507059e+37  ;;  %v1223_v62 = vor.u32 1.1754944e-38, %v1222_v20 }
 0x118   :  { %v5864_v41 = vpop.eup %4993 }
 0x119   :  { %v1227_v9 = vmul.f32 %v5864_v41, %v5857_v50  ;;  %v5870_v33 = vpop.eup %4995  ;;  %vm1232_vm0 = vweird.f32 %v5864_v41 }
 0x11a   :  { %v1197_v14 = vmul.f32 %v5870_v33, %v5860_v54  ;;  %vm5896_vm2 = vmor %vm1231_vm1, %vm1232_vm0  ;;  %vm1202_vm4 = vweird.f32 %v5870_v33 }
 0x11b   :  { %v1113_v42 = vpop.f32.mrf.mxu0  ;;  %v1126_v5 = vpop.f32.mrf.mxu1  ;;  %vm5929_vm7 = vmor %vm1201_vm3, %vm1202_vm4 }
 0x11c   :  { %v1160_v27 = vadd.f32 %v1113_v42, %v724_v48  ;;  %v1161_v38 = vadd.f32 %v1126_v5, %v725_v13  ;;  %v5872_v48 = vpop.eup %4997  ;;  %v1228_v42 = vsub.f32 1.0, %v1227_v9 }
 0x11d   :  { %v1212_v39 = vmul.f32 %v5872_v48, %v5862_v49  ;;  %vm1217_vm6 = vweird.f32 %v5872_v48 }
 0x11e   :  { %v4562_v55 = vmul.f32 -1.442695, %v1160_v27  ;;  %v4563_v63 = vmul.f32 -1.442695, %v1161_v38  ;;  %v5000_v38 = vpop.eup %4999  ;;  %vm1218_vm9 = vmor %vm1216_vm8, %vm1217_vm6 }
 0x120   :  { %5001 = vpow2.f32 %v4562_v55 }
 0x121   :  { %5003 = vpow2.f32 %v4563_v63 }
 0x123   :  { %v1139_v31 = vpop.f32.mrf.mxu2  ;;  %v1152_v18 = vpop.f32.mrf.mxu3 }
 0x124   :  { %v1162_v0 = vadd.f32 %v1139_v31, %v726_v26  ;;  %v1115_v3 = vpop.f32.mrf.mxu0  ;;  %v1163_v13 = vadd.f32 %v1152_v18, %v727_v17  ;;  %v1128_v5 = vpop.f32.mrf.mxu1  ;;  %v1229_v26 = vmul.f32 %v5864_v41, %v1228_v42  ;;  %v1198_v17 = vsub.f32 1.0, %v1197_v14 }
 0x125   :  { %v1213_v18 = vsub.f32 1.0, %v1212_v39  ;;  %v5884_v3 = vadd.f32 1.0, %v5000_v38  ;;  %v1235_v14 = vand.u32 2147483647, %v5857_v50 }
 0x126   :  { %v4564_v27 = vmul.f32 -1.442695, %v1162_v0  ;;  %v4565_v55 = vmul.f32 -1.442695, %v1163_v13  ;;  %v5002_v21 = vpop.eup %5001  ;;  %v1230_v5 = vadd.f32 %v5864_v41, %v1229_v26 }
 0x127   :  { %v5004_v63 = vpop.eup %5003  ;;  %v5879_v31 = vadd.f32 1.0, %v5002_v21  ;;  %v1237_v21 = vand.u32 2147483648, %v5857_v50  ;;  %v1214_v38 = vmul.f32 %v5872_v48, %v1213_v18  ;;  %v1207_v18 = vand.u32 2147483648, %v5860_v54 }
 0x128   :  { %5005 = vpow2.f32 %v4564_v27  ;;  %v5881_v9 = vadd.f32 1.0, %v5004_v63  ;;  %vm1236_vm5 = vcmp.eq.f32.partialorder %v1235_v14, 8.507059e+37 }
 0x129   :  { %5007 = vpow2.f32 %v4565_v55  ;;  %v1199_v55 = vmul.f32 %v5870_v33, %v1198_v17  ;;  %v1234_v17 = vsel %vm5896_vm2, %v5864_v41, %v1230_v5  ;;  %v1215_v5 = vadd.f32 %v5872_v48, %v1214_v38 }
 0x12a   :  { %5009 = vrcp.f32 %v5879_v31  ;;  %v1208_v32 = vor.u32 1.1754944e-38, %v1207_v18  ;;  %vm1276_vm14 = vweird.f32 %v5881_v9  ;;  %v1280_v20 = vand.u32 2147483647, %v5881_v9 }
 0x12b   :  { %v1141_v0 = vpop.f32.mrf.mxu2  ;;  %5011 = vrcp.f32 %v5881_v9  ;;  %v1154_v13 = vpop.f32.mrf.mxu3  ;;  %vm1261_vm2 = vweird.f32 %v5879_v31 }
 0x12c   :  { %5013 = vrcp.f32 %v5884_v3  ;;  %v1238_v13 = vor.u32 1.1754944e-38, %v1237_v21  ;;  %v1205_v21 = vand.u32 2147483647, %v5860_v54  ;;  %vm1281_vm6 = vcmp.eq.f32.partialorder %v1280_v20, 8.507059e+37 }
 0x12e   :  { %v5006_v42 = vpop.eup %5005  ;;  %v1239_v63 = vsel %vm1236_vm5, %v1238_v13, %v1234_v17  ;;  %vm1206_vm10 = vcmp.eq.f32.partialorder %v1205_v21, 8.507059e+37 }
 0x12f   :  { %v5008_v27 = vpop.eup %5007  ;;  %v5893_v39 = vadd.f32 1.0, %v5006_v42  ;;  %v1316_v43 = vmul.f32 2.0, %v1239_v63 }
 0x130   :  { %v5901_v26 = vadd.f32 1.0, %v5008_v27  ;;  %v5903_v0 = vpop.eup %5009  ;;  %v1200_v27 = vadd.f32 %v5870_v33, %v1199_v55 }
 0x131   :  { %5015 = vrcp.f32 %v5893_v39  ;;  %v5909_v50 = vpop.eup %5011  ;;  %v1257_v42 = vmul.f32 %v5903_v0, %v5879_v31  ;;  %v4566_v18 = vadd.f32 -1.0, %v1316_v43  ;;  %v1295_v19 = vand.u32 2147483647, %v5893_v39 }
 0x132   :  { %v1272_v41 = vmul.f32 %v5909_v50, %v5881_v9  ;;  %5017 = vrcp.f32 %v5901_v26  ;;  %v5925_v44 = vpop.eup %5013  ;;  %v1204_v13 = vsel %vm5929_vm7, %v5870_v33, %v1200_v27  ;;  %vm1277_vm12 = vweird.f32 %v5909_v50 }
 0x133   :  { %v1258_v38 = vsub.f32 1.0, %v1257_v42  ;;  %v1209_v49 = vsel %vm1206_vm10, %v1208_v32, %v1204_v13  ;;  %v1242_v42 = vmul.f32 %v5925_v44, %v5884_v3  ;;  %v1282_v32 = vand.u32 2147483648, %v5881_v9  ;;  %vm5956_vm0 = vmor %vm1276_vm14, %vm1277_vm12 }
 0x134   :  { %v1273_v55 = vsub.f32 1.0, %v1272_v41  ;;  %v1219_v41 = vsel %vm1218_vm9, %v5872_v48, %v1215_v5  ;;  %v1297_v48 = vand.u32 2147483648, %v5893_v39  ;;  %vm1262_vm15 = vweird.f32 %v5903_v0 }
 0x135   :  { %v1259_v33 = vmul.f32 %v5903_v0, %v1258_v38  ;;  %v1224_v63 = vsel %vm1221_vm11, %v1223_v62, %v1219_v41  ;;  %vm1291_vm1 = vweird.f32 %v5893_v39  ;;  %v1322_v14 = vmul.f32 %v4566_v18, %v1209_v49  ;;  %vm1263_vm5 = vmor %vm1261_vm2, %vm1262_vm15 }
 0x136   :  { %v1274_v4 = vmul.f32 %v5909_v50, %v1273_v55  ;;  %v1267_v38 = vand.u32 2147483648, %v5879_v31  ;;  %v1298_v9 = vor.u32 1.1754944e-38, %v1297_v48  ;;  %v1265_v13 = vand.u32 2147483647, %v5879_v31 }
 0x137   :  { %v5016_v17 = vpop.eup %5015  ;;  %v1260_v43 = vadd.f32 %v5903_v0, %v1259_v33  ;;  %vm1296_vm4 = vcmp.eq.f32.partialorder %v1295_v19, 8.507059e+37  ;;  %v1243_v33 = vsub.f32 1.0, %v1242_v42  ;;  %v1320_v49 = vmul.f32 0.0, %v1224_v63 }
 0x138   :  { %v1287_v54 = vmul.f32 %v5016_v17, %v5893_v39  ;;  %v5940_v59 = vpop.eup %5017  ;;  %v1275_v5 = vadd.f32 %v5909_v50, %v1274_v4  ;;  %vm1292_vm13 = vweird.f32 %v5016_v17  ;;  %v1268_v56 = vor.u32 1.1754944e-38, %v1267_v38 }
 0x139   :  { %v1302_v62 = vmul.f32 %v5940_v59, %v5901_v26  ;;  %vm1293_vm3 = vmor %vm1291_vm1, %vm1292_vm13  ;;  %v1264_v18 = vsel %vm1263_vm5, %v5903_v0, %v1260_v43  ;;  %vm1266_vm7 = vcmp.eq.f32.partialorder %v1265_v13, 8.507059e+37  ;;  %v5968_v53 = vadd.f32 %v1322_v14, %v1320_v49  ;;  %v7642_v49 = vld [vmem:[#allocation24_spill] sm:$0xff] }
 0x13a   :  { %v1288_v27 = vsub.f32 1.0, %v1287_v54  ;;  %v1279_v41 = vsel %vm5956_vm0, %v5909_v50, %v1275_v5  ;;  %v1244_v50 = vmul.f32 %v5925_v44, %v1243_v33  ;;  %vm1247_vm8 = vweird.f32 %v5925_v44  ;;  %v7638_v33 = vld [vmem:[#allocation20_spill] sm:$0xff] }
 0x13b   :  { %v1303_v39 = vsub.f32 1.0, %v1302_v62  ;;  %5019 = vtanh.f32 %v5968_v53  ;;  %vm1307_vm9 = vweird.f32 %v5940_v59  ;;  %vm1246_vm10 = vweird.f32 %v5884_v3 }
 0x13c   :  { %v1289_v21 = vmul.f32 %v5016_v17, %v1288_v27  ;;  %v1283_v27 = vor.u32 1.1754944e-38, %v1282_v32  ;;  %v1245_v0 = vadd.f32 %v5925_v44, %v1244_v50  ;;  %vm1248_vm11 = vmor %vm1246_vm10, %vm1247_vm8  ;;  %v1250_v32 = vand.u32 2147483647, %v5884_v3  ;;  %v7646_v50 = vld [vmem:[#allocation28_spill] sm:$0xff] }
 0x13d   :  { %v1304_v42 = vmul.f32 %v5940_v59, %v1303_v39  ;;  %vm1306_vm12 = vweird.f32 %v5901_v26  ;;  %v1310_v62 = vand.u32 2147483647, %v5901_v26  ;;  %v7641_v39 = vld [vmem:[#allocation23_spill] sm:$0xff] }
 0x13e   :  { %v1290_v4 = vadd.f32 %v5016_v17, %v1289_v21  ;;  %v1284_v48 = vsel %vm1281_vm6, %v1283_v27, %v1279_v41  ;;  %vm1308_vm13 = vmor %vm1306_vm12, %vm1307_vm9  ;;  %v1249_v43 = vsel %vm1248_vm11, %v5925_v44, %v1245_v0  ;;  %vm1251_vm14 = vcmp.eq.f32.partialorder %v1250_v32, 8.507059e+37  ;;  %v7639_v27 = vld [vmem:[#allocation21_spill] sm:$0xff] }
 0x13f   :  { %v1321_v5 = vmul.f32 0.0, %v1284_v48  ;;  %v1305_v20 = vadd.f32 %v5940_v59, %v1304_v42  ;;  %vm1311_vm15 = vcmp.eq.f32.partialorder %v1310_v62, 8.507059e+37  ;;  %v7644_v48 = vld [vmem:[#allocation26_spill] sm:$0xff]  ;;  %v7651_v0 = vld [vmem:[#allocation33_spill] sm:$0xff] }
 0x140   :  { %v1294_v54 = vsel %vm1293_vm3, %v5016_v17, %v1290_v4  ;;  %v1269_v17 = vsel %vm1266_vm7, %v1268_v56, %v1264_v18  ;;  %v1252_v56 = vand.u32 2147483648, %v5884_v3  ;;  %v7643_v18 = vld [vmem:[#allocation25_spill] sm:$0xff]  ;;  %v7648_v42 = vld [vmem:[#allocation30_spill] sm:$0xff] }
 0x141   :  { %v1299_v21 = vsel %vm1296_vm4, %v1298_v9, %v1294_v54  ;;  %v1309_v55 = vsel %vm1308_vm13, %v5940_v59, %v1305_v20  ;;  %v5020_v4 = vpop.eup %5019  ;;  %v7652_v20 = vld [vmem:[#allocation34_spill] sm:$0xff]  ;;  %v7655_v32 = vld [vmem:[#allocation37_spill] sm:$0xff] }
 0x142   :  { %v1317_v58 = vmul.f32 2.0, %v1299_v21  ;;  %v1253_v14 = vor.u32 1.1754944e-38, %v1252_v56  ;;  %v7640_v21 = vld [vmem:[#allocation22_spill] sm:$0xff]  ;;  %v7653_v56 = vld [vmem:[#allocation35_spill] sm:$0xff] }
 0x143   :  { %v7656_v62 = vld [vmem:[#allocation38_spill] sm:$0xff] }
 0x144   :  { %v4567_v31 = vadd.f32 -1.0, %v1317_v58  ;;  %v1312_v58 = vand.u32 2147483648, %v5901_v26  ;;  %v1254_v13 = vsel %vm1251_vm14, %v1253_v14, %v1249_v43  ;;  %v7657_v43 = vld [vmem:[#allocation39_spill] sm:$0xff]  ;;  %v7660_v14 = vld [vmem:[#allocation42_spill] sm:$0xff] }
 0x145   :  { %v5988_v54 = vmul.f32 %v5020_v4, %v1254_v13  ;;  %v7659_v4 = vld [vmem:[#allocation41_spill] sm:$0xff] }
 0x146   :  { %v1323_v19 = vmul.f32 %v4567_v31, %v1269_v17  ;;  %v1313_v38 = vor.u32 1.1754944e-38, %v1312_v58  ;;  %v7645_v31 = vld [vmem:[#allocation27_spill] sm:$0xff]  ;;  %v7647_v17 = vld [vmem:[#allocation29_spill] sm:$0xff]  ;;  %v7654_v58 = vld [vmem:[#allocation36_spill] sm:$0xff] }
 0x147   :  { %v7663_v13 = vld [vmem:[#allocation45_spill] sm:$0xff] }
 0x148   :  { %v5973_v63 = vadd.f32 %v1323_v19, %v1321_v5  ;;  %v1314_v41 = vsel %vm1311_vm15, %v1313_v38, %v1309_v55  ;;  %v7649_v5 = vld [vmem:[#allocation31_spill] sm:$0xff]  ;;  %v7650_v19 = vld [vmem:[#allocation32_spill] sm:$0xff] }
 0x149   :  { %v7658_v55 = vld [vmem:[#allocation40_spill] sm:$0xff]  ;;  %v7661_v38 = vld [vmem:[#allocation43_spill] sm:$0xff] }
 0x14a   :  { %5021 = vtanh.f32 %v5973_v63 }
 0x150   :  { %v5022_v9 = vpop.eup %5021 }
 0x151   :  { %v5990_v3 = vmul.f32 %v5022_v9, %v1314_v41  ;;  %v7662_v9 = vld [vmem:[#allocation44_spill] sm:$0xff]  ;;  %v7664_v41 = vld [vmem:[#allocation46_spill] sm:$0xff] }
 0x153   :  { %v1362_v26 = vpack.c.bf16 %v5990_v3, %v5988_v54 }
 0x155   :  { %1371 = vmatmul.bf16.vlgmr.msra.gmra.mxu0 %v1362_v26  ;;  %1384 = vmatmul.bf16.vlgmr.msra.gmra.mxu1 %v1362_v26  ;;  %v1416_v59 = vunpack.c.h.b16 %v1362_v26 }
 0x156   :  { %1397 = vmatmul.bf16.vlgmr.msra.gmra.mxu2 %v1362_v26  ;;  %1410 = vmatmul.bf16.vlgmr.msra.gmra.mxu3 %v1362_v26  ;;  %v7665_v26 = vld [vmem:[#allocation47_spill] sm:$0xff] }
 0x157   :  { %1678 = vmatpush.bf16.msra.mxu0 %v5586_v10  ;;  %1691 = vmatpush.bf16.msra.mxu1 %v5588_v11  ;;  %v1417_v44 = vpack.c.b16 %v1416_v59, %v1416_v59  ;;  %v7666_v59 = vld [vmem:[#allocation48_spill] sm:$0xff] }
 0x158   :  { %1704 = vmatpush.bf16.msra.mxu2 %v5590_v12  ;;  %1717 = vmatpush.bf16.msra.mxu3 %v5592_v16 }
 0x15b   :  { %1679 = vmatpush.bf16.msra.mxu0 %v5595_v22  ;;  %1692 = vmatpush.bf16.msra.mxu1 %v5599_v23 }
 0x15c   :  { %1705 = vmatpush.bf16.msra.mxu2 %v5601_v24  ;;  %1718 = vmatpush.bf16.msra.mxu3 %v5604_v28 }
 0x15f   :  { %1680 = vmatpush.bf16.msra.mxu0 %v5610_v34  ;;  %1693 = vmatpush.bf16.msra.mxu1 %v5615_v35 }
 0x160   :  { %1706 = vmatpush.bf16.msra.mxu2 %v5617_v36  ;;  %1719 = vmatpush.bf16.msra.mxu3 %v5620_v40 }
 0x163   :  { %1681 = vmatpush.bf16.msra.mxu0 %v5623_v45  ;;  %1694 = vmatpush.bf16.msra.mxu1 %v5627_v46 }
 0x164   :  { %1707 = vmatpush.bf16.msra.mxu2 %v5629_v47  ;;  %1720 = vmatpush.bf16.msra.mxu3 %v5632_v51 }
 0x165   :  { %1427 = vmatmul.bf16.vlgmr.msrb.gmra.mxu0 %v1417_v44  ;;  %1440 = vmatmul.bf16.vlgmr.msrb.gmra.mxu1 %v1417_v44 }
 0x166   :  { %1453 = vmatmul.bf16.vlgmr.msrb.gmra.mxu2 %v1417_v44  ;;  %1466 = vmatmul.bf16.vlgmr.msrb.gmra.mxu3 %v1417_v44  ;;  %v7667_v44 = vld [vmem:[#allocation49_spill] sm:$0xff] }
 0x167   :  { %1682 = vmatpush.bf16.msra.mxu0 %v5635_v57  ;;  %1695 = vmatpush.bf16.msra.mxu1 %v5639_v60 }
 0x168   :  { %1708 = vmatpush.bf16.msra.mxu2 %v5641_v61  ;;  %1721 = vmatpush.bf16.msra.mxu3 %v5644_v2 }
 0x16b   :  { %1683 = vmatpush.bf16.msra.mxu0 %v5647_v6  ;;  %1696 = vmatpush.bf16.msra.mxu1 %v5651_v7 }
 0x16c   :  { %1709 = vmatpush.bf16.msra.mxu2 %v5653_v8  ;;  %1722 = vmatpush.bf16.msra.mxu3 %v5656_v15 }
 0x16f   :  { %1684 = vmatpush.bf16.msra.mxu0 %v5659_v25  ;;  %1697 = vmatpush.bf16.msra.mxu1 %v5663_v29 }
 0x170   :  { %1710 = vmatpush.bf16.msra.mxu2 %v5665_v30  ;;  %1723 = vmatpush.bf16.msra.mxu3 %v5668_v37 }
 0x173   :  { %1685 = vmatpush.bf16.msra.mxu0 %v5671_v1  ;;  %1698 = vmatpush.bf16.msra.mxu1 %v5675_v52 }
 0x174   :  { %1711 = vmatpush.bf16.msra.mxu2 %v7638_v33  ;;  %1724 = vmatpush.bf16.msra.mxu3 %v7639_v27 }
 0x177   :  { %1734 = vmatpush.bf16.msrb.mxu0 %v7640_v21  ;;  %1747 = vmatpush.bf16.msrb.mxu1 %v7641_v39 }
 0x178   :  { %1760 = vmatpush.bf16.msrb.mxu2 %v7642_v49  ;;  %1773 = vmatpush.bf16.msrb.mxu3 %v7643_v18 }
 0x17b   :  { %1735 = vmatpush.bf16.msrb.mxu0 %v7644_v48  ;;  %1748 = vmatpush.bf16.msrb.mxu1 %v7645_v31 }
 0x17c   :  { %1761 = vmatpush.bf16.msrb.mxu2 %v7646_v50  ;;  %1774 = vmatpush.bf16.msrb.mxu3 %v7647_v17 }
 0x17f   :  { %1736 = vmatpush.bf16.msrb.mxu0 %v7648_v42  ;;  %1749 = vmatpush.bf16.msrb.mxu1 %v7649_v5 }
 0x180   :  { %1762 = vmatpush.bf16.msrb.mxu2 %v7650_v19  ;;  %1775 = vmatpush.bf16.msrb.mxu3 %v7651_v0 }
 0x183   :  { %1737 = vmatpush.bf16.msrb.mxu0 %v7652_v20  ;;  %1750 = vmatpush.bf16.msrb.mxu1 %v7653_v56 }
 0x184   :  { %1763 = vmatpush.bf16.msrb.mxu2 %v7654_v58  ;;  %1776 = vmatpush.bf16.msrb.mxu3 %v7655_v32 }
 0x187   :  { %1738 = vmatpush.bf16.msrb.mxu0 %v7656_v62  ;;  %1751 = vmatpush.bf16.msrb.mxu1 %v7657_v43  ;;  %v7668_v43 = vld [vmem:[#allocation50_spill] sm:$0xff] }
 0x188   :  { %1764 = vmatpush.bf16.msrb.mxu2 %v7658_v55  ;;  %1777 = vmatpush.bf16.msrb.mxu3 %v7659_v4  ;;  %v7669_v55 = vld [vmem:[#allocation51_spill] sm:$0xff]  ;;  %v7670_v4 = vld [vmem:[#allocation52_spill] sm:$0xff] }
 0x18b   :  { %1739 = vmatpush.bf16.msrb.mxu0 %v7660_v14  ;;  %1752 = vmatpush.bf16.msrb.mxu1 %v7661_v38  ;;  %v7671_v14 = vld [vmem:[#allocation53_spill] sm:$0xff] }
 0x18c   :  { %1765 = vmatpush.bf16.msrb.mxu2 %v7662_v9  ;;  %1778 = vmatpush.bf16.msrb.mxu3 %v7663_v13  ;;  %v1341_v38 = vld [vmem:[#allocation2 + $0x1] ss:$8 sm:$0xf] }
 0x18d   :  { %v1345_v9 = vperm.slane %v1341_v38, 0  ;;  %v1346_v62 = vperm.slane %v1341_v38, 1 }
 0x18f   :  { %1740 = vmatpush.bf16.msrb.mxu0 %v7664_v41  ;;  %1753 = vmatpush.bf16.msrb.mxu1 %v7665_v26 }
 0x190   :  { %1766 = vmatpush.bf16.msrb.mxu2 %v7666_v59  ;;  %1779 = vmatpush.bf16.msrb.mxu3 %v7667_v44  ;;  %v1347_v44 = vperm.slane %v1341_v38, 2  ;;  %v1348_v59 = vperm.slane %v1341_v38, 3 }
 0x193   :  { %1741 = vmatpush.bf16.msrb.mxu0 %v7668_v43  ;;  %1754 = vmatpush.bf16.msrb.mxu1 %v7669_v55 }
 0x194   :  { %1767 = vmatpush.bf16.msrb.mxu2 %v7670_v4  ;;  %1780 = vmatpush.bf16.msrb.mxu3 %v7671_v14 }
 0x1d2   :  { %v1372_v13 = vpop.f32.mrf.mxu0  ;;  %v1385_v32 = vpop.f32.mrf.mxu1 }
 0x1d3   :  { %v1471_v41 = vadd.f32 %v1372_v13, %v1345_v9  ;;  %v1472_v58 = vadd.f32 %v1385_v32, %v1346_v62  ;;  %v1343_v32 = vld [vmem:[#allocation2 + $0x26] ss:$8 sm:$0xf] }
 0x1d5   :  { %v4568_v26 = vmul.f32 -1.442695, %v1471_v41  ;;  %v4569_v56 = vmul.f32 -1.442695, %v1472_v58 }
 0x1d7   :  { %5023 = vpow2.f32 %v4568_v26 }
 0x1d8   :  { %5025 = vpow2.f32 %v4569_v56 }
 0x1d9   :  { %v1398_v43 = vpop.f32.mrf.mxu2  ;;  %v1411_v20 = vpop.f32.mrf.mxu3 }
 0x1da   :  { %v1473_v55 = vadd.f32 %v1398_v43, %v1347_v44  ;;  %v1474_v0 = vadd.f32 %v1411_v20, %v1348_v59  ;;  %v1374_v4 = vpop.f32.mrf.mxu0  ;;  %v1387_v19 = vpop.f32.mrf.mxu1  ;;  %v1354_v20 = vperm.slane %v1343_v32, 0  ;;  %v1356_v44 = vperm.slane %v1343_v32, 2 }
 0x1db   :  { %v1355_v19 = vperm.slane %v1343_v32, 1 }
 0x1dc   :  { %v4570_v14 = vmul.f32 -1.442695, %v1473_v55  ;;  %v4571_v5 = vmul.f32 -1.442695, %v1474_v0 }
 0x1dd   :  { %v5024_v42 = vpop.eup %5023 }
 0x1de   :  { %v5026_v17 = vpop.eup %5025  ;;  %v6058_v50 = vadd.f32 1.0, %v5024_v42  ;;  %5027 = vpow2.f32 %v4570_v14 }
 0x1df   :  { %v6060_v62 = vadd.f32 1.0, %v5026_v17  ;;  %5029 = vpow2.f32 %v4571_v5 }
 0x1e0   :  { %5031 = vrcp.f32 %v6058_v50  ;;  %vm1516_vm6 = vweird.f32 %v6058_v50 }
 0x1e1   :  { %5033 = vrcp.f32 %v6060_v62  ;;  %v1400_v56 = vpop.f32.mrf.mxu2  ;;  %v1413_v58 = vpop.f32.mrf.mxu3  ;;  %vm1531_vm0 = vweird.f32 %v6060_v62 }
 0x1e2   :  { %v1428_v43 = vpop.f32.mrf.mxu0  ;;  %v1441_v55 = vpop.f32.mrf.mxu1 }
 0x1e3   :  { %v1475_v0 = vadd.f32 %v1428_v43, %v1354_v20  ;;  %v1476_v38 = vadd.f32 %v1441_v55, %v1355_v19  ;;  %v1357_v43 = vperm.slane %v1343_v32, 3  ;;  %v1535_v32 = vand.u32 2147483647, %v6060_v62 }
 0x1e4   :  { %v5028_v4 = vpop.eup %5027 }
 0x1e5   :  { %v5030_v42 = vpop.eup %5029  ;;  %v6064_v9 = vadd.f32 1.0, %v5028_v4  ;;  %v4572_v13 = vmul.f32 -1.442695, %v1475_v0  ;;  %v4573_v59 = vmul.f32 -1.442695, %v1476_v38  ;;  %vm1536_vm10 = vcmp.eq.f32.partialorder %v1535_v32, 8.507059e+37 }
 0x1e6   :  { %v6066_v14 = vpop.eup %5031  ;;  %v6068_v17 = vadd.f32 1.0, %v5030_v42 }
 0x1e7   :  { %v6070_v5 = vpop.eup %5033  ;;  %5035 = vrcp.f32 %v6064_v9  ;;  %v1512_v41 = vmul.f32 %v6066_v14, %v6058_v50  ;;  %vm1517_vm3 = vweird.f32 %v6066_v14  ;;  %vm1546_vm5 = vweird.f32 %v6064_v9 }
 0x1e8   :  { %v1527_v26 = vmul.f32 %v6070_v5, %v6060_v62  ;;  %5037 = vrcp.f32 %v6068_v17  ;;  %vm1532_vm1 = vweird.f32 %v6070_v5  ;;  %vm6117_vm9 = vmor %vm1516_vm6, %vm1517_vm3  ;;  %vm1561_vm14 = vweird.f32 %v6068_v17 }
 0x1e9   :  { %v1454_v56 = vpop.f32.mrf.mxu2  ;;  %v1467_v58 = vpop.f32.mrf.mxu3  ;;  %5039 = vpow2.f32 %v4572_v13  ;;  %v1513_v42 = vsub.f32 1.0, %v1512_v41  ;;  %vm6102_vm4 = vmor %vm1531_vm0, %vm1532_vm1 }
 0x1ea   :  { %v1528_v20 = vsub.f32 1.0, %v1527_v26  ;;  %v1430_v19 = vpop.f32.mrf.mxu0  ;;  %v1443_v55 = vpop.f32.mrf.mxu1  ;;  %v1477_v4 = vadd.f32 %v1454_v56, %v1356_v44  ;;  %5041 = vpow2.f32 %v4573_v59  ;;  %v1478_v0 = vadd.f32 %v1467_v58, %v1357_v43 }
 0x1eb   :  { %v1514_v26 = vmul.f32 %v6066_v14, %v1513_v42  ;;  %v1550_v59 = vand.u32 2147483647, %v6064_v9  ;;  %v1552_v44 = vand.u32 2147483648, %v6064_v9  ;;  %v1537_v55 = vand.u32 2147483648, %v6060_v62 }
 0x1ec   :  { %v4574_v48 = vmul.f32 -1.442695, %v1477_v4  ;;  %v1529_v18 = vmul.f32 %v6070_v5, %v1528_v20  ;;  %v4575_v49 = vmul.f32 -1.442695, %v1478_v0  ;;  %v1520_v62 = vand.u32 2147483647, %v6058_v50 }
 0x1ed   :  { %v5036_v31 = vpop.eup %5035  ;;  %vm1551_vm8 = vcmp.eq.f32.partialorder %v1550_v59, 8.507059e+37  ;;  %v709_v59 = vlaneseq }
 0x1ee   :  { %v1542_v38 = vmul.f32 %v5036_v31, %v6064_v9  ;;  %5043 = vpow2.f32 %v4574_v48  ;;  %v6080_v39 = vpop.eup %5037  ;;  %v1530_v20 = vadd.f32 %v6070_v5, %v1529_v18  ;;  %vm1547_vm2 = vweird.f32 %v5036_v31 }
 0x1ef   :  { %v5040_v41 = vpop.eup %5039  ;;  %5045 = vpow2.f32 %v4575_v49  ;;  %v1557_v4 = vmul.f32 %v6080_v39, %v6068_v17  ;;  %v1515_v49 = vadd.f32 %v6066_v14, %v1514_v26  ;;  %vm1548_vm7 = vmor %vm1546_vm5, %vm1547_vm2  ;;  %v1553_v26 = vor.u32 1.1754944e-38, %v1552_v44 }
 0x1f0   :  { %v1543_v13 = vsub.f32 1.0, %v1542_v38  ;;  %v5042_v48 = vpop.eup %5041  ;;  %v6089_v19 = vadd.f32 1.0, %v5040_v41  ;;  %v1534_v41 = vsel %vm6102_vm4, %v6070_v5, %v1530_v20  ;;  %vm1521_vm11 = vcmp.eq.f32.partialorder %v1520_v62, 8.507059e+37 }
 0x1f1   :  { %v1456_v56 = vpop.f32.mrf.mxu2  ;;  %v1469_v58 = vpop.f32.mrf.mxu3  ;;  %v6095_v42 = vadd.f32 1.0, %v5042_v48  ;;  %v1538_v48 = vor.u32 1.1754944e-38, %v1537_v55  ;;  %v1558_v44 = vsub.f32 1.0, %v1557_v4  ;;  %v1565_v62 = vand.u32 2147483647, %v6068_v17 }
 0x1f2   :  { %v1544_v43 = vmul.f32 %v5036_v31, %v1543_v13  ;;  %5047 = vrcp.f32 %v6089_v19  ;;  %v1522_v13 = vand.u32 2147483648, %v6058_v50  ;;  %v1519_v50 = vsel %vm6117_vm9, %v6066_v14, %v1515_v49 }
 0x1f3   :  { %5049 = vrcp.f32 %v6095_v42  ;;  %v1539_v18 = vsel %vm1536_vm10, %v1538_v48, %v1534_v41  ;;  %v6140_v41 = vshrl.u32 %v709_v59, 7  ;;  %vm1562_vm12 = vweird.f32 %v6080_v39 }
 0x1f4   :  { %v1545_v0 = vadd.f32 %v5036_v31, %v1544_v43  ;;  %v5044_v38 = vpop.eup %5043  ;;  %v1523_v20 = vor.u32 1.1754944e-38, %v1522_v13  ;;  %v1635_v32 = vmul.f32 %v1539_v18, %v5968_v53  ;;  %vm6154_vm15 = vcmp.eq.f32.partialorder %v1565_v62, 8.507059e+37  ;;  %vm6160_vm0 = vmor %vm1561_vm14, %vm1562_vm12 }
 0x1f5   :  { %v5046_v9 = vpop.eup %5045  ;;  %v6121_v21 = vadd.f32 1.0, %v5044_v38  ;;  %vm7582_vm13 = vcmp.eq.s32.totalorder %v6140_v41, 0  ;;  %vm1645_vm1 = vcmp.eq.s32.totalorder %v6140_v41, 1  ;;  %vm1591_vm2 = vweird.f32 %v6095_v42 }
 0x1f6   :  { %v1549_v56 = vsel %vm1548_vm7, %v5036_v31, %v1545_v0  ;;  %v6126_v31 = vadd.f32 1.0, %v5046_v9  ;;  %v1524_v38 = vsel %vm1521_vm11, %v1523_v20, %v1519_v50  ;;  %v1597_v62 = vand.u32 2147483648, %v6095_v42 }
 0x1f7   :  { %v1554_v43 = vsel %vm1551_vm8, %v1553_v26, %v1549_v56  ;;  %5051 = vrcp.f32 %v6121_v21  ;;  %v1559_v26 = vmul.f32 %v6080_v39, %v1558_v44  ;;  %v1567_v56 = vand.u32 2147483648, %v6068_v17 }
 0x1f8   :  { %v1631_v5 = vmul.f32 2.0, %v1554_v43  ;;  %v6129_v0 = vpop.eup %5047  ;;  %5053 = vrcp.f32 %v6126_v31  ;;  %vm1606_vm5 = vweird.f32 %v6121_v21  ;;  %vm1576_vm8 = vweird.f32 %v6089_v19 }
 0x1f9   :  { %v6131_v4 = vpop.eup %5049  ;;  %v1572_v14 = vmul.f32 %v6129_v0, %v6089_v19  ;;  %v1560_v44 = vadd.f32 %v6080_v39, %v1559_v26  ;;  %vm1577_vm6 = vweird.f32 %v6129_v0 }
 0x1fa   :  { %v4576_v55 = vadd.f32 -1.0, %v1631_v5  ;;  %v1587_v13 = vmul.f32 %v6131_v4, %v6095_v42  ;;  %v1333_v5 = vperm.slane %v5988_v54, 0  ;;  %vm1592_vm3 = vweird.f32 %v6131_v4  ;;  %vm1578_vm11 = vmor %vm1576_vm8, %vm1577_vm6 }
 0x1fb   :  { %v1573_v9 = vsub.f32 1.0, %v1572_v14  ;;  %v1612_v54 = vand.u32 2147483648, %v6121_v21  ;;  %v1564_v17 = vsel %vm6160_vm0, %v6080_v39, %v1560_v44  ;;  %vm6183_vm7 = vmor %vm1591_vm2, %vm1592_vm3  ;;  %vm1621_vm0 = vweird.f32 %v6126_v31 }
 0x1fc   :  { %v1637_v49 = vmul.f32 %v4576_v55, %v1524_v38  ;;  %v1588_v58 = vsub.f32 1.0, %v1587_v13  ;;  %v1568_v55 = vor.u32 1.1754944e-38, %v1567_v56  ;;  %v1595_v13 = vand.u32 2147483647, %v6095_v42 }
 0x1fd   :  { %v5052_v43 = vpop.eup %5051  ;;  %v1574_v38 = vmul.f32 %v6129_v0, %v1573_v9 }
 0x1fe   :  { %v6144_v48 = vadd.f32 %v1637_v49, %v1635_v32  ;;  %v1589_v53 = vmul.f32 %v6131_v4, %v1588_v58  ;;  %v1602_v50 = vmul.f32 %v5052_v43, %v6121_v21  ;;  %v6158_v20 = vpop.eup %5053  ;;  %vm1607_vm4 = vweird.f32 %v5052_v43 }
 0x1ff   :  { %v1610_v49 = vand.u32 2147483647, %v6121_v21  ;;  %v1617_v56 = vmul.f32 %v6158_v20, %v6126_v31  ;;  %v1575_v58 = vadd.f32 %v6129_v0, %v1574_v38  ;;  %v1582_v21 = vand.u32 2147483648, %v6089_v19  ;;  %vm1608_vm9 = vmor %vm1606_vm5, %vm1607_vm4 }
 0x200   :  { %7676 = vst [vmem:[#allocation54_spill] sm:$0xff] %v6144_v48  ;;  %5055 = vtanh.f32 %v6144_v48  ;;  %v1603_v26 = vsub.f32 1.0, %v1602_v50  ;;  %v1590_v14 = vadd.f32 %v6131_v4, %v1589_v53  ;;  %v1569_v53 = vsel %vm6154_vm15, %v1568_v55, %v1564_v17 }
 0x201   :  { %v1613_v50 = vor.u32 1.1754944e-38, %v1612_v54  ;;  %v1580_v38 = vand.u32 2147483647, %v6089_v19  ;;  %vm1611_vm10 = vcmp.eq.f32.partialorder %v1610_v49, 8.507059e+37  ;;  %v1618_v59 = vsub.f32 1.0, %v1617_v56 }
 0x202   :  { %v1604_v32 = vmul.f32 %v5052_v43, %v1603_v26  ;;  %v1594_v42 = vsel %vm6183_vm7, %v6131_v4, %v1590_v14  ;;  %v1334_v17 = vsel %vm7582_vm13, %v1333_v5, 0.0  ;;  %v1579_v27 = vsel %vm1578_vm11, %v6129_v0, %v1575_v58 }
 0x203   :  { %vm1596_vm12 = vcmp.eq.f32.partialorder %v1595_v13, 8.507059e+37  ;;  %vm1581_vm14 = vcmp.eq.f32.partialorder %v1580_v38, 8.507059e+37  ;;  %v1619_v14 = vmul.f32 %v6158_v20, %v1618_v59  ;;  %vm1622_vm15 = vweird.f32 %v6158_v20  ;;  %v7687_v59 = vld [vmem:[#allocation25_spill] sm:$0xff] }
 0x204   :  { %v1605_v44 = vadd.f32 %v5052_v43, %v1604_v32  ;;  %v1598_v32 = vor.u32 1.1754944e-38, %v1597_v62  ;;  %v1625_v5 = vand.u32 2147483647, %v6126_v31  ;;  %vm1623_vm2 = vmor %vm1621_vm0, %vm1622_vm15  ;;  %v1338_v58 = vperm.slane %v5990_v3, 0 }
 0x205   :  { %v1620_v0 = vadd.f32 %v6158_v20, %v1619_v14  ;;  %vm1335_vm4 = vcmp.eq.s32.totalorder %v6140_v41, 7  ;;  %vm1650_vm5 = vcmp.eq.s32.totalorder %v6140_v41, 6  ;;  %v7695_v14 = vld [vmem:[#allocation33_spill] sm:$0xff] }
 0x206   :  { %v5056_v9 = vpop.eup %5055  ;;  %v1609_v26 = vsel %vm1608_vm9, %v5052_v43, %v1605_v44  ;;  %v1599_v19 = vsel %vm1596_vm12, %v1598_v32, %v1594_v42  ;;  %vm1626_vm3 = vcmp.eq.f32.partialorder %v1625_v5, 8.507059e+37  ;;  %v1339_v38 = vsel %vm1335_vm4, %v1338_v58, 0.0  ;;  %v7684_v42 = vld [vmem:[#allocation22_spill] sm:$0xff]  ;;  %v7686_v32 = vld [vmem:[#allocation24_spill] sm:$0xff] }
 0x207   :  { %v1643_v18 = vmul.f32 %v5056_v9, %v1569_v53  ;;  %v1614_v48 = vsel %vm1611_vm10, %v1613_v50, %v1609_v26  ;;  %v1583_v9 = vor.u32 1.1754944e-38, %v1582_v21  ;;  %v1636_v49 = vmul.f32 %v1599_v19, %v5973_v63  ;;  %v7685_v26 = vld [vmem:[#allocation23_spill] sm:$0xff]  ;;  %v7692_v19 = vld [vmem:[#allocation30_spill] sm:$0xff] }
 0x208   :  { %v1632_v54 = vmul.f32 2.0, %v1614_v48  ;;  %v1627_v48 = vand.u32 2147483648, %v6126_v31  ;;  %v7700_v5 = vld [vmem:[#allocation38_spill] sm:$0xff] }
 0x209   :  { %v1648_v55 = vperm.slane %v1643_v18, 0  ;;  %v1584_v43 = vsel %vm1581_vm14, %v1583_v9, %v1579_v27  ;;  %v1624_v27 = vsel %vm1623_vm2, %v6158_v20, %v1620_v0  ;;  %v7691_v9 = vld [vmem:[#allocation29_spill] sm:$0xff]  ;;  %v7698_v0 = vld [vmem:[#allocation36_spill] sm:$0xff]  ;;  %v7704_v58 = vld [vmem:[#allocation42_spill] sm:$0xff] }
 0x20a   :  { %v4577_v4 = vadd.f32 -1.0, %v1632_v54  ;;  %v1628_v13 = vor.u32 1.1754944e-38, %v1627_v48  ;;  %v7690_v54 = vld [vmem:[#allocation28_spill] sm:$0xff]  ;;  %v7699_v48 = vld [vmem:[#allocation37_spill] sm:$0xff] }
 0x20b   :  { %v6200_v39 = vsel %vm1645_vm1, %v1648_v55, %v1334_v17  ;;  %v7688_v55 = vld [vmem:[#allocation26_spill] sm:$0xff]  ;;  %v7689_v17 = vld [vmem:[#allocation27_spill] sm:$0xff] }
 0x20c   :  { %v1638_v62 = vmul.f32 %v4577_v4, %v1584_v43  ;;  %v1629_v44 = vsel %vm1626_vm3, %v1628_v13, %v1624_v27  ;;  %v7693_v4 = vld [vmem:[#allocation31_spill] sm:$0xff]  ;;  %v7694_v43 = vld [vmem:[#allocation32_spill] sm:$0xff] }
 0x20d   :  { %v7701_v27 = vld [vmem:[#allocation39_spill] sm:$0xff]  ;;  %v7702_v13 = vld [vmem:[#allocation40_spill] sm:$0xff] }
 0x20e   :  { %v6204_v56 = vadd.f32 %v1638_v62, %v1636_v49  ;;  %v7696_v49 = vld [vmem:[#allocation34_spill] sm:$0xff]  ;;  %v7697_v62 = vld [vmem:[#allocation35_spill] sm:$0xff] }
 0x210   :  { %5057 = vtanh.f32 %v6204_v56 }
 0x216   :  { %v5058_v63 = vpop.eup %5057 }
 0x217   :  { %v1644_v53 = vmul.f32 %v5058_v63, %v1629_v44  ;;  %v7703_v63 = vld [vmem:[#allocation41_spill] sm:$0xff]  ;;  %v7705_v44 = vld [vmem:[#allocation43_spill] sm:$0xff] }
 0x219   :  { %v1653_v21 = vperm.slane %v1644_v53, 0  ;;  %v1677_v50 = vpack.c.bf16 %v1644_v53, %v1643_v18  ;;  %v7683_v18 = vld [vmem:[#allocation21_spill] sm:$0xff]  ;;  %v7706_v53 = vld [vmem:[#allocation44_spill] sm:$0xff] }
 0x21b   :  { %1686 = vmatmul.bf16.vlgmr.msra.gmra.mxu0 %v1677_v50  ;;  %1699 = vmatmul.bf16.vlgmr.msra.gmra.mxu1 %v1677_v50  ;;  %v6220_v31 = vsel %vm1650_vm5, %v1653_v21, %v1339_v38  ;;  %v1731_v3 = vunpack.c.h.b16 %v1677_v50  ;;  %v7707_v21 = vld [vmem:[#allocation45_spill] sm:$0xff]  ;;  %v7709_v38 = vld [vmem:[#allocation47_spill] sm:$0xff] }
 0x21c   :  { %1712 = vmatmul.bf16.vlgmr.msra.gmra.mxu2 %v1677_v50  ;;  %1725 = vmatmul.bf16.vlgmr.msra.gmra.mxu3 %v1677_v50  ;;  %v7708_v50 = vld [vmem:[#allocation46_spill] sm:$0xff] }
 0x21d   :  { %1993 = vmatpush.bf16.msra.mxu0 %v5586_v10  ;;  %2006 = vmatpush.bf16.msra.mxu1 %v5588_v11  ;;  %v1732_v20 = vpack.c.b16 %v1731_v3, %v1731_v3  ;;  %v7710_v3 = vld [vmem:[#allocation48_spill] sm:$0xff] }
 0x21e   :  { %2019 = vmatpush.bf16.msra.mxu2 %v5590_v12  ;;  %2032 = vmatpush.bf16.msra.mxu3 %v5592_v16 }
 0x221   :  { %1994 = vmatpush.bf16.msra.mxu0 %v5595_v22  ;;  %2007 = vmatpush.bf16.msra.mxu1 %v5599_v23 }
 0x222   :  { %2020 = vmatpush.bf16.msra.mxu2 %v5601_v24  ;;  %2033 = vmatpush.bf16.msra.mxu3 %v5604_v28 }
 0x225   :  { %1995 = vmatpush.bf16.msra.mxu0 %v5610_v34  ;;  %2008 = vmatpush.bf16.msra.mxu1 %v5615_v35 }
 0x226   :  { %2021 = vmatpush.bf16.msra.mxu2 %v5617_v36  ;;  %2034 = vmatpush.bf16.msra.mxu3 %v5620_v40 }
 0x229   :  { %1996 = vmatpush.bf16.msra.mxu0 %v5623_v45  ;;  %2009 = vmatpush.bf16.msra.mxu1 %v5627_v46 }
 0x22a   :  { %2022 = vmatpush.bf16.msra.mxu2 %v5629_v47  ;;  %2035 = vmatpush.bf16.msra.mxu3 %v5632_v51 }
 0x22b   :  { %1742 = vmatmul.bf16.vlgmr.msrb.gmra.mxu0 %v1732_v20  ;;  %1755 = vmatmul.bf16.vlgmr.msrb.gmra.mxu1 %v1732_v20 }
 0x22c   :  { %1768 = vmatmul.bf16.vlgmr.msrb.gmra.mxu2 %v1732_v20  ;;  %1781 = vmatmul.bf16.vlgmr.msrb.gmra.mxu3 %v1732_v20  ;;  %v7711_v20 = vld [vmem:[#allocation49_spill] sm:$0xff] }
 0x22d   :  { %1997 = vmatpush.bf16.msra.mxu0 %v5635_v57  ;;  %2010 = vmatpush.bf16.msra.mxu1 %v5639_v60 }
 0x22e   :  { %2023 = vmatpush.bf16.msra.mxu2 %v5641_v61  ;;  %2036 = vmatpush.bf16.msra.mxu3 %v5644_v2 }
 0x231   :  { %1998 = vmatpush.bf16.msra.mxu0 %v5647_v6  ;;  %2011 = vmatpush.bf16.msra.mxu1 %v5651_v7 }
 0x232   :  { %2024 = vmatpush.bf16.msra.mxu2 %v5653_v8  ;;  %2037 = vmatpush.bf16.msra.mxu3 %v5656_v15 }
 0x235   :  { %1999 = vmatpush.bf16.msra.mxu0 %v5659_v25  ;;  %2012 = vmatpush.bf16.msra.mxu1 %v5663_v29 }
 0x236   :  { %2025 = vmatpush.bf16.msra.mxu2 %v5665_v30  ;;  %2038 = vmatpush.bf16.msra.mxu3 %v5668_v37 }
 0x239   :  { %2000 = vmatpush.bf16.msra.mxu0 %v5671_v1  ;;  %2013 = vmatpush.bf16.msra.mxu1 %v5675_v52 }
 0x23a   :  { %2026 = vmatpush.bf16.msra.mxu2 %v7638_v33  ;;  %2039 = vmatpush.bf16.msra.mxu3 %v7683_v18 }
 0x23d   :  { %2049 = vmatpush.bf16.msrb.mxu0 %v7684_v42  ;;  %2062 = vmatpush.bf16.msrb.mxu1 %v7685_v26 }
 0x23e   :  { %2075 = vmatpush.bf16.msrb.mxu2 %v7686_v32  ;;  %2088 = vmatpush.bf16.msrb.mxu3 %v7687_v59 }
 0x241   :  { %2050 = vmatpush.bf16.msrb.mxu0 %v7688_v55  ;;  %2063 = vmatpush.bf16.msrb.mxu1 %v7689_v17 }
 0x242   :  { %2076 = vmatpush.bf16.msrb.mxu2 %v7690_v54  ;;  %2089 = vmatpush.bf16.msrb.mxu3 %v7691_v9 }
 0x245   :  { %2051 = vmatpush.bf16.msrb.mxu0 %v7692_v19  ;;  %2064 = vmatpush.bf16.msrb.mxu1 %v7693_v4 }
 0x246   :  { %2077 = vmatpush.bf16.msrb.mxu2 %v7694_v43  ;;  %2090 = vmatpush.bf16.msrb.mxu3 %v7695_v14 }
 0x249   :  { %2052 = vmatpush.bf16.msrb.mxu0 %v7696_v49  ;;  %2065 = vmatpush.bf16.msrb.mxu1 %v7697_v62 }
 0x24a   :  { %2078 = vmatpush.bf16.msrb.mxu2 %v7698_v0  ;;  %2091 = vmatpush.bf16.msrb.mxu3 %v7699_v48 }
 0x24d   :  { %2053 = vmatpush.bf16.msrb.mxu0 %v7700_v5  ;;  %2066 = vmatpush.bf16.msrb.mxu1 %v7701_v27  ;;  %v7712_v27 = vld [vmem:[#allocation50_spill] sm:$0xff] }
 0x24e   :  { %2079 = vmatpush.bf16.msrb.mxu2 %v7702_v13  ;;  %2092 = vmatpush.bf16.msrb.mxu3 %v7703_v63  ;;  %v7713_v13 = vld [vmem:[#allocation51_spill] sm:$0xff]  ;;  %v7714_v63 = vld [vmem:[#allocation52_spill] sm:$0xff] }
 0x251   :  { %2054 = vmatpush.bf16.msrb.mxu0 %v7704_v58  ;;  %2067 = vmatpush.bf16.msrb.mxu1 %v7705_v44  ;;  %v7715_v58 = vld [vmem:[#allocation53_spill] sm:$0xff] }
 0x252   :  { %2080 = vmatpush.bf16.msrb.mxu2 %v7706_v53  ;;  %2093 = vmatpush.bf16.msrb.mxu3 %v7707_v21  ;;  %v1656_v44 = vld [vmem:[#allocation2 + $0x2] ss:$8 sm:$0xf] }
 0x253   :  { %v1660_v53 = vperm.slane %v1656_v44, 0  ;;  %v1661_v5 = vperm.slane %v1656_v44, 1 }
 0x255   :  { %2055 = vmatpush.bf16.msrb.mxu0 %v7708_v50  ;;  %2068 = vmatpush.bf16.msrb.mxu1 %v7709_v38 }
 0x256   :  { %2081 = vmatpush.bf16.msrb.mxu2 %v7710_v3  ;;  %2094 = vmatpush.bf16.msrb.mxu3 %v7711_v20  ;;  %v1662_v20 = vperm.slane %v1656_v44, 2  ;;  %v1663_v3 = vperm.slane %v1656_v44, 3 }
 0x259   :  { %2056 = vmatpush.bf16.msrb.mxu0 %v7712_v27  ;;  %2069 = vmatpush.bf16.msrb.mxu1 %v7713_v13 }
 0x25a   :  { %2082 = vmatpush.bf16.msrb.mxu2 %v7714_v63  ;;  %2095 = vmatpush.bf16.msrb.mxu3 %v7715_v58 }
 0x298   :  { %v1687_v21 = vpop.f32.mrf.mxu0  ;;  %v1700_v48 = vpop.f32.mrf.mxu1 }
 0x299   :  { %v1786_v50 = vadd.f32 %v1687_v21, %v1660_v53  ;;  %v1787_v0 = vadd.f32 %v1700_v48, %v1661_v5  ;;  %v1658_v48 = vld [vmem:[#allocation2 + $0x25] ss:$8 sm:$0xf] }
 0x29b   :  { %v4578_v38 = vmul.f32 -1.442695, %v1786_v50  ;;  %v4579_v62 = vmul.f32 -1.442695, %v1787_v0 }
 0x29d   :  { %5059 = vpow2.f32 %v4578_v38 }
 0x29e   :  { %5061 = vpow2.f32 %v4579_v62 }
 0x29f   :  { %v1713_v27 = vpop.f32.mrf.mxu2  ;;  %v1726_v49 = vpop.f32.mrf.mxu3 }
 0x2a0   :  { %v1788_v13 = vadd.f32 %v1713_v27, %v1662_v20  ;;  %v1789_v14 = vadd.f32 %v1726_v49, %v1663_v3  ;;  %v1689_v63 = vpop.f32.mrf.mxu0  ;;  %v1702_v43 = vpop.f32.mrf.mxu1  ;;  %v1669_v49 = vperm.slane %v1658_v48, 0  ;;  %v1671_v20 = vperm.slane %v1658_v48, 2 }
 0x2a1   :  { %v1670_v43 = vperm.slane %v1658_v48, 1 }
 0x2a2   :  { %v4580_v58 = vmul.f32 -1.442695, %v1788_v13  ;;  %v4581_v4 = vmul.f32 -1.442695, %v1789_v14 }
 0x2a3   :  { %v5060_v19 = vpop.eup %5059 }
 0x2a4   :  { %v5062_v9 = vpop.eup %5061  ;;  %v6286_v54 = vadd.f32 1.0, %v5060_v19  ;;  %5063 = vpow2.f32 %v4580_v58 }
 0x2a5   :  { %v6288_v5 = vadd.f32 1.0, %v5062_v9  ;;  %5065 = vpow2.f32 %v4581_v4 }
 0x2a6   :  { %5067 = vrcp.f32 %v6286_v54  ;;  %vm1831_vm12 = vweird.f32 %v6286_v54 }
 0x2a7   :  { %5069 = vrcp.f32 %v6288_v5  ;;  %v1715_v62 = vpop.f32.mrf.mxu2  ;;  %v1728_v0 = vpop.f32.mrf.mxu3  ;;  %vm1846_vm6 = vweird.f32 %v6288_v5 }
 0x2a8   :  { %v1743_v27 = vpop.f32.mrf.mxu0  ;;  %v1756_v13 = vpop.f32.mrf.mxu1 }
 0x2a9   :  { %v1790_v14 = vadd.f32 %v1743_v27, %v1669_v49  ;;  %v1791_v44 = vadd.f32 %v1756_v13, %v1670_v43  ;;  %v1672_v27 = vperm.slane %v1658_v48, 3  ;;  %v1850_v48 = vand.u32 2147483647, %v6288_v5 }
 0x2aa   :  { %v5064_v63 = vpop.eup %5063 }
 0x2ab   :  { %v5066_v19 = vpop.eup %5065  ;;  %v6292_v53 = vadd.f32 1.0, %v5064_v63  ;;  %v4582_v21 = vmul.f32 -1.442695, %v1790_v14  ;;  %v4583_v3 = vmul.f32 -1.442695, %v1791_v44  ;;  %vm1851_vm2 = vcmp.eq.f32.partialorder %v1850_v48, 8.507059e+37 }
 0x2ac   :  { %v6294_v58 = vpop.eup %5067  ;;  %v6296_v9 = vadd.f32 1.0, %v5066_v19  ;;  %v7720_v48 = vld [vmem:[#allocation54_spill] sm:$0xff] }
 0x2ad   :  { %v6298_v4 = vpop.eup %5069  ;;  %5071 = vrcp.f32 %v6292_v53  ;;  %v1827_v50 = vmul.f32 %v6294_v58, %v6286_v54  ;;  %vm1832_vm9 = vweird.f32 %v6294_v58  ;;  %vm1861_vm11 = vweird.f32 %v6292_v53 }
 0x2ae   :  { %v1842_v38 = vmul.f32 %v6298_v4, %v6288_v5  ;;  %5073 = vrcp.f32 %v6296_v9  ;;  %vm1847_vm7 = vweird.f32 %v6298_v4  ;;  %vm6345_vm0 = vmor %vm1831_vm12, %vm1832_vm9 }
 0x2af   :  { %v1769_v62 = vpop.f32.mrf.mxu2  ;;  %v1782_v0 = vpop.f32.mrf.mxu3  ;;  %5075 = vpow2.f32 %v4582_v21  ;;  %v1828_v19 = vsub.f32 1.0, %v1827_v50  ;;  %vm6330_vm10 = vmor %vm1846_vm6, %vm1847_vm7  ;;  %vm1876_vm7 = vweird.f32 %v6296_v9 }
 0x2b0   :  { %v1843_v49 = vsub.f32 1.0, %v1842_v38  ;;  %v1745_v43 = vpop.f32.mrf.mxu0  ;;  %v1758_v13 = vpop.f32.mrf.mxu1  ;;  %v1792_v63 = vadd.f32 %v1769_v62, %v1671_v20  ;;  %5077 = vpow2.f32 %v4583_v3  ;;  %v1793_v14 = vadd.f32 %v1782_v0, %v1672_v27 }
 0x2b1   :  { %v1829_v38 = vmul.f32 %v6294_v58, %v1828_v19  ;;  %v1865_v3 = vand.u32 2147483647, %v6292_v53  ;;  %v1867_v20 = vand.u32 2147483648, %v6292_v53  ;;  %v1852_v13 = vand.u32 2147483648, %v6288_v5 }
 0x2b2   :  { %v4584_v55 = vmul.f32 -1.442695, %v1792_v63  ;;  %v1844_v59 = vmul.f32 %v6298_v4, %v1843_v49  ;;  %v4585_v32 = vmul.f32 -1.442695, %v1793_v14  ;;  %v1835_v5 = vand.u32 2147483647, %v6286_v54 }
 0x2b3   :  { %v5072_v17 = vpop.eup %5071  ;;  %vm1866_vm15 = vcmp.eq.f32.partialorder %v1865_v3, 8.507059e+37 }
 0x2b4   :  { %v1857_v44 = vmul.f32 %v5072_v17, %v6292_v53  ;;  %5079 = vpow2.f32 %v4584_v55  ;;  %v6308_v26 = vpop.eup %5073  ;;  %v1845_v49 = vadd.f32 %v6298_v4, %v1844_v59  ;;  %vm1862_vm8 = vweird.f32 %v5072_v17 }
 0x2b5   :  { %v5076_v50 = vpop.eup %5075  ;;  %5081 = vpow2.f32 %v4585_v32  ;;  %v1872_v63 = vmul.f32 %v6308_v26, %v6296_v9  ;;  %v1830_v32 = vadd.f32 %v6294_v58, %v1829_v38  ;;  %vm1863_vm14 = vmor %vm1861_vm11, %vm1862_vm8  ;;  %v1868_v38 = vor.u32 1.1754944e-38, %v1867_v20 }
 0x2b6   :  { %v1858_v21 = vsub.f32 1.0, %v1857_v44  ;;  %v5078_v55 = vpop.eup %5077  ;;  %v6317_v43 = vadd.f32 1.0, %v5076_v50  ;;  %v1849_v50 = vsel %vm6330_vm10, %v6298_v4, %v1845_v49  ;;  %vm1836_vm3 = vcmp.eq.f32.partialorder %v1835_v5, 8.507059e+37 }
 0x2b7   :  { %v1771_v62 = vpop.f32.mrf.mxu2  ;;  %v1784_v0 = vpop.f32.mrf.mxu3  ;;  %v6323_v19 = vadd.f32 1.0, %v5078_v55  ;;  %v1853_v55 = vor.u32 1.1754944e-38, %v1852_v13  ;;  %v1873_v20 = vsub.f32 1.0, %v1872_v63  ;;  %v1882_v5 = vand.u32 2147483648, %v6296_v9 }
 0x2b8   :  { %v1859_v27 = vmul.f32 %v5072_v17, %v1858_v21  ;;  %5083 = vrcp.f32 %v6317_v43  ;;  %v1837_v21 = vand.u32 2147483648, %v6286_v54  ;;  %v1834_v54 = vsel %vm6345_vm0, %v6294_v58, %v1830_v32 }
 0x2b9   :  { %5085 = vrcp.f32 %v6323_v19  ;;  %v1854_v49 = vsel %vm1851_vm2, %v1853_v55, %v1849_v50  ;;  %v1880_v50 = vand.u32 2147483647, %v6296_v9  ;;  %vm1877_vm6 = vweird.f32 %v6308_v26 }
 0x2ba   :  { %v1860_v14 = vadd.f32 %v5072_v17, %v1859_v27  ;;  %v5080_v44 = vpop.eup %5079  ;;  %v1838_v3 = vor.u32 1.1754944e-38, %v1837_v21  ;;  %v1950_v32 = vmul.f32 %v1854_v49, %v7720_v48  ;;  %vm6384_vm9 = vmor %vm1876_vm7, %vm1877_vm6  ;;  %vm1960_vm10 = vcmp.eq.s32.totalorder %v6140_v41, 2 }
 0x2bb   :  { %v5082_v53 = vpop.eup %5081  ;;  %v6349_v42 = vadd.f32 1.0, %v5080_v44  ;;  %v1874_v44 = vmul.f32 %v6308_v26, %v1873_v20  ;;  %vm6378_vm8 = vcmp.eq.f32.partialorder %v1880_v50, 8.507059e+37  ;;  %vm1906_vm11 = vweird.f32 %v6323_v19 }
 0x2bc   :  { %v1864_v62 = vsel %vm1863_vm14, %v5072_v17, %v1860_v14  ;;  %v6354_v17 = vadd.f32 1.0, %v5082_v53  ;;  %v1839_v63 = vsel %vm1836_vm3, %v1838_v3, %v1834_v54  ;;  %v1912_v50 = vand.u32 2147483648, %v6323_v19 }
 0x2bd   :  { %v1869_v27 = vsel %vm1866_vm15, %v1868_v38, %v1864_v62  ;;  %5087 = vrcp.f32 %v6349_v42  ;;  %v1927_v9 = vand.u32 2147483648, %v6349_v42  ;;  %vm1921_vm15 = vweird.f32 %v6349_v42 }
 0x2be   :  { %v1946_v4 = vmul.f32 2.0, %v1869_v27  ;;  %v6357_v59 = vpop.eup %5083  ;;  %5089 = vrcp.f32 %v6354_v17  ;;  %v1875_v27 = vadd.f32 %v6308_v26, %v1874_v44  ;;  %vm1891_vm3 = vweird.f32 %v6317_v43 }
 0x2bf   :  { %v6359_v14 = vpop.eup %5085  ;;  %v1887_v58 = vmul.f32 %v6357_v59, %v6317_v43  ;;  %vm1892_vm0 = vweird.f32 %v6357_v59 }
 0x2c0   :  { %v4586_v13 = vadd.f32 -1.0, %v1946_v4  ;;  %v1902_v21 = vmul.f32 %v6359_v14, %v6323_v19  ;;  %vm1907_vm12 = vweird.f32 %v6359_v14 }
 0x2c1   :  { %v1888_v62 = vsub.f32 1.0, %v1887_v58  ;;  %v1879_v58 = vsel %vm6384_vm9, %v6308_v26, %v1875_v27  ;;  %vm6407_vm2 = vmor %vm1906_vm11, %vm1907_vm12 }
 0x2c2   :  { %v1952_v38 = vmul.f32 %v4586_v13, %v1839_v63  ;;  %v1903_v53 = vsub.f32 1.0, %v1902_v21  ;;  %v1883_v13 = vor.u32 1.1754944e-38, %v1882_v5  ;;  %v1910_v21 = vand.u32 2147483647, %v6323_v19  ;;  %vm1893_vm9 = vmor %vm1891_vm3, %vm1892_vm0 }
 0x2c3   :  { %v5088_v55 = vpop.eup %5087  ;;  %v1889_v63 = vmul.f32 %v6357_v59, %v1888_v62 }
 0x2c4   :  { %v6370_v0 = vadd.f32 %v1952_v38, %v1950_v32  ;;  %v1904_v20 = vmul.f32 %v6359_v14, %v1903_v53  ;;  %v1917_v54 = vmul.f32 %v5088_v55, %v6349_v42  ;;  %v6382_v3 = vpop.eup %5089  ;;  %vm1922_vm14 = vweird.f32 %v5088_v55 }
 0x2c5   :  { %v1925_v38 = vand.u32 2147483647, %v6349_v42  ;;  %v1932_v5 = vmul.f32 %v6382_v3, %v6354_v17  ;;  %v1890_v53 = vadd.f32 %v6357_v59, %v1889_v63  ;;  %v1897_v42 = vand.u32 2147483648, %v6317_v43  ;;  %vm1923_vm6 = vmor %vm1921_vm15, %vm1922_vm14 }
 0x2c6   :  { %7721 = vst [vmem:[#allocation54_spill] sm:$0xff] %v6370_v0  ;;  %5091 = vtanh.f32 %v6370_v0  ;;  %v1918_v44 = vsub.f32 1.0, %v1917_v54  ;;  %v1905_v48 = vadd.f32 %v6359_v14, %v1904_v20  ;;  %v1884_v20 = vsel %vm6378_vm8, %v1883_v13, %v1879_v58 }
 0x2c7   :  { %v1928_v54 = vor.u32 1.1754944e-38, %v1927_v9  ;;  %v1895_v63 = vand.u32 2147483647, %v6317_v43  ;;  %vm1926_vm7 = vcmp.eq.f32.partialorder %v1925_v38, 8.507059e+37  ;;  %v1933_v4 = vsub.f32 1.0, %v1932_v5 }
 0x2c8   :  { %v1919_v32 = vmul.f32 %v5088_v55, %v1918_v44  ;;  %v1909_v19 = vsel %vm6407_vm2, %v6359_v14, %v1905_v48  ;;  %v1894_v58 = vsel %vm1893_vm9, %v6357_v59, %v1890_v53  ;;  %vm1911_vm8 = vcmp.eq.f32.partialorder %v1910_v21, 8.507059e+37 }
 0x2c9   :  { %v1898_v33 = vor.u32 1.1754944e-38, %v1897_v42  ;;  %vm1896_vm11 = vcmp.eq.f32.partialorder %v1895_v63, 8.507059e+37  ;;  %v1934_v48 = vmul.f32 %v6382_v3, %v1933_v4  ;;  %vm1937_vm12 = vweird.f32 %v6382_v3  ;;  %v7730_v42 = vld [vmem:[#allocation22_spill] sm:$0xff]  ;;  %v7733_v63 = vld [vmem:[#allocation25_spill] sm:$0xff] }
 0x2ca   :  { %v1920_v27 = vadd.f32 %v5088_v55, %v1919_v32  ;;  %v1913_v32 = vor.u32 1.1754944e-38, %v1912_v50  ;;  %vm1936_vm14 = vweird.f32 %v6354_v17  ;;  %vm1965_vm2 = vcmp.eq.s32.totalorder %v6140_v41, 5  ;;  %v7737_v4 = vld [vmem:[#allocation29_spill] sm:$0xff] }
 0x2cb   :  { %v1935_v59 = vadd.f32 %v6382_v3, %v1934_v48  ;;  %vm1938_vm15 = vmor %vm1936_vm14, %vm1937_vm12  ;;  %v7743_v48 = vld [vmem:[#allocation35_spill] sm:$0xff] }
 0x2cc   :  { %v5092_v62 = vpop.eup %5091  ;;  %v1924_v44 = vsel %vm1923_vm6, %v5088_v55, %v1920_v27  ;;  %v1914_v9 = vsel %vm1911_vm8, %v1913_v32, %v1909_v19  ;;  %v1899_v55 = vsel %vm1896_vm11, %v1898_v33, %v1894_v58  ;;  %v7734_v19 = vld [vmem:[#allocation26_spill] sm:$0xff]  ;;  %v7736_v32 = vld [vmem:[#allocation28_spill] sm:$0xff]  ;;  %v7739_v58 = vld [vmem:[#allocation31_spill] sm:$0xff] }
 0x2cd   :  { %v1958_v49 = vmul.f32 %v5092_v62, %v1884_v20  ;;  %v1929_v0 = vsel %vm1926_vm7, %v1928_v54, %v1924_v44  ;;  %v1951_v38 = vmul.f32 %v1914_v9, %v6204_v56  ;;  %v1939_v33 = vsel %vm1938_vm15, %v6382_v3, %v1935_v59  ;;  %v7728_v3 = vld [vmem:[#allocation20_spill] sm:$0xff]  ;;  %v7729_v20 = vld [vmem:[#allocation21_spill] sm:$0xff]  ;;  %v7731_v54 = vld [vmem:[#allocation23_spill] sm:$0xff] }
 0x2ce   :  { %v1947_v18 = vmul.f32 2.0, %v1929_v0  ;;  %v1942_v0 = vand.u32 2147483648, %v6354_v17  ;;  %v7735_v44 = vld [vmem:[#allocation27_spill] sm:$0xff]  ;;  %v7740_v9 = vld [vmem:[#allocation32_spill] sm:$0xff]  ;;  %v7746_v59 = vld [vmem:[#allocation38_spill] sm:$0xff] }
 0x2cf   :  { %v1963_v13 = vperm.slane %v1958_v49, 0 }
 0x2d0   :  { %v4587_v14 = vadd.f32 -1.0, %v1947_v18  ;;  %v1943_v18 = vor.u32 1.1754944e-38, %v1942_v0  ;;  %v7747_v0 = vld [vmem:[#allocation39_spill] sm:$0xff] }
 0x2d1   :  { %v6423_v43 = vsel %vm1960_vm10, %v1963_v13, %v6200_v39  ;;  %v1940_v39 = vand.u32 2147483647, %v6354_v17  ;;  %v7738_v13 = vld [vmem:[#allocation30_spill] sm:$0xff] }
 0x2d2   :  { %v1953_v50 = vmul.f32 %v4587_v14, %v1899_v55  ;;  %v7741_v14 = vld [vmem:[#allocation33_spill] sm:$0xff]  ;;  %v7742_v55 = vld [vmem:[#allocation34_spill] sm:$0xff] }
 0x2d3   :  { %vm1941_vm0 = vcmp.eq.f32.partialorder %v1940_v39, 8.507059e+37  ;;  %v7748_v39 = vld [vmem:[#allocation40_spill] sm:$0xff] }
 0x2d4   :  { %v6427_v5 = vadd.f32 %v1953_v50, %v1951_v38  ;;  %v1944_v21 = vsel %vm1941_vm0, %v1943_v18, %v1939_v33  ;;  %v7744_v38 = vld [vmem:[#allocation36_spill] sm:$0xff]  ;;  %v7745_v50 = vld [vmem:[#allocation37_spill] sm:$0xff]  ;;  %v7750_v18 = vld [vmem:[#allocation42_spill] sm:$0xff] }
 0x2d5   :  { %v7749_v33 = vld [vmem:[#allocation41_spill] sm:$0xff] }
 0x2d6   :  { %5093 = vtanh.f32 %v6427_v5 }
 0x2dc   :  { %v5094_v56 = vpop.eup %5093 }
 0x2dd   :  { %v1959_v62 = vmul.f32 %v5094_v56, %v1944_v21  ;;  %v7751_v56 = vld [vmem:[#allocation43_spill] sm:$0xff]  ;;  %v7752_v21 = vld [vmem:[#allocation44_spill] sm:$0xff] }
 0x2df   :  { %v1968_v53 = vperm.slane %v1959_v62, 0  ;;  %v1992_v26 = vpack.c.bf16 %v1959_v62, %v1958_v49  ;;  %v7732_v49 = vld [vmem:[#allocation24_spill] sm:$0xff]  ;;  %v7753_v62 = vld [vmem:[#allocation45_spill] sm:$0xff] }
 0x2e1   :  { %2001 = vmatmul.bf16.vlgmr.msra.gmra.mxu0 %v1992_v26  ;;  %2014 = vmatmul.bf16.vlgmr.msra.gmra.mxu1 %v1992_v26  ;;  %v6440_v27 = vsel %vm1965_vm2, %v1968_v53, %v6220_v31  ;;  %v2046_v31 = vunpack.c.h.b16 %v1992_v26  ;;  %v7754_v53 = vld [vmem:[#allocation46_spill] sm:$0xff] }
 0x2e2   :  { %2027 = vmatmul.bf16.vlgmr.msra.gmra.mxu2 %v1992_v26  ;;  %2040 = vmatmul.bf16.vlgmr.msra.gmra.mxu3 %v1992_v26  ;;  %v7755_v26 = vld [vmem:[#allocation47_spill] sm:$0xff] }
 0x2e3   :  { %2308 = vmatpush.bf16.msra.mxu0 %v5586_v10  ;;  %2321 = vmatpush.bf16.msra.mxu1 %v5588_v11  ;;  %v2047_v17 = vpack.c.b16 %v2046_v31, %v2046_v31  ;;  %v7756_v31 = vld [vmem:[#allocation48_spill] sm:$0xff] }
 0x2e4   :  { %2334 = vmatpush.bf16.msra.mxu2 %v5590_v12  ;;  %2347 = vmatpush.bf16.msra.mxu3 %v5592_v16 }
 0x2e7   :  { %2309 = vmatpush.bf16.msra.mxu0 %v5595_v22  ;;  %2322 = vmatpush.bf16.msra.mxu1 %v5599_v23 }
 0x2e8   :  { %2335 = vmatpush.bf16.msra.mxu2 %v5601_v24  ;;  %2348 = vmatpush.bf16.msra.mxu3 %v5604_v28 }
 0x2eb   :  { %2310 = vmatpush.bf16.msra.mxu0 %v5610_v34  ;;  %2323 = vmatpush.bf16.msra.mxu1 %v5615_v35 }
 0x2ec   :  { %2336 = vmatpush.bf16.msra.mxu2 %v5617_v36  ;;  %2349 = vmatpush.bf16.msra.mxu3 %v5620_v40 }
 0x2ef   :  { %2311 = vmatpush.bf16.msra.mxu0 %v5623_v45  ;;  %2324 = vmatpush.bf16.msra.mxu1 %v5627_v46 }
 0x2f0   :  { %2337 = vmatpush.bf16.msra.mxu2 %v5629_v47  ;;  %2350 = vmatpush.bf16.msra.mxu3 %v5632_v51 }
 0x2f1   :  { %2057 = vmatmul.bf16.vlgmr.msrb.gmra.mxu0 %v2047_v17  ;;  %2070 = vmatmul.bf16.vlgmr.msrb.gmra.mxu1 %v2047_v17 }
 0x2f2   :  { %2083 = vmatmul.bf16.vlgmr.msrb.gmra.mxu2 %v2047_v17  ;;  %2096 = vmatmul.bf16.vlgmr.msrb.gmra.mxu3 %v2047_v17  ;;  %v7757_v17 = vld [vmem:[#allocation49_spill] sm:$0xff] }
 0x2f3   :  { %2312 = vmatpush.bf16.msra.mxu0 %v5635_v57  ;;  %2325 = vmatpush.bf16.msra.mxu1 %v5639_v60 }
 0x2f4   :  { %2338 = vmatpush.bf16.msra.mxu2 %v5641_v61  ;;  %2351 = vmatpush.bf16.msra.mxu3 %v5644_v2 }
 0x2f7   :  { %2313 = vmatpush.bf16.msra.mxu0 %v5647_v6  ;;  %2326 = vmatpush.bf16.msra.mxu1 %v5651_v7 }
 0x2f8   :  { %2339 = vmatpush.bf16.msra.mxu2 %v5653_v8  ;;  %2352 = vmatpush.bf16.msra.mxu3 %v5656_v15 }
 0x2fb   :  { %2314 = vmatpush.bf16.msra.mxu0 %v5659_v25  ;;  %2327 = vmatpush.bf16.msra.mxu1 %v5663_v29 }
 0x2fc   :  { %2340 = vmatpush.bf16.msra.mxu2 %v5665_v30  ;;  %2353 = vmatpush.bf16.msra.mxu3 %v5668_v37 }
 0x2ff   :  { %2315 = vmatpush.bf16.msra.mxu0 %v5671_v1  ;;  %2328 = vmatpush.bf16.msra.mxu1 %v5675_v52 }
 0x300   :  { %2341 = vmatpush.bf16.msra.mxu2 %v7728_v3  ;;  %2354 = vmatpush.bf16.msra.mxu3 %v7729_v20 }
 0x303   :  { %2364 = vmatpush.bf16.msrb.mxu0 %v7730_v42  ;;  %2377 = vmatpush.bf16.msrb.mxu1 %v7731_v54 }
 0x304   :  { %2390 = vmatpush.bf16.msrb.mxu2 %v7732_v49  ;;  %2403 = vmatpush.bf16.msrb.mxu3 %v7733_v63 }
 0x307   :  { %2365 = vmatpush.bf16.msrb.mxu0 %v7734_v19  ;;  %2378 = vmatpush.bf16.msrb.mxu1 %v7735_v44 }
 0x308   :  { %2391 = vmatpush.bf16.msrb.mxu2 %v7736_v32  ;;  %2404 = vmatpush.bf16.msrb.mxu3 %v7737_v4 }
 0x30b   :  { %2366 = vmatpush.bf16.msrb.mxu0 %v7738_v13  ;;  %2379 = vmatpush.bf16.msrb.mxu1 %v7739_v58 }
 0x30c   :  { %2392 = vmatpush.bf16.msrb.mxu2 %v7740_v9  ;;  %2405 = vmatpush.bf16.msrb.mxu3 %v7741_v14 }
 0x30f   :  { %2367 = vmatpush.bf16.msrb.mxu0 %v7742_v55  ;;  %2380 = vmatpush.bf16.msrb.mxu1 %v7743_v48 }
 0x310   :  { %2393 = vmatpush.bf16.msrb.mxu2 %v7744_v38  ;;  %2406 = vmatpush.bf16.msrb.mxu3 %v7745_v50 }
 0x313   :  { %2368 = vmatpush.bf16.msrb.mxu0 %v7746_v59  ;;  %2381 = vmatpush.bf16.msrb.mxu1 %v7747_v0  ;;  %v7758_v0 = vld [vmem:[#allocation50_spill] sm:$0xff] }
 0x314   :  { %2394 = vmatpush.bf16.msrb.mxu2 %v7748_v39  ;;  %2407 = vmatpush.bf16.msrb.mxu3 %v7749_v33  ;;  %v7759_v39 = vld [vmem:[#allocation51_spill] sm:$0xff]  ;;  %v7760_v33 = vld [vmem:[#allocation52_spill] sm:$0xff] }
 0x317   :  { %2369 = vmatpush.bf16.msrb.mxu0 %v7750_v18  ;;  %2382 = vmatpush.bf16.msrb.mxu1 %v7751_v56  ;;  %v7761_v18 = vld [vmem:[#allocation53_spill] sm:$0xff] }
 0x318   :  { %2395 = vmatpush.bf16.msrb.mxu2 %v7752_v21  ;;  %2408 = vmatpush.bf16.msrb.mxu3 %v7753_v62  ;;  %v1971_v56 = vld [vmem:[#allocation2 + $0x3] ss:$8 sm:$0xf] }
 0x319   :  { %v1975_v21 = vperm.slane %v1971_v56, 0  ;;  %v1976_v59 = vperm.slane %v1971_v56, 1 }
 0x31b   :  { %2370 = vmatpush.bf16.msrb.mxu0 %v7754_v53  ;;  %2383 = vmatpush.bf16.msrb.mxu1 %v7755_v26 }
 0x31c   :  { %2396 = vmatpush.bf16.msrb.mxu2 %v7756_v31  ;;  %2409 = vmatpush.bf16.msrb.mxu3 %v7757_v17  ;;  %v1977_v17 = vperm.slane %v1971_v56, 2  ;;  %v1978_v31 = vperm.slane %v1971_v56, 3 }
 0x31f   :  { %2371 = vmatpush.bf16.msrb.mxu0 %v7758_v0  ;;  %2384 = vmatpush.bf16.msrb.mxu1 %v7759_v39 }
 0x320   :  { %2397 = vmatpush.bf16.msrb.mxu2 %v7760_v33  ;;  %2410 = vmatpush.bf16.msrb.mxu3 %v7761_v18 }
 0x35e   :  { %v2002_v62 = vpop.f32.mrf.mxu0  ;;  %v2015_v50 = vpop.f32.mrf.mxu1 }
 0x35f   :  { %v2101_v53 = vadd.f32 %v2002_v62, %v1975_v21  ;;  %v2102_v38 = vadd.f32 %v2015_v50, %v1976_v59  ;;  %v1973_v50 = vld [vmem:[#allocation2 + $0x24] ss:$8 sm:$0xf] }
 0x361   :  { %v4588_v26 = vmul.f32 -1.442695, %v2101_v53  ;;  %v4589_v48 = vmul.f32 -1.442695, %v2102_v38 }
 0x363   :  { %5095 = vpow2.f32 %v4588_v26 }
 0x364   :  { %5097 = vpow2.f32 %v4589_v48 }
 0x365   :  { %v2028_v0 = vpop.f32.mrf.mxu2  ;;  %v2041_v55 = vpop.f32.mrf.mxu3 }
 0x366   :  { %v2103_v39 = vadd.f32 %v2028_v0, %v1977_v17  ;;  %v2104_v14 = vadd.f32 %v2041_v55, %v1978_v31  ;;  %v2004_v33 = vpop.f32.mrf.mxu0  ;;  %v2017_v9 = vpop.f32.mrf.mxu1  ;;  %v1984_v55 = vperm.slane %v1973_v50, 0  ;;  %v1986_v17 = vperm.slane %v1973_v50, 2 }
 0x367   :  { %v1985_v9 = vperm.slane %v1973_v50, 1 }
 0x368   :  { %v4590_v18 = vmul.f32 -1.442695, %v2103_v39  ;;  %v4591_v58 = vmul.f32 -1.442695, %v2104_v14 }
 0x369   :  { %v5096_v13 = vpop.eup %5095 }
 0x36a   :  { %v5098_v4 = vpop.eup %5097  ;;  %v6506_v32 = vadd.f32 1.0, %v5096_v13  ;;  %5099 = vpow2.f32 %v4590_v18 }
 0x36b   :  { %v6508_v59 = vadd.f32 1.0, %v5098_v4  ;;  %5101 = vpow2.f32 %v4591_v58 }
 0x36c   :  { %5103 = vrcp.f32 %v6506_v32  ;;  %vm2146_vm12 = vweird.f32 %v6506_v32 }
 0x36d   :  { %5105 = vrcp.f32 %v6508_v59  ;;  %v2030_v48 = vpop.f32.mrf.mxu2  ;;  %v2043_v38 = vpop.f32.mrf.mxu3  ;;  %vm2161_vm3 = vweird.f32 %v6508_v59 }
 0x36e   :  { %v2058_v0 = vpop.f32.mrf.mxu0  ;;  %v2071_v39 = vpop.f32.mrf.mxu1 }
 0x36f   :  { %v2105_v14 = vadd.f32 %v2058_v0, %v1984_v55  ;;  %v2106_v56 = vadd.f32 %v2071_v39, %v1985_v9  ;;  %v1987_v0 = vperm.slane %v1973_v50, 3  ;;  %v2165_v50 = vand.u32 2147483647, %v6508_v59 }
 0x370   :  { %v5100_v33 = vpop.eup %5099 }
 0x371   :  { %v5102_v13 = vpop.eup %5101  ;;  %v6512_v21 = vadd.f32 1.0, %v5100_v33  ;;  %v4592_v62 = vmul.f32 -1.442695, %v2105_v14  ;;  %v4593_v31 = vmul.f32 -1.442695, %v2106_v56 }
 0x372   :  { %v6514_v18 = vpop.eup %5103  ;;  %v6516_v4 = vadd.f32 1.0, %v5102_v13 }
 0x373   :  { %v6518_v58 = vpop.eup %5105  ;;  %5107 = vrcp.f32 %v6512_v21  ;;  %v2142_v53 = vmul.f32 %v6514_v18, %v6506_v32  ;;  %vm2147_vm9 = vweird.f32 %v6514_v18  ;;  %vm2176_vm11 = vweird.f32 %v6512_v21 }
 0x374   :  { %v2157_v26 = vmul.f32 %v6518_v58, %v6508_v59  ;;  %5109 = vrcp.f32 %v6516_v4  ;;  %vm2162_vm6 = vweird.f32 %v6518_v58  ;;  %vm6565_vm0 = vmor %vm2146_vm12, %vm2147_vm9  ;;  %vm2191_vm9 = vweird.f32 %v6516_v4 }
 0x375   :  { %v2084_v48 = vpop.f32.mrf.mxu2  ;;  %v2097_v38 = vpop.f32.mrf.mxu3  ;;  %5111 = vpow2.f32 %v4592_v62  ;;  %v2143_v13 = vsub.f32 1.0, %v2142_v53  ;;  %vm6550_vm8 = vmor %vm2161_vm3, %vm2162_vm6  ;;  %vm2166_vm3 = vcmp.eq.f32.partialorder %v2165_v50, 8.507059e+37  ;;  %v7766_v50 = vld [vmem:[#allocation54_spill] sm:$0xff]  ;;  %vm2275_vm12 = vcmp.eq.s32.totalorder %v6140_v41, 3 }
 0x376   :  { %v2158_v55 = vsub.f32 1.0, %v2157_v26  ;;  %v2060_v9 = vpop.f32.mrf.mxu0  ;;  %v2073_v39 = vpop.f32.mrf.mxu1  ;;  %v2107_v33 = vadd.f32 %v2084_v48, %v1986_v17  ;;  %5113 = vpow2.f32 %v4593_v31  ;;  %v2108_v14 = vadd.f32 %v2097_v38, %v1987_v0 }
 0x377   :  { %v2144_v26 = vmul.f32 %v6514_v18, %v2143_v13  ;;  %v2180_v31 = vand.u32 2147483647, %v6512_v21  ;;  %v2182_v17 = vand.u32 2147483648, %v6512_v21  ;;  %v2167_v39 = vand.u32 2147483648, %v6508_v59 }
 0x378   :  { %v4594_v19 = vmul.f32 -1.442695, %v2107_v33  ;;  %v2159_v63 = vmul.f32 %v6518_v58, %v2158_v55  ;;  %v4595_v49 = vmul.f32 -1.442695, %v2108_v14  ;;  %v2150_v59 = vand.u32 2147483647, %v6506_v32 }
 0x379   :  { %v5108_v44 = vpop.eup %5107  ;;  %vm2181_vm15 = vcmp.eq.f32.partialorder %v2180_v31, 8.507059e+37 }
 0x37a   :  { %v2172_v56 = vmul.f32 %v5108_v44, %v6512_v21  ;;  %5115 = vpow2.f32 %v4594_v19  ;;  %v6528_v54 = vpop.eup %5109  ;;  %v2160_v55 = vadd.f32 %v6518_v58, %v2159_v63  ;;  %vm2177_vm7 = vweird.f32 %v5108_v44 }
 0x37b   :  { %v5112_v53 = vpop.eup %5111  ;;  %5117 = vpow2.f32 %v4595_v49  ;;  %v2187_v33 = vmul.f32 %v6528_v54, %v6516_v4  ;;  %v2145_v49 = vadd.f32 %v6514_v18, %v2144_v26  ;;  %vm2178_vm14 = vmor %vm2176_vm11, %vm2177_vm7  ;;  %v2183_v26 = vor.u32 1.1754944e-38, %v2182_v17 }
 0x37c   :  { %v2173_v62 = vsub.f32 1.0, %v2172_v56  ;;  %v5114_v19 = vpop.eup %5113  ;;  %v6537_v9 = vadd.f32 1.0, %v5112_v53  ;;  %v2164_v53 = vsel %vm6550_vm8, %v6518_v58, %v2160_v55  ;;  %vm2151_vm6 = vcmp.eq.f32.partialorder %v2150_v59, 8.507059e+37 }
 0x37d   :  { %v2086_v48 = vpop.f32.mrf.mxu2  ;;  %v2099_v38 = vpop.f32.mrf.mxu3  ;;  %v6543_v13 = vadd.f32 1.0, %v5114_v19  ;;  %v2168_v19 = vor.u32 1.1754944e-38, %v2167_v39  ;;  %v2188_v17 = vsub.f32 1.0, %v2187_v33  ;;  %v2197_v59 = vand.u32 2147483648, %v6516_v4 }
 0x37e   :  { %v2174_v0 = vmul.f32 %v5108_v44, %v2173_v62  ;;  %5119 = vrcp.f32 %v6537_v9  ;;  %v2152_v62 = vand.u32 2147483648, %v6506_v32  ;;  %v2149_v32 = vsel %vm6565_vm0, %v6514_v18, %v2145_v49 }
 0x37f   :  { %5121 = vrcp.f32 %v6543_v13  ;;  %v2169_v55 = vsel %vm2166_vm3, %v2168_v19, %v2164_v53  ;;  %v2195_v53 = vand.u32 2147483647, %v6516_v4  ;;  %vm2192_vm7 = vweird.f32 %v6528_v54 }
 0x380   :  { %v2175_v14 = vadd.f32 %v5108_v44, %v2174_v0  ;;  %v5116_v56 = vpop.eup %5115  ;;  %v2153_v31 = vor.u32 1.1754944e-38, %v2152_v62  ;;  %v2265_v49 = vmul.f32 %v2169_v55, %v7766_v50  ;;  %vm6604_vm11 = vmor %vm2191_vm9, %vm2192_vm7  ;;  %vm2206_vm9 = vweird.f32 %v6537_v9 }
 0x381   :  { %v5118_v21 = vpop.eup %5117  ;;  %v6569_v42 = vadd.f32 1.0, %v5116_v56  ;;  %v2189_v56 = vmul.f32 %v6528_v54, %v2188_v17  ;;  %vm6598_vm8 = vcmp.eq.f32.partialorder %v2195_v53, 8.507059e+37  ;;  %v2227_v53 = vand.u32 2147483648, %v6543_v13 }
 0x382   :  { %v2179_v48 = vsel %vm2178_vm14, %v5108_v44, %v2175_v14  ;;  %v6574_v44 = vadd.f32 1.0, %v5118_v21  ;;  %v2154_v33 = vsel %vm2151_vm6, %v2153_v31, %v2149_v32  ;;  %vm2221_vm14 = vweird.f32 %v6543_v13 }
 0x383   :  { %v2184_v0 = vsel %vm2181_vm15, %v2183_v26, %v2179_v48  ;;  %5123 = vrcp.f32 %v6569_v42  ;;  %v2242_v4 = vand.u32 2147483648, %v6569_v42  ;;  %vm2236_vm3 = vweird.f32 %v6569_v42 }
 0x384   :  { %v2261_v58 = vmul.f32 2.0, %v2184_v0  ;;  %v6577_v63 = vpop.eup %5119  ;;  %5125 = vrcp.f32 %v6574_v44  ;;  %v2190_v0 = vadd.f32 %v6528_v54, %v2189_v56 }
 0x385   :  { %v6579_v14 = vpop.eup %5121  ;;  %v2202_v18 = vmul.f32 %v6577_v63, %v6537_v9  ;;  %vm2207_vm6 = vweird.f32 %v6577_v63 }
 0x386   :  { %v4596_v39 = vadd.f32 -1.0, %v2261_v58  ;;  %v2217_v62 = vmul.f32 %v6579_v14, %v6543_v13  ;;  %vm2222_vm15 = vweird.f32 %v6579_v14 }
 0x387   :  { %v2203_v48 = vsub.f32 1.0, %v2202_v18  ;;  %v2194_v18 = vsel %vm6604_vm11, %v6528_v54, %v2190_v0  ;;  %vm6627_vm7 = vmor %vm2221_vm14, %vm2222_vm15 }
 0x388   :  { %v2267_v26 = vmul.f32 %v4596_v39, %v2154_v33  ;;  %v2218_v21 = vsub.f32 1.0, %v2217_v62  ;;  %v2198_v39 = vor.u32 1.1754944e-38, %v2197_v59  ;;  %v2225_v62 = vand.u32 2147483647, %v6543_v13  ;;  %vm2208_vm15 = vmor %vm2206_vm9, %vm2207_vm6 }
 0x389   :  { %v5124_v19 = vpop.eup %5123  ;;  %v2204_v33 = vmul.f32 %v6577_v63, %v2203_v48  ;;  %vm2251_vm6 = vweird.f32 %v6574_v44 }
 0x38a   :  { %v6590_v38 = vadd.f32 %v2267_v26, %v2265_v49  ;;  %v2219_v17 = vmul.f32 %v6579_v14, %v2218_v21  ;;  %v2232_v32 = vmul.f32 %v5124_v19, %v6569_v42  ;;  %v6602_v31 = vpop.eup %5125  ;;  %vm2237_vm0 = vweird.f32 %v5124_v19 }
 0x38b   :  { %v2240_v26 = vand.u32 2147483647, %v6569_v42  ;;  %v2247_v59 = vmul.f32 %v6602_v31, %v6574_v44  ;;  %v2205_v21 = vadd.f32 %v6577_v63, %v2204_v33  ;;  %v2212_v42 = vand.u32 2147483648, %v6537_v9  ;;  %vm2238_vm11 = vmor %vm2236_vm3, %vm2237_vm0 }
 0x38c   :  { %7767 = vst [vmem:[#allocation54_spill] sm:$0xff] %v6590_v38  ;;  %5127 = vtanh.f32 %v6590_v38  ;;  %v2233_v56 = vsub.f32 1.0, %v2232_v32  ;;  %v2220_v50 = vadd.f32 %v6579_v14, %v2219_v17  ;;  %v2199_v17 = vsel %vm6598_vm8, %v2198_v39, %v2194_v18 }
 0x38d   :  { %v2243_v32 = vor.u32 1.1754944e-38, %v2242_v4  ;;  %v2210_v33 = vand.u32 2147483647, %v6537_v9  ;;  %vm2241_vm14 = vcmp.eq.f32.partialorder %v2240_v26, 8.507059e+37  ;;  %v2248_v58 = vsub.f32 1.0, %v2247_v59 }
 0x38e   :  { %v2234_v49 = vmul.f32 %v5124_v19, %v2233_v56  ;;  %v2224_v13 = vsel %vm6627_vm7, %v6579_v14, %v2220_v50  ;;  %v2209_v18 = vsel %vm2208_vm15, %v6577_v63, %v2205_v21  ;;  %vm2226_vm8 = vcmp.eq.f32.partialorder %v2225_v62, 8.507059e+37 }
 0x38f   :  { %v2213_v3 = vor.u32 1.1754944e-38, %v2212_v42  ;;  %vm2211_vm0 = vcmp.eq.f32.partialorder %v2210_v33, 8.507059e+37  ;;  %v2249_v50 = vmul.f32 %v6602_v31, %v2248_v58  ;;  %vm2252_vm3 = vweird.f32 %v6602_v31  ;;  %v7776_v42 = vld [vmem:[#allocation22_spill] sm:$0xff]  ;;  %v7779_v33 = vld [vmem:[#allocation25_spill] sm:$0xff] }
 0x390   :  { %v2235_v0 = vadd.f32 %v5124_v19, %v2234_v49  ;;  %v2228_v49 = vor.u32 1.1754944e-38, %v2227_v53  ;;  %vm2253_vm7 = vmor %vm2251_vm6, %vm2252_vm3  ;;  %v7783_v58 = vld [vmem:[#allocation29_spill] sm:$0xff] }
 0x391   :  { %v2250_v63 = vadd.f32 %v6602_v31, %v2249_v50  ;;  %v7789_v50 = vld [vmem:[#allocation35_spill] sm:$0xff] }
 0x392   :  { %v5128_v48 = vpop.eup %5127  ;;  %v2239_v56 = vsel %vm2238_vm11, %v5124_v19, %v2235_v0  ;;  %v2229_v4 = vsel %vm2226_vm8, %v2228_v49, %v2224_v13  ;;  %v2214_v19 = vsel %vm2211_vm0, %v2213_v3, %v2209_v18  ;;  %vm2280_vm11 = vcmp.eq.s32.totalorder %v6140_v41, 4  ;;  %v7780_v13 = vld [vmem:[#allocation26_spill] sm:$0xff]  ;;  %v7782_v49 = vld [vmem:[#allocation28_spill] sm:$0xff]  ;;  %v7785_v18 = vld [vmem:[#allocation31_spill] sm:$0xff] }
 0x393   :  { %v2273_v55 = vmul.f32 %v5128_v48, %v2199_v17  ;;  %v2244_v38 = vsel %vm2241_vm14, %v2243_v32, %v2239_v56  ;;  %v2266_v26 = vmul.f32 %v2229_v4, %v6427_v5  ;;  %v2254_v3 = vsel %vm2253_vm7, %v6602_v31, %v2250_v63  ;;  %v7774_v31 = vld [vmem:[#allocation20_spill] sm:$0xff]  ;;  %v7775_v17 = vld [vmem:[#allocation21_spill] sm:$0xff]  ;;  %v7777_v32 = vld [vmem:[#allocation23_spill] sm:$0xff] }
 0x394   :  { %v2262_v20 = vmul.f32 2.0, %v2244_v38  ;;  %v2257_v38 = vand.u32 2147483648, %v6574_v44  ;;  %v7781_v56 = vld [vmem:[#allocation27_spill] sm:$0xff]  ;;  %v7786_v4 = vld [vmem:[#allocation32_spill] sm:$0xff]  ;;  %v7792_v63 = vld [vmem:[#allocation38_spill] sm:$0xff] }
 0x395   :  { %v2278_v39 = vperm.slane %v2273_v55, 0 }
 0x396   :  { %v4597_v14 = vadd.f32 -1.0, %v2262_v20  ;;  %v2258_v20 = vor.u32 1.1754944e-38, %v2257_v38  ;;  %v7793_v38 = vld [vmem:[#allocation39_spill] sm:$0xff] }
 0x397   :  { %v6643_v9 = vsel %vm2275_vm12, %v2278_v39, %v6423_v43  ;;  %v2255_v43 = vand.u32 2147483647, %v6574_v44  ;;  %v7784_v39 = vld [vmem:[#allocation30_spill] sm:$0xff] }
 0x398   :  { %v2268_v53 = vmul.f32 %v4597_v14, %v2214_v19  ;;  %v7787_v14 = vld [vmem:[#allocation33_spill] sm:$0xff]  ;;  %v7788_v19 = vld [vmem:[#allocation34_spill] sm:$0xff] }
 0x399   :  { %vm2256_vm9 = vcmp.eq.f32.partialorder %v2255_v43, 8.507059e+37  ;;  %v7794_v43 = vld [vmem:[#allocation40_spill] sm:$0xff] }
 0x39a   :  { %v6647_v59 = vadd.f32 %v2268_v53, %v2266_v26  ;;  %v2259_v62 = vsel %vm2256_vm9, %v2258_v20, %v2254_v3  ;;  %v7790_v26 = vld [vmem:[#allocation36_spill] sm:$0xff]  ;;  %v7791_v53 = vld [vmem:[#allocation37_spill] sm:$0xff]  ;;  %v7796_v20 = vld [vmem:[#allocation42_spill] sm:$0xff] }
 0x39b   :  { %v7795_v3 = vld [vmem:[#allocation41_spill] sm:$0xff] }
 0x39c   :  { %5129 = vtanh.f32 %v6647_v59 }
 0x3a2   :  { %v5130_v5 = vpop.eup %5129 }
 0x3a3   :  { %v2274_v48 = vmul.f32 %v5130_v5, %v2259_v62  ;;  %v7797_v5 = vld [vmem:[#allocation43_spill] sm:$0xff]  ;;  %v7798_v62 = vld [vmem:[#allocation44_spill] sm:$0xff] }
 0x3a5   :  { %v2283_v21 = vperm.slane %v2274_v48, 0  ;;  %v2307_v54 = vpack.c.bf16 %v2274_v48, %v2273_v55  ;;  %v7778_v55 = vld [vmem:[#allocation24_spill] sm:$0xff]  ;;  %v7799_v48 = vld [vmem:[#allocation45_spill] sm:$0xff] }
 0x3a7   :  { %2316 = vmatmul.bf16.vlgmr.msra.gmra.mxu0 %v2307_v54  ;;  %2329 = vmatmul.bf16.vlgmr.msra.gmra.mxu1 %v2307_v54  ;;  %v6660_v0 = vsel %vm2280_vm11, %v2283_v21, %v6440_v27  ;;  %v2361_v27 = vunpack.c.h.b16 %v2307_v54  ;;  %v7800_v21 = vld [vmem:[#allocation46_spill] sm:$0xff] }
 0x3a8   :  { %2342 = vmatmul.bf16.vlgmr.msra.gmra.mxu2 %v2307_v54  ;;  %2355 = vmatmul.bf16.vlgmr.msra.gmra.mxu3 %v2307_v54  ;;  %v7801_v54 = vld [vmem:[#allocation47_spill] sm:$0xff] }
 0x3a9   :  { %2617 = vmatpush.bf16.msra.mxu0 %v5586_v10  ;;  %2630 = vmatpush.bf16.msra.mxu1 %v5588_v11  ;;  %v2362_v44 = vpack.c.b16 %v2361_v27, %v2361_v27  ;;  %v7802_v27 = vld [vmem:[#allocation48_spill] sm:$0xff] }
 0x3aa   :  { %2643 = vmatpush.bf16.msra.mxu2 %v5590_v12  ;;  %2656 = vmatpush.bf16.msra.mxu3 %v5592_v16 }
 0x3ad   :  { %2618 = vmatpush.bf16.msra.mxu0 %v5595_v22  ;;  %2631 = vmatpush.bf16.msra.mxu1 %v5599_v23 }
 0x3ae   :  { %2644 = vmatpush.bf16.msra.mxu2 %v5601_v24  ;;  %2657 = vmatpush.bf16.msra.mxu3 %v5604_v28 }
 0x3b1   :  { %2619 = vmatpush.bf16.msra.mxu0 %v5610_v34  ;;  %2632 = vmatpush.bf16.msra.mxu1 %v5615_v35 }
 0x3b2   :  { %2645 = vmatpush.bf16.msra.mxu2 %v5617_v36  ;;  %2658 = vmatpush.bf16.msra.mxu3 %v5620_v40 }
 0x3b5   :  { %2620 = vmatpush.bf16.msra.mxu0 %v5623_v45  ;;  %2633 = vmatpush.bf16.msra.mxu1 %v5627_v46 }
 0x3b6   :  { %2646 = vmatpush.bf16.msra.mxu2 %v5629_v47  ;;  %2659 = vmatpush.bf16.msra.mxu3 %v5632_v51 }
 0x3b7   :  { %2372 = vmatmul.bf16.vlgmr.msrb.gmra.mxu0 %v2362_v44  ;;  %2385 = vmatmul.bf16.vlgmr.msrb.gmra.mxu1 %v2362_v44 }
 0x3b8   :  { %2398 = vmatmul.bf16.vlgmr.msrb.gmra.mxu2 %v2362_v44  ;;  %2411 = vmatmul.bf16.vlgmr.msrb.gmra.mxu3 %v2362_v44  ;;  %v7803_v44 = vld [vmem:[#allocation49_spill] sm:$0xff] }
 0x3b9   :  { %2621 = vmatpush.bf16.msra.mxu0 %v5635_v57  ;;  %2634 = vmatpush.bf16.msra.mxu1 %v5639_v60 }
 0x3ba   :  { %2647 = vmatpush.bf16.msra.mxu2 %v5641_v61  ;;  %2660 = vmatpush.bf16.msra.mxu3 %v5644_v2 }
 0x3bd   :  { %2622 = vmatpush.bf16.msra.mxu0 %v5647_v6  ;;  %2635 = vmatpush.bf16.msra.mxu1 %v5651_v7 }
 0x3be   :  { %2648 = vmatpush.bf16.msra.mxu2 %v5653_v8  ;;  %2661 = vmatpush.bf16.msra.mxu3 %v5656_v15 }
 0x3c1   :  { %2623 = vmatpush.bf16.msra.mxu0 %v5659_v25  ;;  %2636 = vmatpush.bf16.msra.mxu1 %v5663_v29 }
 0x3c2   :  { %2649 = vmatpush.bf16.msra.mxu2 %v5665_v30  ;;  %2662 = vmatpush.bf16.msra.mxu3 %v5668_v37 }
 0x3c5   :  { %2624 = vmatpush.bf16.msra.mxu0 %v5671_v1  ;;  %2637 = vmatpush.bf16.msra.mxu1 %v5675_v52 }
 0x3c6   :  { %2650 = vmatpush.bf16.msra.mxu2 %v7774_v31  ;;  %2663 = vmatpush.bf16.msra.mxu3 %v7775_v17 }
 0x3c9   :  { %2673 = vmatpush.bf16.msrb.mxu0 %v7776_v42  ;;  %2686 = vmatpush.bf16.msrb.mxu1 %v7777_v32 }
 0x3ca   :  { %2699 = vmatpush.bf16.msrb.mxu2 %v7778_v55  ;;  %2712 = vmatpush.bf16.msrb.mxu3 %v7779_v33 }
 0x3cd   :  { %2674 = vmatpush.bf16.msrb.mxu0 %v7780_v13  ;;  %2687 = vmatpush.bf16.msrb.mxu1 %v7781_v56 }
 0x3ce   :  { %2700 = vmatpush.bf16.msrb.mxu2 %v7782_v49  ;;  %2713 = vmatpush.bf16.msrb.mxu3 %v7783_v58 }
 0x3d1   :  { %2675 = vmatpush.bf16.msrb.mxu0 %v7784_v39  ;;  %2688 = vmatpush.bf16.msrb.mxu1 %v7785_v18 }
 0x3d2   :  { %2701 = vmatpush.bf16.msrb.mxu2 %v7786_v4  ;;  %2714 = vmatpush.bf16.msrb.mxu3 %v7787_v14 }
 0x3d5   :  { %2676 = vmatpush.bf16.msrb.mxu0 %v7788_v19  ;;  %2689 = vmatpush.bf16.msrb.mxu1 %v7789_v50 }
 0x3d6   :  { %2702 = vmatpush.bf16.msrb.mxu2 %v7790_v26  ;;  %2715 = vmatpush.bf16.msrb.mxu3 %v7791_v53 }
 0x3d9   :  { %2677 = vmatpush.bf16.msrb.mxu0 %v7792_v63  ;;  %2690 = vmatpush.bf16.msrb.mxu1 %v7793_v38  ;;  %v7804_v38 = vld [vmem:[#allocation50_spill] sm:$0xff] }
 0x3da   :  { %2703 = vmatpush.bf16.msrb.mxu2 %v7794_v43  ;;  %2716 = vmatpush.bf16.msrb.mxu3 %v7795_v3  ;;  %v7805_v43 = vld [vmem:[#allocation51_spill] sm:$0xff]  ;;  %v7806_v3 = vld [vmem:[#allocation52_spill] sm:$0xff] }
 0x3dd   :  { %2678 = vmatpush.bf16.msrb.mxu0 %v7796_v20  ;;  %2691 = vmatpush.bf16.msrb.mxu1 %v7797_v5  ;;  %v7807_v20 = vld [vmem:[#allocation53_spill] sm:$0xff] }
 0x3de   :  { %2704 = vmatpush.bf16.msrb.mxu2 %v7798_v62  ;;  %2717 = vmatpush.bf16.msrb.mxu3 %v7799_v48  ;;  %v2286_v5 = vld [vmem:[#allocation2 + $0x4] ss:$8 sm:$0xf] }
 0x3df   :  { %v2290_v62 = vperm.slane %v2286_v5, 0  ;;  %v2291_v63 = vperm.slane %v2286_v5, 1 }
 0x3e1   :  { %2679 = vmatpush.bf16.msrb.mxu0 %v7800_v21  ;;  %2692 = vmatpush.bf16.msrb.mxu1 %v7801_v54 }
 0x3e2   :  { %2705 = vmatpush.bf16.msrb.mxu2 %v7802_v27  ;;  %2718 = vmatpush.bf16.msrb.mxu3 %v7803_v44  ;;  %v2292_v44 = vperm.slane %v2286_v5, 2  ;;  %v2293_v27 = vperm.slane %v2286_v5, 3 }
 0x3e5   :  { %2680 = vmatpush.bf16.msrb.mxu0 %v7804_v38  ;;  %2693 = vmatpush.bf16.msrb.mxu1 %v7805_v43 }
 0x3e6   :  { %2706 = vmatpush.bf16.msrb.mxu2 %v7806_v3  ;;  %2719 = vmatpush.bf16.msrb.mxu3 %v7807_v20 }
 0x424   :  { %v2317_v48 = vpop.f32.mrf.mxu0  ;;  %v2330_v53 = vpop.f32.mrf.mxu1 }
 0x425   :  { %v2416_v21 = vadd.f32 %v2317_v48, %v2290_v62  ;;  %v2417_v26 = vadd.f32 %v2330_v53, %v2291_v63  ;;  %v2288_v53 = vld [vmem:[#allocation2 + $0x23] ss:$8 sm:$0xf] }
 0x427   :  { %v4598_v54 = vmul.f32 -1.442695, %v2416_v21  ;;  %v4599_v50 = vmul.f32 -1.442695, %v2417_v26 }
 0x429   :  { %5131 = vpow2.f32 %v4598_v54 }
 0x42a   :  { %5133 = vpow2.f32 %v4599_v50 }
 0x42b   :  { %v2343_v38 = vpop.f32.mrf.mxu2  ;;  %v2356_v19 = vpop.f32.mrf.mxu3 }
 0x42c   :  { %v2418_v43 = vadd.f32 %v2343_v38, %v2292_v44  ;;  %v2419_v14 = vadd.f32 %v2356_v19, %v2293_v27  ;;  %v2319_v3 = vpop.f32.mrf.mxu0  ;;  %v2332_v4 = vpop.f32.mrf.mxu1  ;;  %v2299_v19 = vperm.slane %v2288_v53, 0  ;;  %v2301_v44 = vperm.slane %v2288_v53, 2 }
 0x42d   :  { %v2300_v4 = vperm.slane %v2288_v53, 1 }
 0x42e   :  { %v4600_v20 = vmul.f32 -1.442695, %v2418_v43  ;;  %v4601_v18 = vmul.f32 -1.442695, %v2419_v14 }
 0x42f   :  { %v5132_v39 = vpop.eup %5131 }
 0x430   :  { %v5134_v58 = vpop.eup %5133  ;;  %v6726_v49 = vadd.f32 1.0, %v5132_v39  ;;  %5135 = vpow2.f32 %v4600_v20 }
 0x431   :  { %v6728_v63 = vadd.f32 1.0, %v5134_v58  ;;  %5137 = vpow2.f32 %v4601_v18 }
 0x432   :  { %5139 = vrcp.f32 %v6726_v49  ;;  %vm2461_vm7 = vweird.f32 %v6726_v49 }
 0x433   :  { %5141 = vrcp.f32 %v6728_v63  ;;  %v2345_v50 = vpop.f32.mrf.mxu2  ;;  %v2358_v26 = vpop.f32.mrf.mxu3  ;;  %vm2476_vm14 = vweird.f32 %v6728_v63 }
 0x434   :  { %v2373_v38 = vpop.f32.mrf.mxu0  ;;  %v2386_v43 = vpop.f32.mrf.mxu1 }
 0x435   :  { %v2420_v14 = vadd.f32 %v2373_v38, %v2299_v19  ;;  %v2421_v5 = vadd.f32 %v2386_v43, %v2300_v4  ;;  %v2302_v38 = vperm.slane %v2288_v53, 3  ;;  %v2480_v53 = vand.u32 2147483647, %v6728_v63 }
 0x436   :  { %v5136_v3 = vpop.eup %5135 }
 0x437   :  { %v5138_v39 = vpop.eup %5137  ;;  %v6732_v62 = vadd.f32 1.0, %v5136_v3  ;;  %v4602_v48 = vmul.f32 -1.442695, %v2420_v14  ;;  %v4603_v27 = vmul.f32 -1.442695, %v2421_v5 }
 0x438   :  { %v6734_v20 = vpop.eup %5139  ;;  %v6736_v58 = vadd.f32 1.0, %v5138_v39 }
 0x439   :  { %v6738_v18 = vpop.eup %5141  ;;  %5143 = vrcp.f32 %v6732_v62  ;;  %v2457_v21 = vmul.f32 %v6734_v20, %v6726_v49  ;;  %vm2462_vm0 = vweird.f32 %v6734_v20  ;;  %vm2491_vm6 = vweird.f32 %v6732_v62 }
 0x43a   :  { %v2472_v54 = vmul.f32 %v6738_v18, %v6728_v63  ;;  %5145 = vrcp.f32 %v6736_v58  ;;  %vm2477_vm15 = vweird.f32 %v6738_v18 }
 0x43b   :  { %v2399_v50 = vpop.f32.mrf.mxu2  ;;  %v2412_v26 = vpop.f32.mrf.mxu3  ;;  %5147 = vpow2.f32 %v4602_v48  ;;  %v2458_v39 = vsub.f32 1.0, %v2457_v21  ;;  %vm6770_vm3 = vmor %vm2476_vm14, %vm2477_vm15 }
 0x43c   :  { %v2473_v19 = vsub.f32 1.0, %v2472_v54  ;;  %v2375_v4 = vpop.f32.mrf.mxu0  ;;  %v2388_v43 = vpop.f32.mrf.mxu1  ;;  %v2422_v3 = vadd.f32 %v2399_v50, %v2301_v44  ;;  %5149 = vpow2.f32 %v4603_v27  ;;  %v2423_v14 = vadd.f32 %v2412_v26, %v2302_v38  ;;  %vm6785_vm15 = vmor %vm2461_vm7, %vm2462_vm0 }
 0x43d   :  { %v2459_v54 = vmul.f32 %v6734_v20, %v2458_v39  ;;  %v2495_v27 = vand.u32 2147483647, %v6732_v62  ;;  %v2497_v44 = vand.u32 2147483648, %v6732_v62  ;;  %v2482_v43 = vand.u32 2147483648, %v6728_v63 }
 0x43e   :  { %v4604_v13 = vmul.f32 -1.442695, %v2422_v3  ;;  %v2474_v33 = vmul.f32 %v6738_v18, %v2473_v19  ;;  %v4605_v55 = vmul.f32 -1.442695, %v2423_v14  ;;  %v2465_v63 = vand.u32 2147483647, %v6726_v49 }
 0x43f   :  { %v5144_v56 = vpop.eup %5143  ;;  %vm2496_vm14 = vcmp.eq.f32.partialorder %v2495_v27, 8.507059e+37 }
 0x440   :  { %v2487_v5 = vmul.f32 %v5144_v56, %v6732_v62  ;;  %5151 = vpow2.f32 %v4604_v13  ;;  %v6748_v32 = vpop.eup %5145  ;;  %v2475_v19 = vadd.f32 %v6738_v18, %v2474_v33  ;;  %vm2492_vm8 = vweird.f32 %v5144_v56 }
 0x441   :  { %v5148_v21 = vpop.eup %5147  ;;  %5153 = vpow2.f32 %v4605_v55  ;;  %v2502_v3 = vmul.f32 %v6748_v32, %v6736_v58  ;;  %v2460_v55 = vadd.f32 %v6734_v20, %v2459_v54  ;;  %vm2493_vm9 = vmor %vm2491_vm6, %vm2492_vm8  ;;  %v2498_v54 = vor.u32 1.1754944e-38, %v2497_v44 }
 0x442   :  { %v2488_v48 = vsub.f32 1.0, %v2487_v5  ;;  %v5150_v13 = vpop.eup %5149  ;;  %v6757_v4 = vadd.f32 1.0, %v5148_v21  ;;  %v2479_v21 = vsel %vm6770_vm3, %v6738_v18, %v2475_v19  ;;  %vm2481_vm8 = vcmp.eq.f32.partialorder %v2480_v53, 8.507059e+37  ;;  %v7812_v53 = vld [vmem:[#allocation54_spill] sm:$0xff] }
 0x443   :  { %v2401_v50 = vpop.f32.mrf.mxu2  ;;  %v2414_v26 = vpop.f32.mrf.mxu3  ;;  %v6763_v39 = vadd.f32 1.0, %v5150_v13  ;;  %v2483_v13 = vor.u32 1.1754944e-38, %v2482_v43  ;;  %v2503_v44 = vsub.f32 1.0, %v2502_v3  ;;  %vm2466_vm0 = vcmp.eq.f32.partialorder %v2465_v63, 8.507059e+37 }
 0x444   :  { %v2489_v38 = vmul.f32 %v5144_v56, %v2488_v48  ;;  %5155 = vrcp.f32 %v6757_v4  ;;  %v2467_v48 = vand.u32 2147483648, %v6726_v49  ;;  %v2464_v49 = vsel %vm6785_vm15, %v6734_v20, %v2460_v55 }
 0x445   :  { %5157 = vrcp.f32 %v6763_v39  ;;  %v2484_v19 = vsel %vm2481_vm8, %v2483_v13, %v2479_v21  ;;  %v2510_v21 = vand.u32 2147483647, %v6736_v58  ;;  %v2512_v63 = vand.u32 2147483648, %v6736_v58 }
 0x446   :  { %v2490_v14 = vadd.f32 %v5144_v56, %v2489_v38  ;;  %v5152_v5 = vpop.eup %5151  ;;  %v2468_v27 = vor.u32 1.1754944e-38, %v2467_v48  ;;  %v2580_v55 = vmul.f32 %v2484_v19, %v7812_v53  ;;  %vm2507_vm3 = vweird.f32 %v6748_v32 }
 0x447   :  { %v5154_v62 = vpop.eup %5153  ;;  %v6789_v42 = vadd.f32 1.0, %v5152_v5  ;;  %v2504_v5 = vmul.f32 %v6748_v32, %v2503_v44  ;;  %vm2506_vm6 = vweird.f32 %v6736_v58 }
 0x448   :  { %v2494_v50 = vsel %vm2493_vm9, %v5144_v56, %v2490_v14  ;;  %v6794_v56 = vadd.f32 1.0, %v5154_v62  ;;  %v2469_v3 = vsel %vm2466_vm0, %v2468_v27, %v2464_v49  ;;  %vm6820_vm7 = vmor %vm2506_vm6, %vm2507_vm3  ;;  %vm6824_vm9 = vcmp.eq.f32.partialorder %v2510_v21, 8.507059e+37 }
 0x449   :  { %v2499_v38 = vsel %vm2496_vm14, %v2498_v54, %v2494_v50  ;;  %5159 = vrcp.f32 %v6789_v42  ;;  %vm2536_vm14 = vweird.f32 %v6763_v39  ;;  %v2557_v58 = vand.u32 2147483648, %v6789_v42 }
 0x44a   :  { %v2576_v18 = vmul.f32 2.0, %v2499_v38  ;;  %v6797_v33 = vpop.eup %5155  ;;  %5161 = vrcp.f32 %v6794_v56  ;;  %v2505_v38 = vadd.f32 %v6748_v32, %v2504_v5  ;;  %v2542_v21 = vand.u32 2147483648, %v6763_v39 }
 0x44b   :  { %v6799_v14 = vpop.eup %5157  ;;  %v2517_v20 = vmul.f32 %v6797_v33, %v6757_v4  ;;  %vm2551_vm0 = vweird.f32 %v6789_v42  ;;  %vm2522_vm3 = vweird.f32 %v6797_v33 }
 0x44c   :  { %v4606_v43 = vadd.f32 -1.0, %v2576_v18  ;;  %v2532_v48 = vmul.f32 %v6799_v14, %v6763_v39  ;;  %vm2537_vm15 = vweird.f32 %v6799_v14 }
 0x44d   :  { %v2518_v50 = vsub.f32 1.0, %v2517_v20  ;;  %v2509_v20 = vsel %vm6820_vm7, %v6748_v32, %v2505_v38  ;;  %vm6846_vm6 = vmor %vm2536_vm14, %vm2537_vm15  ;;  %vm2521_vm7 = vweird.f32 %v6757_v4 }
 0x44e   :  { %v2582_v54 = vmul.f32 %v4606_v43, %v2469_v3  ;;  %v2533_v62 = vsub.f32 1.0, %v2532_v48  ;;  %v2513_v43 = vor.u32 1.1754944e-38, %v2512_v63  ;;  %v2540_v48 = vand.u32 2147483647, %v6763_v39  ;;  %vm2523_vm15 = vmor %vm2521_vm7, %vm2522_vm3 }
 0x44f   :  { %v5160_v13 = vpop.eup %5159  ;;  %v2519_v3 = vmul.f32 %v6797_v33, %v2518_v50 }
 0x450   :  { %v6810_v26 = vadd.f32 %v2582_v54, %v2580_v55  ;;  %v2534_v44 = vmul.f32 %v6799_v14, %v2533_v62  ;;  %v2547_v49 = vmul.f32 %v5160_v13, %v6789_v42  ;;  %v6818_v18 = vpop.eup %5161  ;;  %vm2552_vm8 = vweird.f32 %v5160_v13 }
 0x451   :  { %v2555_v54 = vand.u32 2147483647, %v6789_v42  ;;  %v2562_v63 = vmul.f32 %v6818_v18, %v6794_v56  ;;  %v2520_v62 = vadd.f32 %v6797_v33, %v2519_v3  ;;  %v2527_v42 = vand.u32 2147483648, %v6757_v4  ;;  %vm2553_vm13 = vmor %vm2551_vm0, %vm2552_vm8 }
 0x452   :  { %7813 = vst [vmem:[#allocation54_spill] sm:$0xff] %v6810_v26  ;;  %5163 = vtanh.f32 %v6810_v26  ;;  %v2548_v5 = vsub.f32 1.0, %v2547_v49  ;;  %v2535_v53 = vadd.f32 %v6799_v14, %v2534_v44  ;;  %v2514_v44 = vsel %vm6824_vm9, %v2513_v43, %v2509_v20 }
 0x453   :  { %v2558_v49 = vor.u32 1.1754944e-38, %v2557_v58  ;;  %v2525_v3 = vand.u32 2147483647, %v6757_v4  ;;  %vm2556_vm14 = vcmp.eq.f32.partialorder %v2555_v54, 8.507059e+37  ;;  %v2563_v19 = vsub.f32 1.0, %v2562_v63 }
 0x454   :  { %v2549_v55 = vmul.f32 %v5160_v13, %v2548_v5  ;;  %v2539_v39 = vsel %vm6846_vm6, %v6799_v14, %v2535_v53  ;;  %v2524_v20 = vsel %vm2523_vm15, %v6797_v33, %v2520_v62  ;;  %vm2541_vm9 = vcmp.eq.f32.partialorder %v2540_v48, 8.507059e+37 }
 0x455   :  { %v2528_v31 = vor.u32 1.1754944e-38, %v2527_v42  ;;  %vm2526_vm8 = vcmp.eq.f32.partialorder %v2525_v3, 8.507059e+37  ;;  %v2564_v53 = vmul.f32 %v6818_v18, %v2563_v19  ;;  %v7822_v42 = vld [vmem:[#allocation22_spill] sm:$0xff]  ;;  %v7825_v3 = vld [vmem:[#allocation25_spill] sm:$0xff] }
 0x456   :  { %v2550_v38 = vadd.f32 %v5160_v13, %v2549_v55  ;;  %v2543_v55 = vor.u32 1.1754944e-38, %v2542_v21  ;;  %v7829_v19 = vld [vmem:[#allocation29_spill] sm:$0xff] }
 0x457   :  { %v2565_v33 = vadd.f32 %v6818_v18, %v2564_v53  ;;  %v7835_v53 = vld [vmem:[#allocation35_spill] sm:$0xff] }
 0x458   :  { %v5164_v50 = vpop.eup %5163  ;;  %v2554_v5 = vsel %vm2553_vm13, %v5160_v13, %v2550_v38  ;;  %v2544_v58 = vsel %vm2541_vm9, %v2543_v55, %v2539_v39  ;;  %v2529_v13 = vsel %vm2526_vm8, %v2528_v31, %v2524_v20  ;;  %vm2567_vm13 = vweird.f32 %v6818_v18  ;;  %v7826_v39 = vld [vmem:[#allocation26_spill] sm:$0xff]  ;;  %v7828_v55 = vld [vmem:[#allocation28_spill] sm:$0xff]  ;;  %v7831_v20 = vld [vmem:[#allocation31_spill] sm:$0xff] }
 0x459   :  { %v2588_v27 = vmul.f32 %v5164_v50, %v2514_v44  ;;  %v2559_v26 = vsel %vm2556_vm14, %v2558_v49, %v2554_v5  ;;  %v2581_v54 = vmul.f32 %v2544_v58, %v6647_v59  ;;  %v7821_v44 = vld [vmem:[#allocation21_spill] sm:$0xff]  ;;  %v7823_v49 = vld [vmem:[#allocation23_spill] sm:$0xff]  ;;  %v7832_v58 = vld [vmem:[#allocation32_spill] sm:$0xff] }
 0x45a   :  { %v2577_v17 = vmul.f32 2.0, %v2559_v26  ;;  %v2572_v26 = vand.u32 2147483648, %v6794_v56  ;;  %v7827_v5 = vld [vmem:[#allocation27_spill] sm:$0xff] }
 0x45b   :  { %v2590_v43 = vperm.slane %v2588_v27, 0 }
 0x45c   :  { %v4607_v14 = vadd.f32 -1.0, %v2577_v17  ;;  %v2573_v17 = vor.u32 1.1754944e-38, %v2572_v26  ;;  %v7839_v26 = vld [vmem:[#allocation39_spill] sm:$0xff] }
 0x45d   :  { %v6862_v4 = vsel %vm2280_vm11, %v2590_v43, %v6643_v9  ;;  %vm2566_vm11 = vweird.f32 %v6794_v56  ;;  %v2570_v9 = vand.u32 2147483647, %v6794_v56  ;;  %v7830_v43 = vld [vmem:[#allocation30_spill] sm:$0xff] }
 0x45e   :  { %v2583_v21 = vmul.f32 %v4607_v14, %v2529_v13  ;;  %vm2568_vm0 = vmor %vm2566_vm11, %vm2567_vm13  ;;  %v7833_v14 = vld [vmem:[#allocation33_spill] sm:$0xff]  ;;  %v7834_v13 = vld [vmem:[#allocation34_spill] sm:$0xff] }
 0x45f   :  { %v2569_v31 = vsel %vm2568_vm0, %v6818_v18, %v2565_v33  ;;  %vm2571_vm3 = vcmp.eq.f32.partialorder %v2570_v9, 8.507059e+37  ;;  %v7820_v18 = vld [vmem:[#allocation20_spill] sm:$0xff]  ;;  %v7838_v33 = vld [vmem:[#allocation38_spill] sm:$0xff] }
 0x460   :  { %v6866_v63 = vadd.f32 %v2583_v21, %v2581_v54  ;;  %v2574_v48 = vsel %vm2571_vm3, %v2573_v17, %v2569_v31  ;;  %v7836_v54 = vld [vmem:[#allocation36_spill] sm:$0xff]  ;;  %v7837_v21 = vld [vmem:[#allocation37_spill] sm:$0xff]  ;;  %v7842_v17 = vld [vmem:[#allocation42_spill] sm:$0xff] }
 0x461   :  { %v7840_v9 = vld [vmem:[#allocation40_spill] sm:$0xff]  ;;  %v7841_v31 = vld [vmem:[#allocation41_spill] sm:$0xff] }
 0x462   :  { %5165 = vtanh.f32 %v6866_v63 }
 0x468   :  { %v5166_v59 = vpop.eup %5165 }
 0x469   :  { %v2589_v50 = vmul.f32 %v5166_v59, %v2574_v48  ;;  %v7843_v59 = vld [vmem:[#allocation43_spill] sm:$0xff]  ;;  %v7844_v48 = vld [vmem:[#allocation44_spill] sm:$0xff] }
 0x46b   :  { %v2592_v62 = vperm.slane %v2589_v50, 0  ;;  %v2616_v32 = vpack.c.bf16 %v2589_v50, %v2588_v27  ;;  %v7824_v27 = vld [vmem:[#allocation24_spill] sm:$0xff]  ;;  %v7845_v50 = vld [vmem:[#allocation45_spill] sm:$0xff] }
 0x46d   :  { %2625 = vmatmul.bf16.vlgmr.msra.gmra.mxu0 %v2616_v32  ;;  %2638 = vmatmul.bf16.vlgmr.msra.gmra.mxu1 %v2616_v32  ;;  %v6878_v38 = vsel %vm2275_vm12, %v2592_v62, %v6660_v0  ;;  %v2670_v0 = vunpack.c.h.b16 %v2616_v32  ;;  %v7846_v62 = vld [vmem:[#allocation46_spill] sm:$0xff] }
 0x46e   :  { %2651 = vmatmul.bf16.vlgmr.msra.gmra.mxu2 %v2616_v32  ;;  %2664 = vmatmul.bf16.vlgmr.msra.gmra.mxu3 %v2616_v32  ;;  %v7847_v32 = vld [vmem:[#allocation47_spill] sm:$0xff] }
 0x46f   :  { %2926 = vmatpush.bf16.msra.mxu0 %v5586_v10  ;;  %2939 = vmatpush.bf16.msra.mxu1 %v5588_v11  ;;  %v2671_v56 = vpack.c.b16 %v2670_v0, %v2670_v0  ;;  %v7848_v0 = vld [vmem:[#allocation48_spill] sm:$0xff] }
 0x470   :  { %2952 = vmatpush.bf16.msra.mxu2 %v5590_v12  ;;  %2965 = vmatpush.bf16.msra.mxu3 %v5592_v16 }
 0x473   :  { %2927 = vmatpush.bf16.msra.mxu0 %v5595_v22  ;;  %2940 = vmatpush.bf16.msra.mxu1 %v5599_v23 }
 0x474   :  { %2953 = vmatpush.bf16.msra.mxu2 %v5601_v24  ;;  %2966 = vmatpush.bf16.msra.mxu3 %v5604_v28 }
 0x477   :  { %2928 = vmatpush.bf16.msra.mxu0 %v5610_v34  ;;  %2941 = vmatpush.bf16.msra.mxu1 %v5615_v35 }
 0x478   :  { %2954 = vmatpush.bf16.msra.mxu2 %v5617_v36  ;;  %2967 = vmatpush.bf16.msra.mxu3 %v5620_v40 }
 0x47b   :  { %2929 = vmatpush.bf16.msra.mxu0 %v5623_v45  ;;  %2942 = vmatpush.bf16.msra.mxu1 %v5627_v46 }
 0x47c   :  { %2955 = vmatpush.bf16.msra.mxu2 %v5629_v47  ;;  %2968 = vmatpush.bf16.msra.mxu3 %v5632_v51 }
 0x47d   :  { %2681 = vmatmul.bf16.vlgmr.msrb.gmra.mxu0 %v2671_v56  ;;  %2694 = vmatmul.bf16.vlgmr.msrb.gmra.mxu1 %v2671_v56 }
 0x47e   :  { %2707 = vmatmul.bf16.vlgmr.msrb.gmra.mxu2 %v2671_v56  ;;  %2720 = vmatmul.bf16.vlgmr.msrb.gmra.mxu3 %v2671_v56  ;;  %v7849_v56 = vld [vmem:[#allocation49_spill] sm:$0xff] }
 0x47f   :  { %2930 = vmatpush.bf16.msra.mxu0 %v5635_v57  ;;  %2943 = vmatpush.bf16.msra.mxu1 %v5639_v60 }
 0x480   :  { %2956 = vmatpush.bf16.msra.mxu2 %v5641_v61  ;;  %2969 = vmatpush.bf16.msra.mxu3 %v5644_v2 }
 0x483   :  { %2931 = vmatpush.bf16.msra.mxu0 %v5647_v6  ;;  %2944 = vmatpush.bf16.msra.mxu1 %v5651_v7 }
 0x484   :  { %2957 = vmatpush.bf16.msra.mxu2 %v5653_v8  ;;  %2970 = vmatpush.bf16.msra.mxu3 %v5656_v15 }
 0x487   :  { %2932 = vmatpush.bf16.msra.mxu0 %v5659_v25  ;;  %2945 = vmatpush.bf16.msra.mxu1 %v5663_v29 }
 0x488   :  { %2958 = vmatpush.bf16.msra.mxu2 %v5665_v30  ;;  %2971 = vmatpush.bf16.msra.mxu3 %v5668_v37 }
 0x48b   :  { %2933 = vmatpush.bf16.msra.mxu0 %v5671_v1  ;;  %2946 = vmatpush.bf16.msra.mxu1 %v5675_v52 }
 0x48c   :  { %2959 = vmatpush.bf16.msra.mxu2 %v7820_v18  ;;  %2972 = vmatpush.bf16.msra.mxu3 %v7821_v44 }
 0x48f   :  { %2982 = vmatpush.bf16.msrb.mxu0 %v7822_v42  ;;  %2995 = vmatpush.bf16.msrb.mxu1 %v7823_v49 }
 0x490   :  { %3008 = vmatpush.bf16.msrb.mxu2 %v7824_v27  ;;  %3021 = vmatpush.bf16.msrb.mxu3 %v7825_v3 }
 0x493   :  { %2983 = vmatpush.bf16.msrb.mxu0 %v7826_v39  ;;  %2996 = vmatpush.bf16.msrb.mxu1 %v7827_v5 }
 0x494   :  { %3009 = vmatpush.bf16.msrb.mxu2 %v7828_v55  ;;  %3022 = vmatpush.bf16.msrb.mxu3 %v7829_v19 }
 0x497   :  { %2984 = vmatpush.bf16.msrb.mxu0 %v7830_v43  ;;  %2997 = vmatpush.bf16.msrb.mxu1 %v7831_v20 }
 0x498   :  { %3010 = vmatpush.bf16.msrb.mxu2 %v7832_v58  ;;  %3023 = vmatpush.bf16.msrb.mxu3 %v7833_v14 }
 0x49b   :  { %2985 = vmatpush.bf16.msrb.mxu0 %v7834_v13  ;;  %2998 = vmatpush.bf16.msrb.mxu1 %v7835_v53 }
 0x49c   :  { %3011 = vmatpush.bf16.msrb.mxu2 %v7836_v54  ;;  %3024 = vmatpush.bf16.msrb.mxu3 %v7837_v21 }
 0x49f   :  { %2986 = vmatpush.bf16.msrb.mxu0 %v7838_v33  ;;  %2999 = vmatpush.bf16.msrb.mxu1 %v7839_v26  ;;  %v7850_v26 = vld [vmem:[#allocation50_spill] sm:$0xff] }
 0x4a0   :  { %3012 = vmatpush.bf16.msrb.mxu2 %v7840_v9  ;;  %3025 = vmatpush.bf16.msrb.mxu3 %v7841_v31  ;;  %v7851_v9 = vld [vmem:[#allocation51_spill] sm:$0xff]  ;;  %v7852_v31 = vld [vmem:[#allocation52_spill] sm:$0xff] }
 0x4a3   :  { %2987 = vmatpush.bf16.msrb.mxu0 %v7842_v17  ;;  %3000 = vmatpush.bf16.msrb.mxu1 %v7843_v59  ;;  %v7853_v17 = vld [vmem:[#allocation53_spill] sm:$0xff] }
 0x4a4   :  { %3013 = vmatpush.bf16.msrb.mxu2 %v7844_v48  ;;  %3026 = vmatpush.bf16.msrb.mxu3 %v7845_v50  ;;  %v2595_v59 = vld [vmem:[#allocation2 + $0x5] ss:$8 sm:$0xf] }
 0x4a5   :  { %v2599_v48 = vperm.slane %v2595_v59, 0  ;;  %v2600_v33 = vperm.slane %v2595_v59, 1 }
 0x4a7   :  { %2988 = vmatpush.bf16.msrb.mxu0 %v7846_v62  ;;  %3001 = vmatpush.bf16.msrb.mxu1 %v7847_v32 }
 0x4a8   :  { %3014 = vmatpush.bf16.msrb.mxu2 %v7848_v0  ;;  %3027 = vmatpush.bf16.msrb.mxu3 %v7849_v56  ;;  %v2601_v56 = vperm.slane %v2595_v59, 2  ;;  %v2602_v0 = vperm.slane %v2595_v59, 3 }
 0x4ab   :  { %2989 = vmatpush.bf16.msrb.mxu0 %v7850_v26  ;;  %3002 = vmatpush.bf16.msrb.mxu1 %v7851_v9 }
 0x4ac   :  { %3015 = vmatpush.bf16.msrb.mxu2 %v7852_v31  ;;  %3028 = vmatpush.bf16.msrb.mxu3 %v7853_v17 }
 0x4ea   :  { %v2626_v50 = vpop.f32.mrf.mxu0  ;;  %v2639_v21 = vpop.f32.mrf.mxu1 }
 0x4eb   :  { %v2725_v62 = vadd.f32 %v2626_v50, %v2599_v48  ;;  %v2726_v54 = vadd.f32 %v2639_v21, %v2600_v33  ;;  %v2597_v21 = vld [vmem:[#allocation2 + $0x22] ss:$8 sm:$0xf] }
 0x4ed   :  { %v4608_v32 = vmul.f32 -1.442695, %v2725_v62  ;;  %v4609_v53 = vmul.f32 -1.442695, %v2726_v54 }
 0x4ef   :  { %5167 = vpow2.f32 %v4608_v32 }
 0x4f0   :  { %5169 = vpow2.f32 %v4609_v53 }
 0x4f1   :  { %v2652_v26 = vpop.f32.mrf.mxu2  ;;  %v2665_v13 = vpop.f32.mrf.mxu3 }
 0x4f2   :  { %v2727_v9 = vadd.f32 %v2652_v26, %v2601_v56  ;;  %v2728_v14 = vadd.f32 %v2665_v13, %v2602_v0  ;;  %v2628_v31 = vpop.f32.mrf.mxu0  ;;  %v2641_v58 = vpop.f32.mrf.mxu1  ;;  %v2608_v13 = vperm.slane %v2597_v21, 0  ;;  %v2610_v56 = vperm.slane %v2597_v21, 2 }
 0x4f3   :  { %v2609_v58 = vperm.slane %v2597_v21, 1 }
 0x4f4   :  { %v4610_v17 = vmul.f32 -1.442695, %v2727_v9  ;;  %v4611_v20 = vmul.f32 -1.442695, %v2728_v14 }
 0x4f5   :  { %v5168_v43 = vpop.eup %5167 }
 0x4f6   :  { %v5170_v19 = vpop.eup %5169  ;;  %v6944_v55 = vadd.f32 1.0, %v5168_v43  ;;  %5171 = vpow2.f32 %v4610_v17 }
 0x4f7   :  { %v6946_v33 = vadd.f32 1.0, %v5170_v19  ;;  %5173 = vpow2.f32 %v4611_v20 }
 0x4f8   :  { %5175 = vrcp.f32 %v6944_v55  ;;  %vm2770_vm8 = vweird.f32 %v6944_v55 }
 0x4f9   :  { %5177 = vrcp.f32 %v6946_v33  ;;  %v2654_v53 = vpop.f32.mrf.mxu2  ;;  %v2667_v54 = vpop.f32.mrf.mxu3  ;;  %vm2785_vm12 = vweird.f32 %v6946_v33 }
 0x4fa   :  { %v2682_v26 = vpop.f32.mrf.mxu0  ;;  %v2695_v9 = vpop.f32.mrf.mxu1 }
 0x4fb   :  { %v2729_v14 = vadd.f32 %v2682_v26, %v2608_v13  ;;  %v2730_v59 = vadd.f32 %v2695_v9, %v2609_v58  ;;  %v2611_v26 = vperm.slane %v2597_v21, 3  ;;  %v2789_v21 = vand.u32 2147483647, %v6946_v33 }
 0x4fc   :  { %v5172_v31 = vpop.eup %5171 }
 0x4fd   :  { %v5174_v43 = vpop.eup %5173  ;;  %v6950_v48 = vadd.f32 1.0, %v5172_v31  ;;  %v4612_v50 = vmul.f32 -1.442695, %v2729_v14  ;;  %v4613_v0 = vmul.f32 -1.442695, %v2730_v59  ;;  %vm2790_vm3 = vcmp.eq.f32.partialorder %v2789_v21, 8.507059e+37 }
 0x4fe   :  { %v6952_v17 = vpop.eup %5175  ;;  %v6954_v19 = vadd.f32 1.0, %v5174_v43  ;;  %v7858_v21 = vld [vmem:[#allocation54_spill] sm:$0xff] }
 0x4ff   :  { %v6956_v20 = vpop.eup %5177  ;;  %5179 = vrcp.f32 %v6950_v48  ;;  %v2766_v62 = vmul.f32 %v6952_v17, %v6944_v55  ;;  %vm2771_vm14 = vweird.f32 %v6952_v17  ;;  %vm2800_vm9 = vweird.f32 %v6950_v48 }
 0x500   :  { %v2781_v32 = vmul.f32 %v6956_v20, %v6946_v33  ;;  %5181 = vrcp.f32 %v6954_v19  ;;  %vm2786_vm6 = vweird.f32 %v6956_v20  ;;  %vm7003_vm0 = vmor %vm2770_vm8, %vm2771_vm14 }
 0x501   :  { %v2708_v53 = vpop.f32.mrf.mxu2  ;;  %v2721_v54 = vpop.f32.mrf.mxu3  ;;  %5183 = vpow2.f32 %v4612_v50  ;;  %v2767_v43 = vsub.f32 1.0, %v2766_v62  ;;  %vm6988_vm15 = vmor %vm2785_vm12, %vm2786_vm6 }
 0x502   :  { %v2782_v13 = vsub.f32 1.0, %v2781_v32  ;;  %v2684_v58 = vpop.f32.mrf.mxu0  ;;  %v2697_v9 = vpop.f32.mrf.mxu1  ;;  %v2731_v31 = vadd.f32 %v2708_v53, %v2610_v56  ;;  %5185 = vpow2.f32 %v4613_v0  ;;  %v2732_v14 = vadd.f32 %v2721_v54, %v2611_v26 }
 0x503   :  { %v2768_v32 = vmul.f32 %v6952_v17, %v2767_v43  ;;  %v2804_v0 = vand.u32 2147483647, %v6950_v48  ;;  %v2806_v56 = vand.u32 2147483648, %v6950_v48  ;;  %v2791_v9 = vand.u32 2147483648, %v6946_v33 }
 0x504   :  { %v4614_v39 = vmul.f32 -1.442695, %v2731_v31  ;;  %v2783_v3 = vmul.f32 %v6956_v20, %v2782_v13  ;;  %v4615_v27 = vmul.f32 -1.442695, %v2732_v14  ;;  %v2774_v33 = vand.u32 2147483647, %v6944_v55 }
 0x505   :  { %v5180_v5 = vpop.eup %5179  ;;  %vm2805_vm11 = vcmp.eq.f32.partialorder %v2804_v0, 8.507059e+37 }
 0x506   :  { %v2796_v59 = vmul.f32 %v5180_v5, %v6950_v48  ;;  %5187 = vpow2.f32 %v4614_v39  ;;  %v6966_v49 = vpop.eup %5181  ;;  %v2784_v13 = vadd.f32 %v6956_v20, %v2783_v3  ;;  %vm2801_vm7 = vweird.f32 %v5180_v5 }
 0x507   :  { %v5184_v62 = vpop.eup %5183  ;;  %5189 = vpow2.f32 %v4615_v27  ;;  %v2811_v31 = vmul.f32 %v6966_v49, %v6954_v19  ;;  %v2769_v27 = vadd.f32 %v6952_v17, %v2768_v32  ;;  %vm2802_vm13 = vmor %vm2800_vm9, %vm2801_vm7  ;;  %v2807_v32 = vor.u32 1.1754944e-38, %v2806_v56 }
 0x508   :  { %v2797_v50 = vsub.f32 1.0, %v2796_v59  ;;  %v5186_v39 = vpop.eup %5185  ;;  %v6975_v58 = vadd.f32 1.0, %v5184_v62  ;;  %v2788_v62 = vsel %vm6988_vm15, %v6956_v20, %v2784_v13  ;;  %vm2775_vm12 = vcmp.eq.f32.partialorder %v2774_v33, 8.507059e+37 }
 0x509   :  { %v2710_v53 = vpop.f32.mrf.mxu2  ;;  %v2723_v54 = vpop.f32.mrf.mxu3  ;;  %v6981_v43 = vadd.f32 1.0, %v5186_v39  ;;  %v2792_v39 = vor.u32 1.1754944e-38, %v2791_v9  ;;  %v2812_v56 = vsub.f32 1.0, %v2811_v31  ;;  %v2821_v33 = vand.u32 2147483648, %v6954_v19 }
 0x50a   :  { %v2798_v26 = vmul.f32 %v5180_v5, %v2797_v50  ;;  %5191 = vrcp.f32 %v6975_v58  ;;  %v2776_v50 = vand.u32 2147483648, %v6944_v55  ;;  %v2773_v55 = vsel %vm7003_vm0, %v6952_v17, %v2769_v27 }
 0x50b   :  { %5193 = vrcp.f32 %v6981_v43  ;;  %v2793_v13 = vsel %vm2790_vm3, %v2792_v39, %v2788_v62  ;;  %v2819_v62 = vand.u32 2147483647, %v6954_v19  ;;  %vm2816_vm6 = vweird.f32 %v6966_v49 }
 0x50c   :  { %v2799_v14 = vadd.f32 %v5180_v5, %v2798_v26  ;;  %v5188_v59 = vpop.eup %5187  ;;  %v2777_v0 = vor.u32 1.1754944e-38, %v2776_v50  ;;  %v2889_v27 = vmul.f32 %v2793_v13, %v7858_v21  ;;  %vm2815_vm7 = vweird.f32 %v6954_v19 }
 0x50d   :  { %v5190_v48 = vpop.eup %5189  ;;  %v7007_v42 = vadd.f32 1.0, %v5188_v59  ;;  %v2813_v59 = vmul.f32 %v6966_v49, %v2812_v56  ;;  %vm7038_vm14 = vmor %vm2815_vm7, %vm2816_vm6  ;;  %vm7042_vm15 = vcmp.eq.f32.partialorder %v2819_v62, 8.507059e+37  ;;  %vm2845_vm9 = vweird.f32 %v6981_v43 }
 0x50e   :  { %v2803_v53 = vsel %vm2802_vm13, %v5180_v5, %v2799_v14  ;;  %v7012_v5 = vadd.f32 1.0, %v5190_v48  ;;  %v2778_v31 = vsel %vm2775_vm12, %v2777_v0, %v2773_v55  ;;  %v2851_v62 = vand.u32 2147483648, %v6981_v43 }
 0x50f   :  { %v2808_v26 = vsel %vm2805_vm11, %v2807_v32, %v2803_v53  ;;  %5195 = vrcp.f32 %v7007_v42  ;;  %v2866_v19 = vand.u32 2147483648, %v7007_v42  ;;  %vm2860_vm11 = vweird.f32 %v7007_v42 }
 0x510   :  { %v2885_v20 = vmul.f32 2.0, %v2808_v26  ;;  %v7015_v3 = vpop.eup %5191  ;;  %5197 = vrcp.f32 %v7012_v5  ;;  %v2814_v26 = vadd.f32 %v6966_v49, %v2813_v59  ;;  %vm2830_vm12 = vweird.f32 %v6975_v58 }
 0x511   :  { %v7017_v14 = vpop.eup %5193  ;;  %v2826_v17 = vmul.f32 %v7015_v3, %v6975_v58  ;;  %vm2831_vm0 = vweird.f32 %v7015_v3 }
 0x512   :  { %v4616_v9 = vadd.f32 -1.0, %v2885_v20  ;;  %v2841_v50 = vmul.f32 %v7017_v14, %v6981_v43  ;;  %vm2846_vm8 = vweird.f32 %v7017_v14 }
 0x513   :  { %v2827_v53 = vsub.f32 1.0, %v2826_v17  ;;  %v2818_v17 = vsel %vm7038_vm14, %v6966_v49, %v2814_v26  ;;  %vm7064_vm3 = vmor %vm2845_vm9, %vm2846_vm8 }
 0x514   :  { %v2891_v32 = vmul.f32 %v4616_v9, %v2778_v31  ;;  %v2842_v48 = vsub.f32 1.0, %v2841_v50  ;;  %v2822_v9 = vor.u32 1.1754944e-38, %v2821_v33  ;;  %v2849_v50 = vand.u32 2147483647, %v6981_v43  ;;  %vm2832_vm14 = vmor %vm2830_vm12, %vm2831_vm0 }
 0x515   :  { %v5196_v39 = vpop.eup %5195  ;;  %v2828_v31 = vmul.f32 %v7015_v3, %v2827_v53 }
 0x516   :  { %v7028_v54 = vadd.f32 %v2891_v32, %v2889_v27  ;;  %v2843_v56 = vmul.f32 %v7017_v14, %v2842_v48  ;;  %v2856_v55 = vmul.f32 %v5196_v39, %v7007_v42  ;;  %v7036_v20 = vpop.eup %5197  ;;  %vm2861_vm13 = vweird.f32 %v5196_v39 }
 0x517   :  { %v2864_v32 = vand.u32 2147483647, %v7007_v42  ;;  %v2871_v33 = vmul.f32 %v7036_v20, %v7012_v5  ;;  %v2829_v48 = vadd.f32 %v7015_v3, %v2828_v31  ;;  %v2836_v42 = vand.u32 2147483648, %v6975_v58  ;;  %vm2862_vm6 = vmor %vm2860_vm11, %vm2861_vm13 }
 0x518   :  { %7859 = vst [vmem:[#allocation54_spill] sm:$0xff] %v7028_v54  ;;  %5199 = vtanh.f32 %v7028_v54  ;;  %v2857_v59 = vsub.f32 1.0, %v2856_v55  ;;  %v2844_v21 = vadd.f32 %v7017_v14, %v2843_v56  ;;  %v2823_v56 = vsel %vm7042_vm15, %v2822_v9, %v2818_v17 }
 0x519   :  { %v2867_v55 = vor.u32 1.1754944e-38, %v2866_v19  ;;  %v2834_v31 = vand.u32 2147483647, %v6975_v58  ;;  %vm2865_vm7 = vcmp.eq.f32.partialorder %v2864_v32, 8.507059e+37  ;;  %v2872_v13 = vsub.f32 1.0, %v2871_v33 }
 0x51a   :  { %v2858_v27 = vmul.f32 %v5196_v39, %v2857_v59  ;;  %v2848_v43 = vsel %vm7064_vm3, %v7017_v14, %v2844_v21  ;;  %v2833_v17 = vsel %vm2832_vm14, %v7015_v3, %v2829_v48  ;;  %vm2850_vm15 = vcmp.eq.f32.partialorder %v2849_v50, 8.507059e+37 }
 0x51b   :  { %v2837_v18 = vor.u32 1.1754944e-38, %v2836_v42  ;;  %vm2835_vm9 = vcmp.eq.f32.partialorder %v2834_v31, 8.507059e+37  ;;  %v2873_v21 = vmul.f32 %v7036_v20, %v2872_v13  ;;  %vm2876_vm8 = vweird.f32 %v7036_v20  ;;  %v7898_v42 = vld [vmem:[#allocation52_spill] sm:$0xff] }
 0x51c   :  { %v2859_v26 = vadd.f32 %v5196_v39, %v2858_v27  ;;  %v2852_v27 = vor.u32 1.1754944e-38, %v2851_v62 }
 0x51d   :  { %v2874_v3 = vadd.f32 %v7036_v20, %v2873_v21 }
 0x51e   :  { %v5200_v53 = vpop.eup %5199  ;;  %v2863_v59 = vsel %vm2862_vm6, %v5196_v39, %v2859_v26  ;;  %v2853_v19 = vsel %vm2850_vm15, %v2852_v27, %v2848_v43  ;;  %v2838_v39 = vsel %vm2835_vm9, %v2837_v18, %v2833_v17 }
 0x51f   :  { %v2897_v0 = vmul.f32 %v5200_v53, %v2823_v56  ;;  %v2868_v54 = vsel %vm2865_vm7, %v2867_v55, %v2863_v59  ;;  %v2890_v32 = vmul.f32 %v2853_v19, %v6866_v63  ;;  %v7897_v56 = vld [vmem:[#allocation51_spill] sm:$0xff]  ;;  %v7899_v55 = vld [vmem:[#allocation53_spill] sm:$0xff] }
 0x520   :  { %v2886_v44 = vmul.f32 2.0, %v2868_v54  ;;  %v2881_v54 = vand.u32 2147483648, %v7012_v5 }
 0x521   :  { %v2899_v9 = vperm.slane %v2897_v0, 0 }
 0x522   :  { %v4617_v14 = vadd.f32 -1.0, %v2886_v44  ;;  %v2882_v44 = vor.u32 1.1754944e-38, %v2881_v54 }
 0x523   :  { %v7080_v58 = vsel %vm1965_vm2, %v2899_v9, %v6862_v4  ;;  %vm2875_vm2 = vweird.f32 %v7012_v5  ;;  %v2879_v4 = vand.u32 2147483647, %v7012_v5  ;;  %v7895_v5 = vld [vmem:[#allocation49_spill] sm:$0xff] }
 0x524   :  { %v2892_v62 = vmul.f32 %v4617_v14, %v2838_v39  ;;  %vm2877_vm13 = vmor %vm2875_vm2, %vm2876_vm8 }
 0x525   :  { %v2878_v18 = vsel %vm2877_vm13, %v7036_v20, %v2874_v3  ;;  %vm2880_vm11 = vcmp.eq.f32.partialorder %v2879_v4, 8.507059e+37  ;;  %v7896_v20 = vld [vmem:[#allocation50_spill] sm:$0xff] }
 0x526   :  { %v7084_v33 = vadd.f32 %v2892_v62, %v2890_v32  ;;  %v2883_v50 = vsel %vm2880_vm11, %v2882_v44, %v2878_v18 }
 0x528   :  { %5201 = vtanh.f32 %v7084_v33 }
 0x52e   :  { %v5202_v63 = vpop.eup %5201 }
 0x52f   :  { %v2898_v53 = vmul.f32 %v5202_v63, %v2883_v50 }
 0x531   :  { %v2901_v48 = vperm.slane %v2898_v53, 0  ;;  %v2925_v49 = vpack.c.bf16 %v2898_v53, %v2897_v0  ;;  %v2904_v0 = vld [vmem:[#allocation2 + $0x6] ss:$8 sm:$0xf] }
 0x532   :  { %v2908_v31 = vperm.slane %v2904_v0, 0  ;;  %v2909_v43 = vperm.slane %v2904_v0, 1  ;;  %v2910_v14 = vperm.slane %v2904_v0, 2  ;;  %v2911_v39 = vperm.slane %v2904_v0, 3 }
 0x533   :  { %2934 = vmatmul.bf16.vlgmr.msra.gmra.mxu0 %v2925_v49  ;;  %2947 = vmatmul.bf16.vlgmr.msra.gmra.mxu1 %v2925_v49  ;;  %v7096_v26 = vsel %vm1960_vm10, %v2901_v48, %v6878_v38  ;;  %v2979_v38 = vunpack.c.h.b16 %v2925_v49  ;;  %v2906_v48 = vld [vmem:[#allocation2 + $0x21] ss:$8 sm:$0xf] }
 0x534   :  { %2960 = vmatmul.bf16.vlgmr.msra.gmra.mxu2 %v2925_v49  ;;  %2973 = vmatmul.bf16.vlgmr.msra.gmra.mxu3 %v2925_v49 }
 0x535   :  { %3235 = vmatpush.bf16.msra.mxu0 %v5586_v10  ;;  %3248 = vmatpush.bf16.msra.mxu1 %v5588_v11  ;;  %v2980_v10 = vpack.c.b16 %v2979_v38, %v2979_v38  ;;  %v7866_v11 = vld [vmem:[#allocation20_spill] sm:$0xff] }
 0x536   :  { %3261 = vmatpush.bf16.msra.mxu2 %v5590_v12  ;;  %3274 = vmatpush.bf16.msra.mxu3 %v5592_v16  ;;  %v7867_v12 = vld [vmem:[#allocation21_spill] sm:$0xff]  ;;  %v7868_v16 = vld [vmem:[#allocation22_spill] sm:$0xff] }
 0x539   :  { %3236 = vmatpush.bf16.msra.mxu0 %v5595_v22  ;;  %3249 = vmatpush.bf16.msra.mxu1 %v5599_v23  ;;  %v7869_v22 = vld [vmem:[#allocation23_spill] sm:$0xff]  ;;  %v7870_v23 = vld [vmem:[#allocation24_spill] sm:$0xff] }
 0x53a   :  { %3262 = vmatpush.bf16.msra.mxu2 %v5601_v24  ;;  %3275 = vmatpush.bf16.msra.mxu3 %v5604_v28  ;;  %v7871_v24 = vld [vmem:[#allocation25_spill] sm:$0xff]  ;;  %v7872_v28 = vld [vmem:[#allocation26_spill] sm:$0xff] }
 0x53d   :  { %3237 = vmatpush.bf16.msra.mxu0 %v5610_v34  ;;  %3250 = vmatpush.bf16.msra.mxu1 %v5615_v35  ;;  %v7873_v34 = vld [vmem:[#allocation27_spill] sm:$0xff]  ;;  %v7874_v35 = vld [vmem:[#allocation28_spill] sm:$0xff] }
 0x53e   :  { %3263 = vmatpush.bf16.msra.mxu2 %v5617_v36  ;;  %3276 = vmatpush.bf16.msra.mxu3 %v5620_v40  ;;  %v7875_v36 = vld [vmem:[#allocation29_spill] sm:$0xff]  ;;  %v7876_v40 = vld [vmem:[#allocation30_spill] sm:$0xff] }
 0x541   :  { %3238 = vmatpush.bf16.msra.mxu0 %v5623_v45  ;;  %3251 = vmatpush.bf16.msra.mxu1 %v5627_v46  ;;  %v7877_v45 = vld [vmem:[#allocation31_spill] sm:$0xff]  ;;  %v7878_v46 = vld [vmem:[#allocation32_spill] sm:$0xff] }
 0x542   :  { %3264 = vmatpush.bf16.msra.mxu2 %v5629_v47  ;;  %3277 = vmatpush.bf16.msra.mxu3 %v5632_v51  ;;  %v7879_v47 = vld [vmem:[#allocation33_spill] sm:$0xff]  ;;  %v7880_v51 = vld [vmem:[#allocation34_spill] sm:$0xff] }
 0x543   :  { %2990 = vmatmul.bf16.vlgmr.msrb.gmra.mxu0 %v2980_v10  ;;  %3003 = vmatmul.bf16.vlgmr.msrb.gmra.mxu1 %v2980_v10 }
 0x544   :  { %3016 = vmatmul.bf16.vlgmr.msrb.gmra.mxu2 %v2980_v10  ;;  %3029 = vmatmul.bf16.vlgmr.msrb.gmra.mxu3 %v2980_v10 }
 0x545   :  { %3239 = vmatpush.bf16.msra.mxu0 %v5635_v57  ;;  %3252 = vmatpush.bf16.msra.mxu1 %v5639_v60  ;;  %v7881_v57 = vld [vmem:[#allocation35_spill] sm:$0xff]  ;;  %v7882_v60 = vld [vmem:[#allocation36_spill] sm:$0xff] }
 0x546   :  { %3265 = vmatpush.bf16.msra.mxu2 %v5641_v61  ;;  %3278 = vmatpush.bf16.msra.mxu3 %v5644_v2  ;;  %v7883_v61 = vld [vmem:[#allocation37_spill] sm:$0xff]  ;;  %v7884_v2 = vld [vmem:[#allocation38_spill] sm:$0xff] }
 0x549   :  { %3240 = vmatpush.bf16.msra.mxu0 %v5647_v6  ;;  %3253 = vmatpush.bf16.msra.mxu1 %v5651_v7  ;;  %v7885_v6 = vld [vmem:[#allocation39_spill] sm:$0xff]  ;;  %v7886_v7 = vld [vmem:[#allocation40_spill] sm:$0xff] }
 0x54a   :  { %3266 = vmatpush.bf16.msra.mxu2 %v5653_v8  ;;  %3279 = vmatpush.bf16.msra.mxu3 %v5656_v15  ;;  %v7887_v8 = vld [vmem:[#allocation41_spill] sm:$0xff]  ;;  %v7888_v15 = vld [vmem:[#allocation42_spill] sm:$0xff] }
 0x54d   :  { %3241 = vmatpush.bf16.msra.mxu0 %v5659_v25  ;;  %3254 = vmatpush.bf16.msra.mxu1 %v5663_v29  ;;  %v7889_v25 = vld [vmem:[#allocation43_spill] sm:$0xff]  ;;  %v7890_v29 = vld [vmem:[#allocation44_spill] sm:$0xff] }
 0x54e   :  { %3267 = vmatpush.bf16.msra.mxu2 %v5665_v30  ;;  %3280 = vmatpush.bf16.msra.mxu3 %v5668_v37  ;;  %v7891_v30 = vld [vmem:[#allocation45_spill] sm:$0xff]  ;;  %v7892_v37 = vld [vmem:[#allocation46_spill] sm:$0xff] }
 0x551   :  { %3242 = vmatpush.bf16.msra.mxu0 %v5671_v1  ;;  %3255 = vmatpush.bf16.msra.mxu1 %v5675_v52  ;;  %v7893_v1 = vld [vmem:[#allocation47_spill] sm:$0xff]  ;;  %v7894_v52 = vld [vmem:[#allocation48_spill] sm:$0xff] }
 0x552   :  { %3268 = vmatpush.bf16.msra.mxu2 %v7866_v11  ;;  %3281 = vmatpush.bf16.msra.mxu3 %v7867_v12  ;;  %v2917_v11 = vperm.slane %v2906_v48, 0 }
 0x555   :  { %3291 = vmatpush.bf16.msrb.mxu0 %v7868_v16  ;;  %3304 = vmatpush.bf16.msrb.mxu1 %v7869_v22  ;;  %v2918_v16 = vperm.slane %v2906_v48, 1 }
 0x556   :  { %3317 = vmatpush.bf16.msrb.mxu2 %v7870_v23  ;;  %3330 = vmatpush.bf16.msrb.mxu3 %v7871_v24 }
 0x559   :  { %3292 = vmatpush.bf16.msrb.mxu0 %v7872_v28  ;;  %3305 = vmatpush.bf16.msrb.mxu1 %v7873_v34 }
 0x55a   :  { %3318 = vmatpush.bf16.msrb.mxu2 %v7874_v35  ;;  %3331 = vmatpush.bf16.msrb.mxu3 %v7875_v36 }
 0x55d   :  { %3293 = vmatpush.bf16.msrb.mxu0 %v7876_v40  ;;  %3306 = vmatpush.bf16.msrb.mxu1 %v7877_v45 }
 0x55e   :  { %3319 = vmatpush.bf16.msrb.mxu2 %v7878_v46  ;;  %3332 = vmatpush.bf16.msrb.mxu3 %v7879_v47 }
 0x561   :  { %3294 = vmatpush.bf16.msrb.mxu0 %v7880_v51  ;;  %3307 = vmatpush.bf16.msrb.mxu1 %v7881_v57 }
 0x562   :  { %3320 = vmatpush.bf16.msrb.mxu2 %v7882_v60  ;;  %3333 = vmatpush.bf16.msrb.mxu3 %v7883_v61  ;;  %v2919_v60 = vperm.slane %v2906_v48, 2 }
 0x565   :  { %3295 = vmatpush.bf16.msrb.mxu0 %v7884_v2  ;;  %3308 = vmatpush.bf16.msrb.mxu1 %v7885_v6 }
 0x566   :  { %3321 = vmatpush.bf16.msrb.mxu2 %v7886_v7  ;;  %3334 = vmatpush.bf16.msrb.mxu3 %v7887_v8  ;;  %v2920_v7 = vperm.slane %v2906_v48, 3 }
 0x569   :  { %3296 = vmatpush.bf16.msrb.mxu0 %v7888_v15  ;;  %3309 = vmatpush.bf16.msrb.mxu1 %v7889_v25 }
 0x56a   :  { %3322 = vmatpush.bf16.msrb.mxu2 %v7890_v29  ;;  %3335 = vmatpush.bf16.msrb.mxu3 %v7891_v30 }
 0x56d   :  { %3297 = vmatpush.bf16.msrb.mxu0 %v7892_v37  ;;  %3310 = vmatpush.bf16.msrb.mxu1 %v7893_v1 }
 0x56e   :  { %3323 = vmatpush.bf16.msrb.mxu2 %v7894_v52  ;;  %3336 = vmatpush.bf16.msrb.mxu3 %v7895_v5 }
 0x571   :  { %3298 = vmatpush.bf16.msrb.mxu0 %v7896_v20  ;;  %3311 = vmatpush.bf16.msrb.mxu1 %v7897_v56 }
 0x572   :  { %3324 = vmatpush.bf16.msrb.mxu2 %v7898_v42  ;;  %3337 = vmatpush.bf16.msrb.mxu3 %v7899_v55 }
 0x5b0   :  { %v2935_v59 = vpop.f32.mrf.mxu0  ;;  %v2948_v27 = vpop.f32.mrf.mxu1 }
 0x5b1   :  { %v3034_v13 = vadd.f32 %v2935_v59, %v2908_v31  ;;  %v3035_v9 = vadd.f32 %v2948_v27, %v2909_v43 }
 0x5b3   :  { %v4618_v17 = vmul.f32 -1.442695, %v3034_v13  ;;  %v4619_v19 = vmul.f32 -1.442695, %v3035_v9 }
 0x5b5   :  { %5203 = vpow2.f32 %v4618_v17 }
 0x5b6   :  { %5205 = vpow2.f32 %v4619_v19 }
 0x5b7   :  { %v2961_v21 = vpop.f32.mrf.mxu2  ;;  %v2974_v32 = vpop.f32.mrf.mxu3 }
 0x5b8   :  { %v3036_v62 = vadd.f32 %v2961_v21, %v2910_v14  ;;  %v3037_v3 = vadd.f32 %v2974_v32, %v2911_v39  ;;  %v2937_v54 = vpop.f32.mrf.mxu0  ;;  %v2950_v4 = vpop.f32.mrf.mxu1 }
 0x5ba   :  { %v4620_v18 = vmul.f32 -1.442695, %v3036_v62  ;;  %v4621_v44 = vmul.f32 -1.442695, %v3037_v3 }
 0x5bb   :  { %v5204_v63 = vpop.eup %5203 }
 0x5bc   :  { %v5206_v50 = vpop.eup %5205  ;;  %v7162_v53 = vadd.f32 1.0, %v5204_v63  ;;  %5207 = vpow2.f32 %v4620_v18 }
 0x5bd   :  { %v7164_v49 = vadd.f32 1.0, %v5206_v50  ;;  %5209 = vpow2.f32 %v4621_v44 }
 0x5be   :  { %5211 = vrcp.f32 %v7162_v53  ;;  %vm3079_vm14 = vweird.f32 %v7162_v53  ;;  %v3085_v18 = vand.u32 2147483648, %v7162_v53  ;;  %v3083_v63 = vand.u32 2147483647, %v7162_v53 }
 0x5bf   :  { %5213 = vrcp.f32 %v7164_v49  ;;  %v2963_v38 = vpop.f32.mrf.mxu2  ;;  %v2976_v10 = vpop.f32.mrf.mxu3  ;;  %vm3094_vm10 = vweird.f32 %v7164_v49  ;;  %v3098_v55 = vand.u32 2147483647, %v7164_v49  ;;  %v3100_v39 = vand.u32 2147483648, %v7164_v49 }
 0x5c0   :  { %v2991_v12 = vpop.f32.mrf.mxu0  ;;  %v3004_v22 = vpop.f32.mrf.mxu1  ;;  %vm3084_vm13 = vcmp.eq.f32.partialorder %v3083_v63, 8.507059e+37 }
 0x5c1   :  { %v3038_v23 = vadd.f32 %v2991_v12, %v2917_v11  ;;  %v3039_v28 = vadd.f32 %v3004_v22, %v2918_v16  ;;  %v3101_v10 = vor.u32 1.1754944e-38, %v3100_v39  ;;  %vm3099_vm2 = vcmp.eq.f32.partialorder %v3098_v55, 8.507059e+37 }
 0x5c2   :  { %v5208_v24 = vpop.eup %5207 }
 0x5c3   :  { %v5210_v34 = vpop.eup %5209  ;;  %v7168_v35 = vadd.f32 1.0, %v5208_v24  ;;  %v4622_v46 = vmul.f32 -1.442695, %v3038_v23  ;;  %v4623_v57 = vmul.f32 -1.442695, %v3039_v28  ;;  %v3086_v24 = vor.u32 1.1754944e-38, %v3085_v18 }
 0x5c4   :  { %v7170_v36 = vpop.eup %5211  ;;  %v7172_v40 = vadd.f32 1.0, %v5210_v34 }
 0x5c5   :  { %v7174_v45 = vpop.eup %5213  ;;  %5215 = vrcp.f32 %v7168_v35  ;;  %v3075_v47 = vmul.f32 %v7170_v36, %v7162_v53  ;;  %v3113_v43 = vand.u32 2147483647, %v7168_v35  ;;  %v3115_v59 = vand.u32 2147483648, %v7168_v35 }
 0x5c6   :  { %v3090_v51 = vmul.f32 %v7174_v45, %v7164_v49  ;;  %5217 = vrcp.f32 %v7172_v40  ;;  %vm3095_vm0 = vweird.f32 %v7174_v45  ;;  %vm3080_vm12 = vweird.f32 %v7170_v36 }
 0x5c7   :  { %v3017_v61 = vpop.f32.mrf.mxu2  ;;  %v3030_v2 = vpop.f32.mrf.mxu3  ;;  %5219 = vpow2.f32 %v4622_v46  ;;  %v3076_v29 = vsub.f32 1.0, %v3075_v47  ;;  %vm7206_vm6 = vmor %vm3094_vm10, %vm3095_vm0  ;;  %vm3109_vm7 = vweird.f32 %v7168_v35  ;;  %v3116_v44 = vor.u32 1.1754944e-38, %v3115_v59 }
 0x5c8   :  { %v3091_v6 = vsub.f32 1.0, %v3090_v51  ;;  %v2993_v8 = vpop.f32.mrf.mxu0  ;;  %v3006_v15 = vpop.f32.mrf.mxu1  ;;  %v3040_v25 = vadd.f32 %v3017_v61, %v2919_v60  ;;  %5221 = vpow2.f32 %v4623_v57  ;;  %v3041_v30 = vadd.f32 %v3030_v2, %v2920_v7  ;;  %vm7221_vm8 = vmor %vm3079_vm14, %vm3080_vm12  ;;  %v7904_v51 = vld [vmem:[#allocation54_spill] sm:$0xff] }
 0x5c9   :  { %v3077_v42 = vmul.f32 %v7170_v36, %v3076_v29  ;;  %vm3114_vm9 = vcmp.eq.f32.partialorder %v3113_v43, 8.507059e+37  ;;  %v3128_v2 = vand.u32 2147483647, %v7172_v40  ;;  %vm3124_vm10 = vweird.f32 %v7172_v40 }
 0x5ca   :  { %v4624_v1 = vmul.f32 -1.442695, %v3040_v25  ;;  %v3092_v52 = vmul.f32 %v7174_v45, %v3091_v6  ;;  %v4625_v20 = vmul.f32 -1.442695, %v3041_v30  ;;  %v3130_v6 = vand.u32 2147483648, %v7172_v40 }
 0x5cb   :  { %v5216_v37 = vpop.eup %5215  ;;  %v3078_v62 = vadd.f32 %v7170_v36, %v3077_v42 }
 0x5cc   :  { %v3105_v5 = vmul.f32 %v5216_v37, %v7168_v35  ;;  %5223 = vpow2.f32 %v4624_v1  ;;  %v7184_v56 = vpop.eup %5217  ;;  %v3093_v17 = vadd.f32 %v7174_v45, %v3092_v52  ;;  %vm3110_vm3 = vweird.f32 %v5216_v37 }
 0x5cd   :  { %v5220_v31 = vpop.eup %5219  ;;  %5225 = vpow2.f32 %v4625_v20  ;;  %v3120_v21 = vmul.f32 %v7184_v56, %v7172_v40  ;;  %vm3111_vm15 = vmor %vm3109_vm7, %vm3110_vm3  ;;  %v3082_v53 = vsel %vm7221_vm8, %v7170_v36, %v3078_v62  ;;  %vm3125_vm11 = vweird.f32 %v7184_v56 }
 0x5ce   :  { %v3106_v0 = vsub.f32 1.0, %v3105_v5  ;;  %v5222_v9 = vpop.eup %5221  ;;  %v7193_v14 = vadd.f32 1.0, %v5220_v31  ;;  %v3097_v50 = vsel %vm7206_vm6, %v7174_v45, %v3093_v17  ;;  %v3087_v46 = vsel %vm3084_vm13, %v3086_v24, %v3082_v53  ;;  %vm7256_vm0 = vmor %vm3124_vm10, %vm3125_vm11 }
 0x5cf   :  { %v3019_v27 = vpop.f32.mrf.mxu2  ;;  %v3032_v13 = vpop.f32.mrf.mxu3  ;;  %v7199_v32 = vadd.f32 1.0, %v5222_v9  ;;  %v3121_v12 = vsub.f32 1.0, %v3120_v21  ;;  %v3102_v28 = vsel %vm3099_vm2, %v3101_v10, %v3097_v50  ;;  %vm7260_vm3 = vcmp.eq.f32.partialorder %v3128_v2, 8.507059e+37  ;;  %v3213_v2 = vld [vmem:[#allocation2 + $0x7] ss:$8 sm:$0xf] }
 0x5d0   :  { %v3107_v19 = vmul.f32 %v5216_v37, %v3106_v0  ;;  %5227 = vrcp.f32 %v7193_v14  ;;  %v3198_v57 = vmul.f32 %v3102_v28, %v7904_v51  ;;  %v3131_v20 = vor.u32 1.1754944e-38, %v3130_v6 }
 0x5d1   :  { %5229 = vrcp.f32 %v7199_v32  ;;  %v3122_v47 = vmul.f32 %v7184_v56, %v3121_v12  ;;  %vm3154_vm12 = vweird.f32 %v7199_v32  ;;  %v3158_v27 = vand.u32 2147483647, %v7199_v32 }
 0x5d2   :  { %v3108_v54 = vadd.f32 %v5216_v37, %v3107_v19  ;;  %v5224_v4 = vpop.eup %5223  ;;  %v3160_v13 = vand.u32 2147483648, %v7199_v32  ;;  %vm3139_vm8 = vweird.f32 %v7193_v14  ;;  %v3145_v62 = vand.u32 2147483648, %v7193_v14 }
 0x5d3   :  { %v5226_v49 = vpop.eup %5225  ;;  %v7225_v16 = vadd.f32 1.0, %v5224_v4  ;;  %v3123_v29 = vadd.f32 %v7184_v56, %v3122_v47  ;;  %v3143_v4 = vand.u32 2147483647, %v7193_v14  ;;  %vm3159_vm10 = vcmp.eq.f32.partialorder %v3158_v27, 8.507059e+37 }
 0x5d4   :  { %v3112_v48 = vsel %vm3111_vm15, %v5216_v37, %v3108_v54  ;;  %v7230_v23 = vadd.f32 1.0, %v5226_v49  ;;  %v3146_v10 = vor.u32 1.1754944e-38, %v3145_v62  ;;  %v3217_v6 = vperm.slane %v3213_v2, 0 }
 0x5d5   :  { %v3117_v11 = vsel %vm3114_vm9, %v3116_v44, %v3112_v48  ;;  %5231 = vrcp.f32 %v7225_v16  ;;  %v3175_v40 = vand.u32 2147483648, %v7225_v16  ;;  %v3127_v0 = vsel %vm7256_vm0, %v7184_v56, %v3123_v29  ;;  %v3215_v56 = vld [vmem:[#allocation2 + $0x20] ss:$8 sm:$0xf] }
 0x5d6   :  { %v3194_v22 = vmul.f32 2.0, %v3117_v11  ;;  %v7233_v34 = vpop.eup %5227  ;;  %5233 = vrcp.f32 %v7230_v23  ;;  %v3173_v59 = vand.u32 2147483647, %v7225_v16  ;;  %vm3169_vm14 = vweird.f32 %v7225_v16 }
 0x5d7   :  { %v7235_v45 = vpop.eup %5229  ;;  %v3135_v36 = vmul.f32 %v7233_v34, %v7193_v14  ;;  %vm3140_vm15 = vweird.f32 %v7233_v34  ;;  %v3132_v21 = vsel %vm7260_vm3, %v3131_v20, %v3127_v0  ;;  %v3176_v3 = vor.u32 1.1754944e-38, %v3175_v40 }
 0x5d8   :  { %v4626_v35 = vadd.f32 -1.0, %v3194_v22  ;;  %v3150_v61 = vmul.f32 %v7235_v45, %v7199_v32  ;;  %vm3155_vm6 = vweird.f32 %v7235_v45  ;;  %vm3174_vm13 = vcmp.eq.f32.partialorder %v3173_v59, 8.507059e+37  ;;  %vm3141_vm11 = vmor %vm3139_vm8, %vm3140_vm15  ;;  %v4933_v59 = vld [vmem:[#allocation8 + $0x28] sm:$0xff] }
 0x5d9   :  { %v3136_v7 = vsub.f32 1.0, %v3135_v36  ;;  %vm7282_vm9 = vmor %vm3154_vm12, %vm3155_vm6  ;;  %v3161_v44 = vor.u32 1.1754944e-38, %v3160_v13  ;;  %vm3144_vm0 = vcmp.eq.f32.partialorder %v3143_v4, 8.507059e+37  ;;  %v3219_v5 = vperm.slane %v3213_v2, 2 }
 0x5da   :  { %v3200_v60 = vmul.f32 %v4626_v35, %v3087_v46  ;;  %v3151_v8 = vsub.f32 1.0, %v3150_v61  ;;  %v3190_v35 = vand.u32 2147483648, %v7230_v23  ;;  %v3220_v20 = vperm.slane %v3213_v2, 3 }
 0x5db   :  { %v5232_v25 = vpop.eup %5231  ;;  %v3137_v42 = vmul.f32 %v7233_v34, %v3136_v7  ;;  %v3218_v7 = vperm.slane %v3213_v2, 1  ;;  %v4941_v2 = vld [vmem:[#allocation8 + $0x68] sm:$0xff] }
 0x5dc   :  { %v7246_v15 = vadd.f32 %v3200_v60, %v3198_v57  ;;  %v3152_v30 = vmul.f32 %v7235_v45, %v3151_v8  ;;  %v3165_v37 = vmul.f32 %v5232_v25, %v7225_v16  ;;  %v7254_v1 = vpop.eup %5233  ;;  %vm3170_vm7 = vweird.f32 %v5232_v25 }
 0x5dd   :  { %v3180_v9 = vmul.f32 %v7254_v1, %v7230_v23  ;;  %v3138_v19 = vadd.f32 %v7233_v34, %v3137_v42  ;;  %vm3171_vm2 = vmor %vm3169_vm14, %vm3170_vm7  ;;  %vm3185_vm3 = vweird.f32 %v7254_v1  ;;  %v3191_v46 = vor.u32 1.1754944e-38, %v3190_v35 }
 0x5de   :  { %5235 = vtanh.f32 %v7246_v15  ;;  %v3166_v55 = vsub.f32 1.0, %v3165_v37  ;;  %v3153_v31 = vadd.f32 %v7235_v45, %v3152_v30  ;;  %v4935_v37 = vld [vmem:[#allocation8 + $0x38] sm:$0xff] }
 0x5df   :  { %v3181_v50 = vsub.f32 1.0, %v3180_v9  ;;  %v3142_v49 = vsel %vm3141_vm11, %v7233_v34, %v3138_v19 }
 0x5e0   :  { %v3167_v43 = vmul.f32 %v5232_v25, %v3166_v55  ;;  %v3157_v32 = vsel %vm7282_vm9, %v7235_v45, %v3153_v31  ;;  %v3147_v16 = vsel %vm3144_vm0, %v3146_v10, %v3142_v49 }
 0x5e1   :  { %v3162_v11 = vsel %vm3159_vm10, %v3161_v44, %v3157_v32  ;;  %v3182_v53 = vmul.f32 %v7254_v1, %v3181_v50  ;;  %v3227_v32 = vperm.slane %v3215_v56, 1  ;;  %v4943_v50 = vld [vmem:[#allocation8 + $0x78] sm:$0xff] }
 0x5e2   :  { %v3168_v39 = vadd.f32 %v5232_v25, %v3167_v43  ;;  %v3199_v22 = vmul.f32 %v3162_v11, %v7084_v33 }
 0x5e3   :  { %v3183_v34 = vadd.f32 %v7254_v1, %v3182_v53 }
 0x5e4   :  { %v5236_v17 = vpop.eup %5235  ;;  %v3172_v18 = vsel %vm3171_vm2, %v5232_v25, %v3168_v39 }
 0x5e5   :  { %v3206_v54 = vmul.f32 %v5236_v17, %v3132_v21  ;;  %v3177_v63 = vsel %vm3174_vm13, %v3176_v3, %v3172_v18  ;;  %v4932_v21 = vld [vmem:[#allocation8 + $0x20] sm:$0xff] }
 0x5e6   :  { %v3195_v38 = vmul.f32 2.0, %v3177_v63  ;;  %v4931_v63 = vld [vmem:[#allocation8 + $0x18] sm:$0xff] }
 0x5e7   :  { %v3208_v48 = vperm.slane %v3206_v54, 0 }
 0x5e8   :  { %v4627_v12 = vadd.f32 -1.0, %v3195_v38 }
 0x5e9   :  { %v7298_v14 = vsel %vm1650_vm5, %v3208_v48, %v7080_v58  ;;  %vm3184_vm5 = vweird.f32 %v7230_v23  ;;  %v3188_v58 = vand.u32 2147483647, %v7230_v23 }
 0x5ea   :  { %v3201_v24 = vmul.f32 %v4627_v12, %v3147_v16  ;;  %vm3186_vm12 = vmor %vm3184_vm5, %vm3185_vm3 }
 0x5eb   :  { %v3187_v45 = vsel %vm3186_vm12, %v7254_v1, %v3183_v34  ;;  %vm3189_vm6 = vcmp.eq.f32.partialorder %v3188_v58, 8.507059e+37 }
 0x5ec   :  { %v7302_v28 = vadd.f32 %v3201_v24, %v3199_v22  ;;  %v3192_v47 = vsel %vm3189_vm6, %v3191_v46, %v3187_v45  ;;  %v4930_v22 = vld [vmem:[#allocation8 + $0x10] sm:$0xff]  ;;  %v3228_v45 = vperm.slane %v3215_v56, 2 }
 0x5ed   :  { %v4942_v24 = vld [vmem:[#allocation8 + $0x70] sm:$0xff] }
 0x5ee   :  { %5237 = vtanh.f32 %v7302_v28 }
 0x5f4   :  { %v5238_v33 = vpop.eup %5237 }
 0x5f5   :  { %v3207_v36 = vmul.f32 %v5238_v33, %v3192_v47 }
 0x5f7   :  { %v3210_v51 = vperm.slane %v3207_v36, 0  ;;  %v3234_v57 = vpack.c.bf16 %v3207_v36, %v3206_v54  ;;  %v3226_v54 = vperm.slane %v3215_v56, 0  ;;  %v3229_v36 = vperm.slane %v3215_v56, 3 }
 0x5f9   :  { %3243 = vmatmul.bf16.vlgmr.msra.gmra.mxu0 %v3234_v57  ;;  %3256 = vmatmul.bf16.vlgmr.msra.gmra.mxu1 %v3234_v57  ;;  %v7314_v60 = vsel %vm1645_vm1, %v3210_v51, %v7096_v26  ;;  %v3288_v23 = vunpack.c.h.b16 %v3234_v57  ;;  %v4934_v26 = vld [vmem:[#allocation8 + $0x30] sm:$0xff] }
 0x5fa   :  { %3269 = vmatmul.bf16.vlgmr.msra.gmra.mxu2 %v3234_v57  ;;  %3282 = vmatmul.bf16.vlgmr.msra.gmra.mxu3 %v3234_v57 }
 0x5fb   :  { %v3289_v61 = vpack.c.b16 %v3288_v23, %v3288_v23  ;;  %3693 = vmatpush.bf16.msra.mxu0 %v4935_v37  ;;  %3706 = vmatpush.bf16.msra.mxu1 %v4943_v50 }
 0x5ff   :  { %3694 = vmatpush.bf16.msra.mxu0 %v4934_v26  ;;  %3707 = vmatpush.bf16.msra.mxu1 %v4942_v24 }
 0x603   :  { %3695 = vmatpush.bf16.msra.mxu0 %v4933_v59  ;;  %3708 = vmatpush.bf16.msra.mxu1 %v4941_v2 }
 0x607   :  { %3696 = vmatpush.bf16.msra.mxu0 %v4932_v21 }
 0x609   :  { %3299 = vmatmul.bf16.vlgmr.msrb.gmra.mxu0 %v3289_v61  ;;  %3312 = vmatmul.bf16.vlgmr.msrb.gmra.mxu1 %v3289_v61 }
 0x60a   :  { %3325 = vmatmul.bf16.vlgmr.msrb.gmra.mxu2 %v3289_v61  ;;  %3338 = vmatmul.bf16.vlgmr.msrb.gmra.mxu3 %v3289_v61  ;;  %v4929_v61 = vld [vmem:[#allocation8 + $0x8] sm:$0xff] }
 0x60b   :  { %3697 = vmatpush.bf16.msra.mxu0 %v4931_v63 }
 0x60f   :  { %3698 = vmatpush.bf16.msra.mxu0 %v4930_v22 }
 0x613   :  { %3699 = vmatpush.bf16.msra.mxu0 %v4929_v61 }
 0x676   :  { %v3244_v8 = vpop.f32.mrf.mxu0  ;;  %v3257_v25 = vpop.f32.mrf.mxu1 }
 0x677   :  { %v3343_v29 = vadd.f32 %v3244_v8, %v3217_v6  ;;  %v3344_v30 = vadd.f32 %v3257_v25, %v3218_v7 }
 0x679   :  { %v4628_v1 = vmul.f32 -1.442695, %v3343_v29  ;;  %v4629_v52 = vmul.f32 -1.442695, %v3344_v30 }
 0x67b   :  { %5239 = vpow2.f32 %v4628_v1  ;;  %v4928_v1 = vld [vmem:[#allocation8] sm:$0xff] }
 0x67c   :  { %5241 = vpow2.f32 %v4629_v52  ;;  %v4940_v52 = vld [vmem:[#allocation8 + $0x60] sm:$0xff]  ;;  %3700 = vmatpush.bf16.msra.mxu0 %v4928_v1 }
 0x67d   :  { %v3270_v42 = vpop.f32.mrf.mxu2  ;;  %v3283_v55 = vpop.f32.mrf.mxu3  ;;  %3709 = vmatpush.bf16.msra.mxu1 %v4940_v52 }
 0x67e   :  { %v3345_v40 = vadd.f32 %v3270_v42, %v3219_v5  ;;  %v3346_v0 = vadd.f32 %v3283_v55, %v3220_v20  ;;  %v3246_v31 = vpop.f32.mrf.mxu0  ;;  %v3259_v43 = vpop.f32.mrf.mxu1 }
 0x680   :  { %v4630_v27 = vmul.f32 -1.442695, %v3345_v40  ;;  %v4631_v13 = vmul.f32 -1.442695, %v3346_v0 }
 0x681   :  { %v5240_v9 = vpop.eup %5239 }
 0x682   :  { %v5242_v17 = vpop.eup %5241  ;;  %v7316_v19 = vadd.f32 1.0, %v5240_v9  ;;  %5243 = vpow2.f32 %v4630_v27 }
 0x683   :  { %v7318_v39 = vadd.f32 1.0, %v5242_v17  ;;  %5245 = vpow2.f32 %v4631_v13  ;;  %v4939_v17 = vld [vmem:[#allocation8 + $0x58] sm:$0xff] }
 0x684   :  { %5247 = vrcp.f32 %v7316_v19  ;;  %vm3388_vm2 = vweird.f32 %v7316_v19  ;;  %3710 = vmatpush.bf16.msra.mxu1 %v4939_v17  ;;  %v3392_v63 = vand.u32 2147483647, %v7316_v19 }
 0x685   :  { %5249 = vrcp.f32 %v7318_v39  ;;  %v3272_v62 = vpop.f32.mrf.mxu2  ;;  %v3285_v3 = vpop.f32.mrf.mxu3  ;;  %vm3403_vm1 = vweird.f32 %v7318_v39  ;;  %v3407_v20 = vand.u32 2147483647, %v7318_v39  ;;  %v3409_v56 = vand.u32 2147483648, %v7318_v39 }
 0x686   :  { %v3300_v4 = vpop.f32.mrf.mxu0  ;;  %v3313_v18 = vpop.f32.mrf.mxu1  ;;  %vm3393_vm3 = vcmp.eq.f32.partialorder %v3392_v63, 8.507059e+37 }
 0x687   :  { %v3347_v44 = vadd.f32 %v3300_v4, %v3226_v54  ;;  %v3348_v49 = vadd.f32 %v3313_v18, %v3227_v32  ;;  %v3394_v18 = vand.u32 2147483648, %v7316_v19  ;;  %vm3408_vm0 = vcmp.eq.f32.partialorder %v3407_v20, 8.507059e+37 }
 0x688   :  { %v5244_v48 = vpop.eup %5243 }
 0x689   :  { %v5246_v38 = vpop.eup %5245  ;;  %v7322_v10 = vadd.f32 1.0, %v5244_v48  ;;  %v4632_v53 = vmul.f32 -1.442695, %v3347_v44  ;;  %v4633_v58 = vmul.f32 -1.442695, %v3348_v49 }
 0x68a   :  { %v7324_v11 = vpop.eup %5247  ;;  %v7326_v12 = vadd.f32 1.0, %v5246_v38 }
 0x68b   :  { %v7328_v16 = vpop.eup %5249  ;;  %5251 = vrcp.f32 %v7322_v10  ;;  %v3384_v34 = vmul.f32 %v7324_v11, %v7316_v19  ;;  %v3422_v40 = vand.u32 2147483647, %v7322_v10  ;;  %v3424_v0 = vand.u32 2147483648, %v7322_v10 }
 0x68c   :  { %v3399_v35 = vmul.f32 %v7328_v16, %v7318_v39  ;;  %5253 = vrcp.f32 %v7326_v12  ;;  %vm3404_vm7 = vweird.f32 %v7328_v16  ;;  %vm3389_vm15 = vweird.f32 %v7324_v11  ;;  %v4938_v39 = vld [vmem:[#allocation8 + $0x50] sm:$0xff] }
 0x68d   :  { %v3326_v46 = vpop.f32.mrf.mxu2  ;;  %v3339_v33 = vpop.f32.mrf.mxu3  ;;  %5255 = vpow2.f32 %v4632_v53  ;;  %v3385_v6 = vsub.f32 1.0, %v3384_v34  ;;  %vm7360_vm9 = vmor %vm3403_vm1, %vm3404_vm7  ;;  %vm3418_vm8 = vweird.f32 %v7322_v10  ;;  %v3425_v44 = vor.u32 1.1754944e-38, %v3424_v0  ;;  %3711 = vmatpush.bf16.msra.mxu1 %v4938_v39 }
 0x68e   :  { %v3400_v47 = vsub.f32 1.0, %v3399_v35  ;;  %v3302_v51 = vpop.f32.mrf.mxu0  ;;  %v3315_v57 = vpop.f32.mrf.mxu1  ;;  %v3349_v23 = vadd.f32 %v3326_v46, %v3228_v45  ;;  %5257 = vpow2.f32 %v4633_v58  ;;  %v3350_v7 = vadd.f32 %v3339_v33, %v3229_v36  ;;  %vm7376_vm10 = vmor %vm3388_vm2, %vm3389_vm15  ;;  %v4937_v58 = vld [vmem:[#allocation8 + $0x48] sm:$0xff] }
 0x68f   :  { %v3386_v5 = vmul.f32 %v7324_v11, %v3385_v6  ;;  %vm3423_vm11 = vcmp.eq.f32.partialorder %v3422_v40, 8.507059e+37  ;;  %v3395_v34 = vor.u32 1.1754944e-38, %v3394_v18  ;;  %v3437_v2 = vand.u32 2147483647, %v7326_v12  ;;  %v4936_v6 = vld [vmem:[#allocation8 + $0x40] sm:$0xff] }
 0x690   :  { %v4634_v25 = vmul.f32 -1.442695, %v3349_v23  ;;  %v3401_v29 = vmul.f32 %v7328_v16, %v3400_v47  ;;  %v4635_v37 = vmul.f32 -1.442695, %v3350_v7  ;;  %vm3433_vm12 = vweird.f32 %v7326_v12 }
 0x691   :  { %v5252_v8 = vpop.eup %5251  ;;  %v3387_v3 = vadd.f32 %v7324_v11, %v3386_v5  ;;  %3712 = vmatpush.bf16.msra.mxu1 %v4937_v58  ;;  %vm7412_vm1 = vcmp.eq.f32.partialorder %v3437_v2, 8.507059e+37 }
 0x692   :  { %v3414_v30 = vmul.f32 %v5252_v8, %v7322_v10  ;;  %5259 = vpow2.f32 %v4634_v25  ;;  %v7338_v26 = vpop.eup %5253  ;;  %v3402_v27 = vadd.f32 %v7328_v16, %v3401_v29  ;;  %vm3419_vm14 = vweird.f32 %v5252_v8 }
 0x693   :  { %v5256_v55 = vpop.eup %5255  ;;  %5261 = vpow2.f32 %v4635_v37  ;;  %v3429_v21 = vmul.f32 %v7338_v26, %v7326_v12  ;;  %vm3420_vm13 = vmor %vm3418_vm8, %vm3419_vm14  ;;  %v3410_v10 = vor.u32 1.1754944e-38, %v3409_v56  ;;  %v3391_v19 = vsel %vm7376_vm10, %v7324_v11, %v3387_v3 }
 0x694   :  { %v3415_v42 = vsub.f32 1.0, %v3414_v30  ;;  %v5258_v59 = vpop.eup %5257  ;;  %v7347_v9 = vadd.f32 1.0, %v5256_v55  ;;  %v3406_v50 = vsel %vm7360_vm9, %v7328_v16, %v3402_v27  ;;  %v3396_v36 = vsel %vm3393_vm3, %v3395_v34, %v3391_v19 }
 0x695   :  { %v3328_v31 = vpop.f32.mrf.mxu2  ;;  %v3341_v43 = vpop.f32.mrf.mxu3  ;;  %v7353_v62 = vadd.f32 1.0, %v5258_v59  ;;  %v3430_v22 = vsub.f32 1.0, %v3429_v21  ;;  %v3411_v35 = vsel %vm3408_vm0, %v3410_v10, %v3406_v50  ;;  %vm3434_vm5 = vweird.f32 %v7338_v26  ;;  %3713 = vmatpush.bf16.msra.mxu1 %v4936_v6 }
 0x696   :  { %v3416_v13 = vmul.f32 %v5252_v8, %v3415_v42  ;;  %5263 = vrcp.f32 %v7347_v9  ;;  %v3507_v57 = vmul.f32 %v3411_v35, %v7246_v15  ;;  %vm7408_vm6 = vmor %vm3433_vm12, %vm3434_vm5  ;;  %v3452_v18 = vand.u32 2147483647, %v7347_v9 }
 0x697   :  { %5265 = vrcp.f32 %v7353_v62  ;;  %v3431_v51 = vmul.f32 %v7338_v26, %v3430_v22  ;;  %vm3463_vm7 = vweird.f32 %v7353_v62  ;;  %v3467_v27 = vand.u32 2147483647, %v7353_v62 }
 0x698   :  { %v3417_v4 = vadd.f32 %v5252_v8, %v3416_v13  ;;  %v5260_v32 = vpop.eup %5259  ;;  %v3469_v13 = vand.u32 2147483648, %v7353_v62  ;;  %vm3453_vm5 = vcmp.eq.f32.partialorder %v3452_v18, 8.507059e+37 }
 0x699   :  { %v5262_v49 = vpop.eup %5261  ;;  %v7380_v24 = vadd.f32 1.0, %v5260_v32  ;;  %v3432_v37 = vadd.f32 %v7338_v26, %v3431_v51  ;;  %vm3468_vm3 = vcmp.eq.f32.partialorder %v3467_v27, 8.507059e+37 }
 0x69a   :  { %v3421_v48 = vsel %vm3420_vm13, %v5252_v8, %v3417_v4  ;;  %v7388_v33 = vadd.f32 1.0, %v5262_v49  ;;  %v3439_v8 = vand.u32 2147483648, %v7326_v12  ;;  %vm3448_vm13 = vweird.f32 %v7347_v9 }
 0x69b   :  { %v3426_v53 = vsel %vm3423_vm11, %v3425_v44, %v3421_v48  ;;  %5267 = vrcp.f32 %v7380_v24  ;;  %v3436_v0 = vsel %vm7408_vm6, %v7338_v26, %v3432_v37  ;;  %v3484_v12 = vand.u32 2147483648, %v7380_v24 }
 0x69c   :  { %v3503_v16 = vmul.f32 2.0, %v3426_v53  ;;  %v7386_v45 = vpop.eup %5263  ;;  %5269 = vrcp.f32 %v7388_v33  ;;  %v3440_v42 = vor.u32 1.1754944e-38, %v3439_v8  ;;  %v3482_v59 = vand.u32 2147483647, %v7380_v24 }
 0x69d   :  { %v7390_v47 = vpop.eup %5265  ;;  %v3444_v11 = vmul.f32 %v7386_v45, %v7347_v9  ;;  %vm3478_vm9 = vweird.f32 %v7380_v24  ;;  %vm3449_vm8 = vweird.f32 %v7386_v45  ;;  %v3485_v4 = vor.u32 1.1754944e-38, %v3484_v12 }
 0x69e   :  { %v4636_v46 = vadd.f32 -1.0, %v3503_v16  ;;  %v3459_v61 = vmul.f32 %v7390_v47, %v7353_v62  ;;  %vm3464_vm14 = vweird.f32 %v7390_v47  ;;  %v3441_v54 = vsel %vm7412_vm1, %v3440_v42, %v3436_v0  ;;  %vm3450_vm0 = vmor %vm3448_vm13, %vm3449_vm8 }
 0x69f   :  { %v3445_v25 = vsub.f32 1.0, %v3444_v11  ;;  %vm7432_vm2 = vmor %vm3463_vm7, %vm3464_vm14  ;;  %v3454_v62 = vand.u32 2147483648, %v7347_v9  ;;  %vm3483_vm10 = vcmp.eq.f32.partialorder %v3482_v59, 8.507059e+37  ;;  %v3470_v63 = vor.u32 1.1754944e-38, %v3469_v13  ;;  %v4948_v13 = vld [vmem:[#allocation9 + $0x20] sm:$0xff] }
 0x6a0   :  { %v3509_v23 = vmul.f32 %v4636_v46, %v3396_v36  ;;  %v3460_v29 = vsub.f32 1.0, %v3459_v61  ;;  %vm7921_vm7 = vcmp.eq.s32.totalorder %v6140_v41, 0  ;;  %v4951_v41 = vld [vmem:[#allocation9 + $0x38] sm:$0xff] }
 0x6a1   :  { %v5268_v30 = vpop.eup %5267  ;;  %v3446_v55 = vmul.f32 %v7386_v45, %v3445_v25  ;;  %v3455_v53 = vor.u32 1.1754944e-38, %v3454_v62  ;;  %v4983_v25 = vld [vmem:[%s7497_s5] ss:$0 sm:$0xff]  ;;  %3812 = vmatpush.bf16.msra.mxu2 %v4951_v41 }
 0x6a2   :  { %v3511_v7 = vadd.f32 %v3509_v23, %v3507_v57  ;;  %v3461_v15 = vmul.f32 %v7390_v47, %v3460_v29  ;;  %v3474_v1 = vmul.f32 %v5268_v30, %v7380_v24  ;;  %v7406_v52 = vpop.eup %5269  ;;  %vm3479_vm15 = vweird.f32 %v5268_v30 }
 0x6a3   :  { %v3489_v26 = vmul.f32 %v7406_v52, %v7388_v33  ;;  %v3447_v56 = vadd.f32 %v7386_v45, %v3446_v55  ;;  %vm3480_vm11 = vmor %vm3478_vm9, %vm3479_vm15  ;;  %vm3494_vm12 = vweird.f32 %v7406_v52 }
 0x6a4   :  { %5271 = vtanh.f32 %v3511_v7  ;;  %v3475_v40 = vsub.f32 1.0, %v3474_v1  ;;  %v3462_v31 = vadd.f32 %v7390_v47, %v3461_v15  ;;  %v5479_v7 = vmov 8.0  }
 0x6a5   :  { %v3490_v48 = vsub.f32 1.0, %v3489_v26  ;;  %v3451_v38 = vsel %vm3450_vm0, %v7386_v45, %v3447_v56  ;;  %v4947_v56 = vld [vmem:[#allocation9 + $0x18] sm:$0xff] }
 0x6a6   :  { %v3476_v43 = vmul.f32 %v5268_v30, %v3475_v40  ;;  %v3466_v44 = vsel %vm7432_vm2, %v7390_v47, %v3462_v31  ;;  %v3456_v16 = vsel %vm3453_vm5, %v3455_v53, %v3451_v38  ;;  %v3499_v47 = vand.u32 2147483648, %v7388_v33  ;;  %v4950_v40 = vld [vmem:[#allocation9 + $0x30] sm:$0xff] }
 0x6a7   :  { %v3471_v22 = vsel %vm3468_vm3, %v3470_v63, %v3466_v44  ;;  %v3491_v34 = vmul.f32 %v7406_v52, %v3490_v48  ;;  %3813 = vmatpush.bf16.msra.mxu2 %v4950_v40 }
 0x6a8   :  { %v3477_v3 = vadd.f32 %v5268_v30, %v3476_v43  ;;  %v3508_v35 = vmul.f32 %v3471_v22, %v7302_v28  ;;  %v3500_v51 = vor.u32 1.1754944e-38, %v3499_v47  ;;  %v4949_v43 = vld [vmem:[#allocation9 + $0x28] sm:$0xff]  ;;  %v3554_v22 = vld [vmem:[%s7498_s6] sm:$0x1] }
 0x6a9   :  { %v3492_v45 = vadd.f32 %v7406_v52, %v3491_v34  ;;  %v4984_v34 = vld [vmem:[%s7499_s7] ss:$0 sm:$0xff] }
 0x6aa   :  { %v5272_v17 = vpop.eup %5271  ;;  %v3481_v39 = vsel %vm3480_vm11, %v5268_v30, %v3477_v3 }
 0x6ab   :  { %v3515_v32 = vmul.f32 %v5272_v17, %v3441_v54  ;;  %v3486_v50 = vsel %vm3483_vm10, %v3485_v4, %v3481_v39  ;;  %3814 = vmatpush.bf16.msra.mxu2 %v4949_v43  ;;  %v4946_v54 = vld [vmem:[#allocation9 + $0x10] sm:$0xff]  ;;  %v4944_v39 = vld [vmem:[#allocation9] sm:$0xff] }
 0x6ac   :  { %v3504_v10 = vmul.f32 2.0, %v3486_v50  ;;  %v4960_v43 = vld [vmem:[#allocation11 + $0x44] sm:$0xf] }
 0x6ad   :  { %v3517_v49 = vperm.slane %v3515_v32, 0  ;;  %v4945_v32 = vld [vmem:[#allocation9 + $0x8] sm:$0xff] }
 0x6ae   :  { %v4637_v24 = vadd.f32 -1.0, %v3504_v10 }
 0x6af   :  { %v3518_v9 = vsel %vm1335_vm4, %v3517_v49, %v7298_v14  ;;  %vm3493_vm4 = vweird.f32 %v7388_v33  ;;  %v3497_v14 = vand.u32 2147483647, %v7388_v33  ;;  %3815 = vmatpush.bf16.msra.mxu2 %v4948_v13 }
 0x6b0   :  { %v3592_v19 = vpack.c.bf16 %v3518_v9, %v3518_v9  ;;  %v3510_v58 = vmul.f32 %v4637_v24, %v3456_v16  ;;  %vm3495_vm6 = vmor %vm3493_vm4, %vm3494_vm12 }
 0x6b1   :  { %v3496_v36 = vsel %vm3495_vm6, %v7406_v52, %v3492_v45  ;;  %vm3498_vm1 = vcmp.eq.f32.partialorder %v3497_v14, 8.507059e+37  ;;  %v4985_v45 = vld [vmem:[%s7501_s9] ss:$0 sm:$0xff] }
 0x6b2   :  { %3701 = vmatmul.bf16.vlgmr.msra.gmra.mxu0 %v3592_v19  ;;  %v3512_v46 = vadd.f32 %v3510_v58, %v3508_v35  ;;  %v3501_v11 = vsel %vm3498_vm1, %v3500_v51, %v3496_v36  ;;  %v4792_v51 = vld [vmem:[#allocation11 + $0x70] sm:$0xf] }
 0x6b3   :  { %3816 = vmatpush.bf16.msra.mxu2 %v4947_v56  ;;  %v4760_v56 = vld [vmem:[#allocation11 + $0x30] sm:$0xf] }
 0x6b4   :  { %5273 = vtanh.f32 %v3512_v46 }
 0x6b5   :  { %5275 = vrcp.f32 %v5479_v7  ;;  %v4784_v7 = vld [vmem:[#allocation11 + $0x60] sm:$0xf] }
 0x6b7   :  { %3817 = vmatpush.bf16.msra.mxu2 %v4946_v54 }
 0x6ba   :  { %v5274_v28 = vpop.eup %5273 }
 0x6bb   :  { %v3516_v57 = vmul.f32 %v5274_v28, %v3501_v11  ;;  %v5276_v33 = vpop.eup %5275  ;;  %3818 = vmatpush.bf16.msra.mxu2 %v4945_v32  ;;  %v4967_v28 = vld [vmem:[#allocation11 + $0x74] sm:$0xf0] }
 0x6bc   :  { %v3726_v29 = vmul.f32 8.0, %v5276_v33  ;;  %vm3730_vm14 = vweird.f32 %v5276_v33  ;;  %v4793_v11 = vor.u32 %v4967_v28, %v4792_v51 }
 0x6bd   :  { %v3519_v23 = vperm.slane %v3516_v57, 0  ;;  %v4966_v57 = vld [vmem:[#allocation11 + $0x74] sm:$0xf] }
 0x6be   :  { %v3727_v15 = vsub.f32 1.0, %v3726_v29  ;;  %3945 = vmatpush.bf16.msra.mxu3 %v4793_v11  ;;  %v4964_v29 = vld [vmem:[#allocation11 + $0x64] sm:$0xf] }
 0x6bf   :  { %v3520_v61 = vsel %vm7921_vm7, %v3519_v23, %v7314_v60  ;;  %3819 = vmatpush.bf16.msra.mxu2 %v4944_v39  ;;  %v4794_v23 = vld [vmem:[#allocation11 + $0x78] sm:$0xf0]  ;;  %v4957_v39 = vld [vmem:[#allocation11 + $0x24] sm:$0xf0] }
 0x6c0   :  { %v3593_v2 = vpack.c.bf16 %v3520_v61, %v3520_v61  ;;  %v3728_v5 = vmul.f32 %v5276_v33, %v3727_v15 }
 0x6c2   :  { %3714 = vmatmul.bf16.vlgmr.msra.gmra.mxu1 %v3593_v2  ;;  %v3729_v42 = vadd.f32 %v5276_v33, %v3728_v5  ;;  %v4797_v2 = vor.u32 %v4966_v57, %v4794_v23  ;;  %v4963_v5 = vld [vmem:[#allocation11 + $0x54] sm:$0xf0] }
 0x6c4   :  { %v7462_v31 = vsel %vm3730_vm14, %v5276_v33, %v3729_v42  ;;  %3958 = vmatpush.bf16.msrb.mxu0 %v4797_v2 }
 0x72f   :  { %v3702_v6 = vpop.f32.mrf.mxu0 }
 0x730   :  { %v3703_v30 = vadd.f32 %v4983_v25, %v3702_v6 }
 0x737   :  { %v3704_v8 = vpop.f32.mrf.mxu0 }
 0x738   :  { %v4965_v8 = vld [vmem:[#allocation11 + $0x64] sm:$0xf0] }
 0x739   :  { %v4785_v25 = vor.u32 %v4965_v8, %v4784_v7 }
 0x73b   :  { %3946 = vmatpush.bf16.msra.mxu3 %v4785_v25  ;;  %v4986_v25 = vld [vmem:[%s7503_s11] ss:$0 sm:$0xff] }
 0x73f   :  { %v3715_v37 = vpop.f32.mrf.mxu1 }
 0x740   :  { %v3716_v1 = vadd.f32 %v3715_v37, %v3703_v30  ;;  %v4786_v30 = vld [vmem:[#allocation11 + $0x68] sm:$0xf0] }
 0x741   :  { %v4789_v15 = vor.u32 %v4964_v29, %v4786_v30 }
 0x742   :  { %v3719_v52 = vrot.slane %v3716_v1, 4 }
 0x743   :  { %3959 = vmatpush.bf16.msrb.mxu0 %v4789_v15  ;;  %v3591_v15 = vld [vmem:[%s7505_s13] sm:$0x3] }
 0x744   :  { %v3720_v60 = vadd.f32 %v3719_v52, %v3716_v1  ;;  %v4776_v52 = vld [vmem:[#allocation11 + $0x50] sm:$0xf] }
 0x745   :  { %v4777_v41 = vor.u32 %v4963_v5, %v4776_v52 }
 0x746   :  { %v3721_v20 = vrot.slane %v3720_v60, 2 }
 0x747   :  { %v3717_v55 = vpop.f32.mrf.mxu1  ;;  %3947 = vmatpush.bf16.msra.mxu3 %v4777_v41 }
 0x748   :  { %v3722_v0 = vadd.f32 %v3721_v20, %v3720_v60  ;;  %v4962_v60 = vld [vmem:[#allocation11 + $0x54] sm:$0xf]  ;;  %v4778_v20 = vld [vmem:[#allocation11 + $0x58] sm:$0xf0] }
 0x749   :  { %v4781_v55 = vor.u32 %v4962_v60, %v4778_v20  ;;  %v3861_v60 = vperm.slane %v3591_v15, 0 }
 0x74a   :  { %v3723_v12 = vrot.slane %v3722_v0, 1 }
 0x74b   :  { %3960 = vmatpush.bf16.msrb.mxu0 %v4781_v55 }
 0x74c   :  { %v3724_v59 = vadd.f32 %v3723_v12, %v3722_v0  ;;  %v4768_v0 = vld [vmem:[#allocation11 + $0x40] sm:$0xf]  ;;  %v4961_v12 = vld [vmem:[#allocation11 + $0x44] sm:$0xf0] }
 0x74e   :  { %v3732_v27 = vmul.f32 %v7462_v31, %v3724_v59  ;;  %v4769_v59 = vor.u32 %v4961_v12, %v4768_v0 }
 0x750   :  { %v3733_v26 = vsub.f32 %v3716_v1, %v3732_v27  ;;  %v4770_v27 = vld [vmem:[#allocation11 + $0x48] sm:$0xf0]  ;;  %3948 = vmatpush.bf16.msra.mxu3 %v4769_v59 }
 0x752   :  { %v3734_v17 = vmul.f32 %v3733_v26, %v3733_v26 }
 0x754   :  { %v3735_v21 = vrot.slane %v3734_v17, 4 }
 0x756   :  { %v3736_v3 = vadd.f32 %v3735_v21, %v3734_v17  ;;  %v4959_v21 = vld [vmem:[#allocation11 + $0x34] sm:$0xf0] }
 0x757   :  { %v4761_v54 = vor.u32 %v4959_v21, %v4760_v56 }
 0x758   :  { %v3737_v62 = vrot.slane %v3736_v3, 2 }
 0x759   :  { %3949 = vmatpush.bf16.msra.mxu3 %v4761_v54 }
 0x75a   :  { %v3738_v4 = vadd.f32 %v3737_v62, %v3736_v3  ;;  %v4958_v3 = vld [vmem:[#allocation11 + $0x34] sm:$0xf]  ;;  %v4762_v62 = vld [vmem:[#allocation11 + $0x38] sm:$0xf0] }
 0x75b   :  { %v4765_v32 = vor.u32 %v4958_v3, %v4762_v62 }
 0x75c   :  { %v3739_v18 = vrot.slane %v3738_v4, 1 }
 0x75e   :  { %v3740_v44 = vadd.f32 %v3739_v18, %v3738_v4 }
 0x760   :  { %v3741_v63 = vmul.f32 %v3740_v44, %v7462_v31  ;;  %v4752_v44 = vld [vmem:[#allocation11 + $0x20] sm:$0xf] }
 0x762   :  { %v3742_v50 = vadd.f32 1e-05, %v3741_v63  ;;  %v4956_v63 = vld [vmem:[#allocation11 + $0x24] sm:$0xf] }
 0x764   :  { %5277 = vrsqrt.f32 %v3742_v50  ;;  %vm3749_vm9 = vweird.f32 %v3742_v50 }
 0x76a   :  { %v5278_v48 = vpop.eup %5277 }
 0x76b   :  { %v3744_v49 = vmul.f32 %v5278_v48, %v3742_v50  ;;  %vm3750_vm15 = vweird.f32 %v5278_v48  ;;  %v4753_v50 = vor.u32 %v4957_v39, %v4752_v44 }
 0x76c   :  { %vm3751_vm8 = vmor %vm3749_vm9, %vm3750_vm15 }
 0x76d   :  { %v3745_v38 = vmul.f32 %v5278_v48, %v3744_v49  ;;  %3950 = vmatpush.bf16.msra.mxu3 %v4753_v50 }
 0x76f   :  { %v3746_v10 = vmul.f32 0.5, %v3745_v38 }
 0x771   :  { %v3747_v53 = vsub.f32 1.5, %v3746_v10 }
 0x773   :  { %v3748_v9 = vmul.f32 %v5278_v48, %v3747_v53  ;;  %v4744_v53 = vld [vmem:[#allocation11 + $0x10] sm:$0xf] }
 0x775   :  { %v3752_v24 = vsel %vm3751_vm8, %v5278_v48, %v3748_v9  ;;  %v4754_v48 = vld [vmem:[#allocation11 + $0x28] sm:$0xf0] }
 0x776   :  { %v3753_v19 = vmul.f32 %v3752_v24, %v3554_v22  ;;  %v4757_v38 = vor.u32 %v4956_v63, %v4754_v48  ;;  %v4955_v22 = vld [vmem:[#allocation11 + $0x14] sm:$0xf0]  ;;  %v4954_v24 = vld [vmem:[#allocation11 + $0x14] sm:$0xf] }
 0x777   :  { %v4745_v9 = vor.u32 %v4955_v22, %v4744_v53 }
 0x778   :  { %v3754_v16 = vperm.slane %v3753_v19, 0  ;;  %v4746_v19 = vld [vmem:[#allocation11 + $0x18] sm:$0xf0] }
 0x779   :  { %3951 = vmatpush.bf16.msra.mxu3 %v4745_v9 }
 0x77a   :  { %v3755_v35 = vmul.f32 %v3754_v16, %v3733_v26  ;;  %v4773_v26 = vor.u32 %v4960_v43, %v4770_v27 }
 0x77c   :  { %v3759_v58 = vadd.f32 %v4984_v34, %v3755_v35  ;;  %3961 = vmatpush.bf16.msrb.mxu0 %v4773_v26  ;;  %v4749_v34 = vor.u32 %v4954_v24, %v4746_v19 }
 0x77e   :  { %v3760_v46 = vpack.c.bf16 %v3759_v58, %v3759_v58  ;;  %v4736_v58 = vld [vmem:[#allocation11] sm:$0xf] }
 0x780   :  { %3820 = vmatmul.bf16.vlgmr.msra.gmra.mxu2 %v3760_v46  ;;  %3962 = vmatpush.bf16.msrb.mxu0 %v4765_v32  ;;  %v4953_v46 = vld [vmem:[#allocation11 + $0x4] sm:$0xf0] }
 0x784   :  { %3963 = vmatpush.bf16.msrb.mxu0 %v4757_v38 }
 0x788   :  { %3964 = vmatpush.bf16.msrb.mxu0 %v4749_v34 }
 0x803   :  { %v3821_v47 = vpop.f32.mrf.mxu2 }
 0x804   :  { %v3822_v14 = vadd.f32 %v4985_v45, %v3821_v47  ;;  %v4952_v45 = vld [vmem:[#allocation11 + $0x4] sm:$0xf]  ;;  %v4737_v47 = vor.u32 %v4953_v46, %v4736_v58 }
 0x806   :  { %v3825_v36 = vrot.slane %v3822_v14, 4  ;;  %3952 = vmatpush.bf16.msra.mxu3 %v4737_v47 }
 0x808   :  { %v3826_v61 = vadd.f32 %v3825_v36, %v3822_v14 }
 0x80a   :  { %v3827_v6 = vrot.slane %v3826_v61, 2 }
 0x80b   :  { %v3823_v33 = vpop.f32.mrf.mxu2 }
 0x80c   :  { %v3828_v37 = vadd.f32 %v3827_v6, %v3826_v61  ;;  %v3573_v6 = vld [vmem:[%s7502_s10] sm:$0x1]  ;;  %s5480_s10 = smov [#allocation13]  }
 0x80d   :  { %s4027_s11 = sshll.u32 %s5480_s10, 4  ;;  %s4028_s11 = int_to_ptr.vmem [resolvable:$true] %s4027_s11 }
 0x80e   :  { %v3829_v1 = vrot.slane %v3828_v37, 1 }
 0x810   :  { %v3830_v42 = vadd.f32 %v3829_v1, %v3828_v37  ;;  %v3862_v1 = vperm.slane %v3591_v15, 1 }
 0x812   :  { %v3831_v40 = vmul.f32 %v3830_v42, %v7462_v31 }
 0x814   :  { %v3832_v13 = vsub.f32 %v3822_v14, %v3831_v40  ;;  %v4738_v14 = vld [vmem:[#allocation11 + $0x8] sm:$0xf0] }
 0x815   :  { %v4741_v51 = vor.u32 %v4952_v45, %v4738_v14 }
 0x816   :  { %v3833_v17 = vmul.f32 %v3832_v13, %v3832_v13 }
 0x817   :  { %3965 = vmatpush.bf16.msrb.mxu0 %v4741_v51 }
 0x818   :  { %v3834_v4 = vrot.slane %v3833_v17, 4 }
 0x81a   :  { %v3835_v18 = vadd.f32 %v3834_v4, %v3833_v17 }
 0x81c   :  { %v3836_v49 = vrot.slane %v3835_v18, 2 }
 0x81e   :  { %v3837_v10 = vadd.f32 %v3836_v49, %v3835_v18 }
 0x820   :  { %v3838_v16 = vrot.slane %v3837_v10, 1 }
 0x822   :  { %v3839_v35 = vadd.f32 %v3838_v16, %v3837_v10 }
 0x824   :  { %v3840_v36 = vmul.f32 %v3839_v35, %v7462_v31 }
 0x826   :  { %v3841_v28 = vadd.f32 1e-05, %v3840_v36 }
 0x828   :  { %5279 = vrsqrt.f32 %v3841_v28  ;;  %vm3848_vm13 = vweird.f32 %v3841_v28 }
 0x82e   :  { %v5280_v11 = vpop.eup %5279 }
 0x82f   :  { %v3843_v57 = vmul.f32 %v5280_v11, %v3841_v28  ;;  %vm3849_vm2 = vweird.f32 %v5280_v11 }
 0x830   :  { %vm3850_vm11 = vmor %vm3848_vm13, %vm3849_vm2 }
 0x831   :  { %v3844_v23 = vmul.f32 %v5280_v11, %v3843_v57 }
 0x833   :  { %v3845_v61 = vmul.f32 0.5, %v3844_v23 }
 0x835   :  { %v3846_v2 = vsub.f32 1.5, %v3845_v61 }
 0x837   :  { %v3847_v7 = vmul.f32 %v5280_v11, %v3846_v2 }
 0x839   :  { %v3851_v8 = vsel %vm3850_vm11, %v5280_v11, %v3847_v7 }
 0x83a   :  { %v3852_v31 = vmul.f32 %v3851_v8, %v3573_v6 }
 0x83c   :  { %v3853_v33 = vperm.slane %v3852_v31, 0 }
 0x83e   :  { %v3854_v29 = vmul.f32 %v3853_v33, %v3832_v13 }
 0x840   :  { %v3858_v30 = vadd.f32 %v4986_v25, %v3854_v29 }
 0x842   :  { %v3859_v37 = vpack.c.bf16 %v3858_v30, %v3858_v30 }
 0x844   :  { %3953 = vmatmul.bf16.vlgmr.msra.gmra.mxu3 %v3859_v37  ;;  %3966 = vmatmul.bf16.vlgmr.msrb.gmra.mxu0 %v3859_v37 }
 0x8c1   :  { %v3967_v52 = vpop.f32.mrf.mxu0 }
 0x8c2   :  { %v3968_v5 = vadd.f32 %v3967_v52, %v3862_v1 }
 0x8c4   :  { %v4799_v41 = vmul.f32 -1.442695, %v3968_v5 }
 0x8c6   :  { %5281 = vpow2.f32 %v4799_v41 }
 0x8c7   :  { %v3954_v20 = vpop.f32.mrf.mxu3 }
 0x8c8   :  { %v3955_v42 = vadd.f32 %v3954_v20, %v3861_v60 }
 0x8c9   :  { %v3969_v55 = vpop.f32.mrf.mxu0 }
 0x8ca   :  { %v4798_v40 = vmul.f32 -1.442695, %v3955_v42 }
 0x8cc   :  { %v5282_v0 = vpop.eup %5281  ;;  %5283 = vpow2.f32 %v4798_v40 }
 0x8cd   :  { %v3978_v12 = vadd.f32 1.0, %v5282_v0 }
 0x8cf   :  { %5285 = vrcp.f32 %v3978_v12  ;;  %v3956_v43 = vpop.f32.mrf.mxu3  ;;  %v4005_v56 = vand.u32 2147483648, %v3978_v12  ;;  %v4003_v3 = vand.u32 2147483647, %v3978_v12  ;;  %vm3999_vm0 = vweird.f32 %v3978_v12 }
 0x8d1   :  { %v4006_v32 = vor.u32 1.1754944e-38, %v4005_v56  ;;  %vm4004_vm5 = vcmp.eq.f32.partialorder %v4003_v3, 8.507059e+37 }
 0x8d2   :  { %v5284_v59 = vpop.eup %5283 }
 0x8d3   :  { %v3977_v27 = vadd.f32 1.0, %v5284_v59 }
 0x8d5   :  { %v5286_v13 = vpop.eup %5285  ;;  %5287 = vrcp.f32 %v3977_v27  ;;  %v3990_v39 = vand.u32 2147483648, %v3977_v27  ;;  %v3988_v48 = vand.u32 2147483647, %v3977_v27  ;;  %vm3984_vm4 = vweird.f32 %v3977_v27 }
 0x8d6   :  { %v3995_v26 = vmul.f32 %v5286_v13, %v3978_v12  ;;  %vm4000_vm10 = vweird.f32 %v5286_v13 }
 0x8d7   :  { %vm4001_vm3 = vmor %vm3999_vm0, %vm4000_vm10  ;;  %v3991_v38 = vor.u32 1.1754944e-38, %v3990_v39  ;;  %vm3989_vm1 = vcmp.eq.f32.partialorder %v3988_v48, 8.507059e+37 }
 0x8d8   :  { %v3996_v17 = vsub.f32 1.0, %v3995_v26 }
 0x8da   :  { %v3997_v21 = vmul.f32 %v5286_v13, %v3996_v17 }
 0x8db   :  { %v5288_v54 = vpop.eup %5287 }
 0x8dc   :  { %v3980_v62 = vmul.f32 %v5288_v54, %v3977_v27  ;;  %v3998_v4 = vadd.f32 %v5286_v13, %v3997_v21  ;;  %vm3985_vm12 = vweird.f32 %v5288_v54 }
 0x8dd   :  { %vm3986_vm6 = vmor %vm3984_vm4, %vm3985_vm12 }
 0x8de   :  { %v3981_v18 = vsub.f32 1.0, %v3980_v62  ;;  %v4002_v44 = vsel %vm4001_vm3, %v5286_v13, %v3998_v4 }
 0x8df   :  { %v4007_v63 = vsel %vm4004_vm5, %v4006_v32, %v4002_v44 }
 0x8e0   :  { %v3982_v50 = vmul.f32 %v5288_v54, %v3981_v18  ;;  %4010 = vst [vmem:[#allocation13] sm:$0xff] %v4007_v63 }
 0x8e1   :  { %4032 = dma.vmem_to_hbm [thread:$0]  %s4028_s11, 128, %s4030_s25, [#allocation14]  }
 0x8e2   :  { %v3983_v49 = vadd.f32 %v5288_v54, %v3982_v50 }
 0x8e4   :  { %v3987_v10 = vsel %vm3986_vm6, %v5288_v54, %v3983_v49 }
 0x8e5   :  { %v3992_v53 = vsel %vm3989_vm1, %v3991_v38, %v3987_v10 }
 0x8e6   :  { %4009 = vst [vmem:[#allocation12] sm:$0xff] %v3992_v53 }
 0x8e7   :  { %4021 = dma.vmem_to_hbm [thread:$0]  %s4017_s28, 128, %s4019_s27, [#allocation5]  }
 0x8e8   :  { %5463 = dma.done.wait [#allocation5], 128  }
 0x8e9   :  { %5464 = vsyncadd [#allocation5], 4294967168 }
 0x8ea   :  { %5465 = dma.done.wait [#allocation14], 128  }
 0x8eb   :  { %5466 = vsyncadd [#allocation14], 4294967168 }
 0x8ec   :  { %4041 = vsyncpa [#allocation4], 1 }
 0x8ed   :  { %4042 = vsyncpa [#allocation7], 1 }
 0x8ee   :  { %4043 = vsyncpa [#allocation10], 1 }
 0x8ef   :  { %4044 = vsyncpa [#allocation5], 1 }
 0x8f0   :  { %4045 = vsyncpa [#allocation14], 1 }

</bundles_post_ra>
